<compile_context>
chip_gen: v5e
topology: v5e:2x2
jax: 0.10.0
libtpu: 0.0.40
codegen_flags: <defaults>
</compile_context>

<pallas_src>
import functools

import jax
import jax.numpy as jnp
from jax.experimental import pallas as pl
from jax.experimental.pallas import tpu as pltpu


_VMEM_LIMIT = 32 * 1024 * 1024


def _pick_td(dout, min_steps=4):
    """Largest depth tile that still leaves >= min_steps depth grid steps."""
    for t in (8, 4, 2, 1):
        if dout % t == 0 and dout // t >= min_steps:
            return t
    return 1


def _compiler_params():
    return pltpu.CompilerParams(
        dimension_semantics=("parallel", "parallel"),
        vmem_limit_bytes=_VMEM_LIMIT)


# -----------------------------------------------------------------------------
# Kernel 1: dilated 3x3x3 conv (stride 1) + folded BN + ReLU
# -----------------------------------------------------------------------------
def _dilated3_kernel(x_ref, w_ref, b_ref, o_ref, *, rate, Wp, Fv, td):
    # x_ref: (Dp, Cin, Hp*Wp)     zero-padded input for one batch element
    # w_ref: (Cout, 27*Cin)       rows ordered (ky, kx, kz, cin), BN scale folded
    # b_ref: (Cout, 1)            folded BN bias
    # o_ref: (td, Cout, Fv)       output lanes l = h*Wp + w  (junk at w >= W)
    w = w_ref[...]
    b = b_ref[...]
    d0 = pl.program_id(1) * td
    for d in range(td):
        # kz slabs stacked along sublanes: rows = (kz, cin)
        xz = jnp.concatenate([x_ref[d0 + d + kz * rate] for kz in range(3)],
                             axis=0)                              # (3*Cin, F)
        # im2col patch: 9 static lane shifts, sublane-aligned concat
        patch = jnp.concatenate(
            [xz[:, rate * (ky * Wp + kx):rate * (ky * Wp + kx) + Fv]
             for ky in range(3) for kx in range(3)], axis=0)      # (27*Cin, Fv)
        y = jnp.dot(w, patch, preferred_element_type=jnp.float32)
        o_ref[d] = jnp.maximum(y + b, 0.0).astype(o_ref.dtype)


def dilated_conv3_bn_relu(x_flat, w_flat, bias, *, rate, Wp):
    # x_flat: (N, D + 2r, C, (H + 2r) * Wp), zero padded, Wp = W + 2r.
    N, Dp, C, F = x_flat.shape
    Cout = w_flat.shape[0]
    Dout = Dp - 2 * rate
    Hp = F // Wp
    H = Hp - 2 * rate
    Fv = H * Wp - 2 * rate
    td = _pick_td(Dout)
    flops = 2 * N * Dout * Fv * 27 * C * Cout
    bytes_accessed = 4 * (N * Dp * C * F + 27 * Cout * C + Cout
                          + N * Dout * Cout * Fv)
    kern = functools.partial(_dilated3_kernel, rate=rate, Wp=Wp, Fv=Fv, td=td)
    return pl.pallas_call(
        kern,
        out_shape=jax.ShapeDtypeStruct((N, Dout, Cout, Fv), x_flat.dtype),
        grid=(N, Dout // td),
        in_specs=[
            pl.BlockSpec((None, Dp, C, F), lambda n, dt: (n, 0, 0, 0)),
            pl.BlockSpec(w_flat.shape, lambda n, dt: (0, 0)),
            pl.BlockSpec((Cout, 1), lambda n, dt: (0, 0)),
        ],
        out_specs=pl.BlockSpec((None, td, Cout, Fv),
                               lambda n, dt: (n, dt, 0, 0)),
        compiler_params=_compiler_params(),
        cost_estimate=pl.CostEstimate(flops=flops, transcendentals=0,
                                      bytes_accessed=bytes_accessed),
    )(x_flat, w_flat, bias)


# -----------------------------------------------------------------------------
# Kernel 3: dilated 3x3x3 conv on two channel-groups (concat-free) + BN + ReLU
# -----------------------------------------------------------------------------
def _dilated3_dual_kernel(a_ref, r_ref, w_ref, b_ref, o_ref, *, rate, Wp, Fv, td):
    # Same as _dilated3_kernel but the input channels come from two tensors
    # (a = dc_block output, r = maxpool residual); the kz slabs of a and r are
    # interleaved so patch rows match the original concat channel order.
    w = w_ref[...]
    b = b_ref[...]
    d0 = pl.program_id(1) * td
    for d in range(td):
        slabs = []
        for kz in range(3):
            slabs.append(a_ref[d0 + d + kz * rate])
            slabs.append(r_ref[d0 + d + kz * rate])
        stack = jnp.concatenate(slabs, axis=0)                    # (3*2C, F)
        patch = jnp.concatenate(
            [stack[:, rate * (ky * Wp + kx):rate * (ky * Wp + kx) + Fv]
             for ky in range(3) for kx in range(3)], axis=0)      # (27*2C, Fv)
        y = jnp.dot(w, patch, preferred_element_type=jnp.float32)
        o_ref[d] = jnp.maximum(y + b, 0.0).astype(o_ref.dtype)


def dilated_conv3_dual_bn_relu(a_flat, r_flat, w_flat, bias, *, rate, Wp):
    N, Dp, C, F = a_flat.shape
    Cout = w_flat.shape[0]
    Dout = Dp - 2 * rate
    Hp = F // Wp
    H = Hp - 2 * rate
    Fv = H * Wp - 2 * rate
    td = _pick_td(Dout)
    flops = 2 * N * Dout * Fv * 27 * (2 * C) * Cout
    bytes_accessed = 4 * (2 * N * Dp * C * F + 27 * Cout * 2 * C + Cout
                          + N * Dout * Cout * Fv)
    kern = functools.partial(_dilated3_dual_kernel, rate=rate, Wp=Wp, Fv=Fv,
                             td=td)
    return pl.pallas_call(
        kern,
        out_shape=jax.ShapeDtypeStruct((N, Dout, Cout, Fv), a_flat.dtype),
        grid=(N, Dout // td),
        in_specs=[
            pl.BlockSpec((None, Dp, C, F), lambda n, dt: (n, 0, 0, 0)),
            pl.BlockSpec((None, Dp, C, F), lambda n, dt: (n, 0, 0, 0)),
            pl.BlockSpec(w_flat.shape, lambda n, dt: (0, 0)),
            pl.BlockSpec((Cout, 1), lambda n, dt: (0, 0)),
        ],
        out_specs=pl.BlockSpec((None, td, Cout, Fv),
                               lambda n, dt: (n, dt, 0, 0)),
        compiler_params=_compiler_params(),
        cost_estimate=pl.CostEstimate(flops=flops, transcendentals=0,
                                      bytes_accessed=bytes_accessed),
    )(a_flat, r_flat, w_flat, bias)


# -----------------------------------------------------------------------------
# Kernel 2: 4x4x4 conv, stride 2, pad 1 + folded BN + ReLU
# (input arrives W-parity split: even / odd columns of the pad-1 input)
# -----------------------------------------------------------------------------
def _strided4_kernel(xe_ref, xo_ref, w_ref, b_ref, o_ref, *, Wh, Lo, td):
    # xe/xo: (D+2, Cin, (H+2)*Wh)  even / odd W columns of the padded input
    # w_ref: (Cout, 64*Cin)        rows ordered (ky, kx, kz, cin), BN folded
    # o_ref: (td, Cout, Lo)        output lanes l = 2*Wh*ho + wo (junk wo>=W/2)
    w = w_ref[...]
    b = b_ref[...]
    d0 = pl.program_id(1) * td
    for d in range(td):
        od = d0 + d
        se = jnp.concatenate([xe_ref[2 * od + kz] for kz in range(4)], axis=0)
        so = jnp.concatenate([xo_ref[2 * od + kz] for kz in range(4)], axis=0)
        cols = []
        for ky in range(4):
            for kx in range(4):
                src = se if kx % 2 == 0 else so
                off = Wh * ky + kx // 2
                cols.append(src[:, off:off + Lo])
        patch = jnp.concatenate(cols, axis=0)                     # (64*Cin, Lo)
        y = jnp.dot(w, patch, preferred_element_type=jnp.float32)
        o_ref[d] = jnp.maximum(y + b, 0.0).astype(o_ref.dtype)


def strided_conv4_bn_relu(xe, xo, w_flat, bias, *, Wh):
    N, Dp, C, Fh = xe.shape
    Cout = w_flat.shape[0]
    D2 = (Dp - 2) // 2
    Hp = Fh // Wh
    H2 = (Hp - 2) // 2
    W2 = Wh - 1
    Lo = 2 * Wh * (H2 - 1) + W2
    td = _pick_td(D2)
    flops = 2 * N * D2 * Lo * 64 * C * Cout
    bytes_accessed = 4 * (2 * N * Dp * C * Fh + 64 * Cout * C + Cout
                          + N * D2 * Cout * Lo)
    kern = functools.partial(_strided4_kernel, Wh=Wh, Lo=Lo, td=td)
    return pl.pallas_call(
        kern,
        out_shape=jax.ShapeDtypeStruct((N, D2, Cout, Lo), xe.dtype),
        grid=(N, D2 // td),
        in_specs=[
            pl.BlockSpec((None, Dp, C, Fh), lambda n, dt: (n, 0, 0, 0)),
            pl.BlockSpec((None, Dp, C, Fh), lambda n, dt: (n, 0, 0, 0)),
            pl.BlockSpec(w_flat.shape, lambda n, dt: (0, 0)),
            pl.BlockSpec((Cout, 1), lambda n, dt: (0, 0)),
        ],
        out_specs=pl.BlockSpec((None, td, Cout, Lo),
                               lambda n, dt: (n, dt, 0, 0)),
        compiler_params=_compiler_params(),
        cost_estimate=pl.CostEstimate(flops=flops, transcendentals=0,
                                      bytes_accessed=bytes_accessed),
    )(xe, xo, w_flat, bias)


# -----------------------------------------------------------------------------
# Kernel 4: MaxPool3d(kernel=2, stride=2)
# -----------------------------------------------------------------------------
def _maxpool2_kernel(xe_ref, xo_ref, o_ref, *, Wh, Lo, td):
    # xe/xo: (D, C, H*Wh)  even / odd W columns of the input
    # o_ref: (td, C, Lo)   output lanes l = 2*Wh*ho + wo (junk at wo >= W/2)
    d0 = pl.program_id(1) * td
    for d in range(td):
        od = d0 + d
        m = None
        for pz in range(2):
            slabs = (xe_ref[2 * od + pz], xo_ref[2 * od + pz])
            for py in range(2):
                off = Wh * py
                for px in range(2):
                    v = slabs[px][:, off:off + Lo]
                    m = v if m is None else jnp.maximum(m, v)
        o_ref[d] = m.astype(o_ref.dtype)


def maxpool2(xe, xo, *, Wh):
    N, D, C, Fh = xe.shape
    H = Fh // Wh
    D2, H2, W2 = D // 2, H // 2, Wh
    Lo = 2 * Wh * (H2 - 1) + W2
    td = _pick_td(D2)
    bytes_accessed = 4 * (2 * N * D * C * Fh + N * D2 * C * Lo)
    kern = functools.partial(_maxpool2_kernel, Wh=Wh, Lo=Lo, td=td)
    return pl.pallas_call(
        kern,
        out_shape=jax.ShapeDtypeStruct((N, D2, C, Lo), xe.dtype),
        grid=(N, D2 // td),
        in_specs=[
            pl.BlockSpec((None, D, C, Fh), lambda n, dt: (n, 0, 0, 0)),
            pl.BlockSpec((None, D, C, Fh), lambda n, dt: (n, 0, 0, 0)),
        ],
        out_specs=pl.BlockSpec((None, td, C, Lo), lambda n, dt: (n, dt, 0, 0)),
        compiler_params=_compiler_params(),
        cost_estimate=pl.CostEstimate(flops=7 * N * D2 * C * Lo,
                                      transcendentals=0,
                                      bytes_accessed=bytes_accessed),
    )(xe, xo)


# -----------------------------------------------------------------------------
# Plain-JAX glue (layout plumbing only; small fused HBM copies)
# -----------------------------------------------------------------------------
def _flatten_hw(x):                       # (N, D, C, H, W) -> (N, D, C, H*W)
    n, d, c, h, w = x.shape
    return x.reshape(n, d, c, h * w)


def _split_w_parity(x):                   # even / odd W columns, flattened
    return _flatten_hw(x[..., 0::2]), _flatten_hw(x[..., 1::2])


def _unflatten_rows(y, H, pitch, W):
    # (N, D, C, L) with lane index l = h*pitch + w  ->  (N, D, C, H, W)
    n, d, c, L = y.shape
    y = jnp.pad(y, ((0, 0), (0, 0), (0, 0), (0, H * pitch - L)))
    return y.reshape(n, d, c, H, pitch)[..., :W]


def ppcd_forward(x_ncdhw, params, atrous_rate):
    r = atrous_rate
    N, C, D, H, W = x_ncdhw.shape
    assert D % 2 == 0 and H % 2 == 0 and W % 2 == 0, "even spatial dims required"
    x = jnp.transpose(x_ncdhw, (0, 2, 1, 3, 4))                  # (N, D, C, H, W)

    # residual branch: MaxPool3d(2)
    xe, xo = _split_w_parity(x)
    res = maxpool2(xe, xo, Wh=W // 2)
    res = _unflatten_rows(res, H // 2, W, W // 2)                # (N, D/2, C, H/2, W/2)

    # dc_block conv #1: dilated 3^3, stride 1
    Wp1 = W + 2 * r
    x1 = _flatten_hw(jnp.pad(x, ((0, 0), (r, r), (0, 0), (r, r), (r, r))))
    h = dilated_conv3_bn_relu(x1, params["w1"], params["b1"], rate=r, Wp=Wp1)
    h = _unflatten_rows(h, H, Wp1, W)                            # (N, D, C, H, W)

    # dc_block conv #2: 4^3, stride 2, pad 1
    hp = jnp.pad(h, ((0, 0), (1, 1), (0, 0), (1, 1), (1, 1)))
    he, ho_ = _split_w_parity(hp)
    h2 = strided_conv4_bn_relu(he, ho_, params["w2"], params["b2"],
                               Wh=(W + 2) // 2)
    h2 = _unflatten_rows(h2, H // 2, W + 2, W // 2)              # (N, D/2, C, H/2, W/2)

    # cbr: dilated 3^3 on concat([h2, res], C) -- concat-free (interleaved kz slabs)
    Wp3 = W // 2 + 2 * r
    pad3 = ((0, 0), (r, r), (0, 0), (r, r), (r, r))
    h2f = _flatten_hw(jnp.pad(h2, pad3))
    resf = _flatten_hw(jnp.pad(res, pad3))
    out = dilated_conv3_dual_bn_relu(h2f, resf, params["w3"], params["b3"],
                                     rate=r, Wp=Wp3)
    out = _unflatten_rows(out, H // 2, Wp3, W // 2)              # (N, D/2, 2C, H/2, W/2)
    return jnp.transpose(out, (0, 2, 1, 3, 4))                   # NDCHW -> NCDHW


# -----------------------------------------------------------------------------
# Pure-JAX reference (lax conv) for the correctness check
# -----------------------------------------------------------------------------
def _ref_conv_bn_relu(x, w_dhwio, scale, bias, stride, padding, dilation):
    y = jax.lax.conv_general_dilated(
        x, w_dhwio,
        window_strides=(stride,) * 3,
        padding=[(padding, padding)] * 3,
        rhs_dilation=(dilation,) * 3,
        dimension_numbers=("NDHWC", "DHWIO", "NDHWC"))
    y = y * scale.reshape(1, 1, 1, 1, -1) + bias.reshape(1, 1, 1, 1, -1)
    return jnp.maximum(y, 0.0)


def ppcd_reference(x_ncdhw, raw, atrous_rate):
    x = jnp.transpose(x_ncdhw, (0, 2, 3, 4, 1))
    res = jax.lax.reduce_window(x, -jnp.inf, jax.lax.max,
                                (1, 2, 2, 2, 1), (1, 2, 2, 2, 1), "VALID")
    h = _ref_conv_bn_relu(x, raw["w1"], raw["s1"], raw["b1"],
                          1, atrous_rate, atrous_rate)
    h = _ref_conv_bn_relu(h, raw["w2"], raw["s2"], raw["b2"], 2, 1, 1)
    xs = jnp.concatenate([h, res], axis=-1)
    out = _ref_conv_bn_relu(xs, raw["w3"], raw["s3"], raw["b3"],
                            1, atrous_rate, atrous_rate)
    return jnp.transpose(out, (0, 4, 1, 2, 3))


# -----------------------------------------------------------------------------
# Deterministic synthetic parameters (eval-mode BatchNorm, folded)
# -----------------------------------------------------------------------------
def make_params(dim, key):
    ks = jax.random.split(key, 15)
    c2 = 2 * dim
    w1 = 0.1 * jax.random.normal(ks[0], (3, 3, 3, dim, dim), jnp.float32)   # DHWIO
    w2 = 0.1 * jax.random.normal(ks[1], (4, 4, 4, dim, dim), jnp.float32)
    w3 = 0.1 * jax.random.normal(ks[2], (3, 3, 3, c2, c2), jnp.float32)

    def bn(kg, kb, km, kv, c):
        g = 1.0 + 0.1 * jax.random.normal(kg, (c,), jnp.float32)
        b = 0.1 * jax.random.normal(kb, (c,), jnp.float32)
        m = 0.1 * jax.random.normal(km, (c,), jnp.float32)
        v = jax.random.uniform(kv, (c,), jnp.float32, 0.5, 1.5)
        scale = g / jnp.sqrt(v + 1e-5)
        bias = b - m * scale
        return scale, bias

    s1, b1 = bn(ks[3], ks[4], ks[5], ks[6], dim)
    s2, b2 = bn(ks[7], ks[8], ks[9], ks[10], dim)
    s3, b3 = bn(ks[11], ks[12], ks[13], ks[14], c2)

    def fold(w_dhwio, scale):
        # (kz,ky,kx,Cin,Cout) -> (Cout, ky*kx*kz*Cin) with BN scale folded into
        # Cout; row order matches the in-kernel im2col stack (ky, kx, kz, cin).
        kz, ky, kx, cin, cout = w_dhwio.shape
        w = jnp.transpose(w_dhwio, (4, 1, 2, 0, 3))        # (co, ky, kx, kz, ci)
        w = w * scale[:, None, None, None, None]
        return w.reshape(cout, ky * kx * kz * cin)

    raw = {"w1": w1, "w2": w2, "w3": w3,
           "s1": s1, "b1": b1, "s2": s2, "b2": b2, "s3": s3, "b3": b3}
    params = {
        "w1": fold(w1, s1), "b1": b1.reshape(dim, 1),
        "w2": fold(w2, s2), "b2": b2.reshape(dim, 1),
        "w3": fold(w3, s3), "b3": b3.reshape(c2, 1),
    }
    return raw, params


if __name__ == "__main__":
    dim = 8
    atrous_rate = 2
    N, D, H, W = 2, 16, 16, 16

    key = jax.random.PRNGKey(0)
    k_x, k_p = jax.random.split(key)
    x = jax.random.normal(k_x, (N, dim, D, H, W), jnp.float32)   # NCDHW (PyTorch)
    raw, params = make_params(dim, k_p)

    fwd = jax.jit(ppcd_forward, static_argnums=2)
    out = jax.block_until_ready(fwd(x, params, atrous_rate))

    assert out.shape == (N, 2 * dim, D // 2, H // 2, W // 2), out.shape

    ref = jax.block_until_ready(ppcd_reference(x, raw, atrous_rate))
    # NOTE: 1e-2 tolerance because both sides use default-precision (bf16-pass)
    # MXU f32 matmuls with different summation orders.
    err = float(jnp.max(jnp.abs(out - ref)))
    assert jnp.allclose(out, ref, rtol=1e-2, atol=1e-2), err

    print("KERNEL_OK")
</pallas_src>

<mosaic_0001>
module attributes {stable_mosaic.version = 11 : i64} {
  func.func @_dilated3_kernel(%arg0: i32, %arg1: i32, %arg2: memref<1x20x8x400xf32, #tpu.memory_space<vmem>>, %arg3: memref<8x216xf32, #tpu.memory_space<vmem>>, %arg4: memref<8x1xf32, #tpu.memory_space<vmem>>, %arg5: memref<1x4x8x316xf32, #tpu.memory_space<vmem>>) attributes {dimension_semantics = [#tpu.dimension_semantics<parallel>, #tpu.dimension_semantics<parallel>], iteration_bounds = array<i64: 2, 4>, scalar_prefetch = 0 : i64, scratch_operands = 0 : i64, tpu.core_type = #tpu.core_type<tc>, window_params = [{transform_indices = @transform_0, window_bounds = array<i64: 1, 20, 8, 400>}, {pipeline_mode = #tpu.pipeline_mode<synchronous>, transform_indices = @transform_1, window_bounds = array<i64: 8, 216>}, {pipeline_mode = #tpu.pipeline_mode<synchronous>, transform_indices = @transform_2, window_bounds = array<i64: 8, 1>}, {transform_indices = @transform_3, window_bounds = array<i64: 1, 4, 8, 316>}]} {
    %c0 = arith.constant 0 : index
    %c0_0 = arith.constant 0 : index
    %0 = vector.load %arg3[%c0, %c0_0] : memref<8x216xf32, #tpu.memory_space<vmem>>, vector<8x216xf32>
    %c0_1 = arith.constant 0 : index
    %c0_2 = arith.constant 0 : index
    %1 = vector.load %arg4[%c0_1, %c0_2] : memref<8x1xf32, #tpu.memory_space<vmem>>, vector<8x1xf32>
    %c4_i32 = arith.constant 4 : i32
    %2 = arith.muli %arg1, %c4_i32 : i32
    %c0_i32 = arith.constant 0 : i32
    %3 = arith.addi %2, %c0_i32 : i32
    %c0_i32_3 = arith.constant 0 : i32
    %4 = arith.addi %3, %c0_i32_3 : i32
    %c0_4 = arith.constant 0 : index
    %5 = arith.index_cast %4 : i32 to index
    %c0_5 = arith.constant 0 : index
    %c0_6 = arith.constant 0 : index
    %6 = vector.load %arg2[%c0_4, %5, %c0_5, %c0_6] : memref<1x20x8x400xf32, #tpu.memory_space<vmem>>, vector<1x1x8x400xf32>
    %7 = vector.shape_cast %6 : vector<1x1x8x400xf32> to vector<8x400xf32>
    %c0_i32_7 = arith.constant 0 : i32
    %8 = arith.addi %2, %c0_i32_7 : i32
    %c2_i32 = arith.constant 2 : i32
    %9 = arith.addi %8, %c2_i32 : i32
    %c0_8 = arith.constant 0 : index
    %10 = arith.index_cast %9 : i32 to index
    %c0_9 = arith.constant 0 : index
    %c0_10 = arith.constant 0 : index
    %11 = vector.load %arg2[%c0_8, %10, %c0_9, %c0_10] : memref<1x20x8x400xf32, #tpu.memory_space<vmem>>, vector<1x1x8x400xf32>
    %12 = vector.shape_cast %11 : vector<1x1x8x400xf32> to vector<8x400xf32>
    %c0_i32_11 = arith.constant 0 : i32
    %13 = arith.addi %2, %c0_i32_11 : i32
    %c4_i32_12 = arith.constant 4 : i32
    %14 = arith.addi %13, %c4_i32_12 : i32
    %c0_13 = arith.constant 0 : index
    %15 = arith.index_cast %14 : i32 to index
    %c0_14 = arith.constant 0 : index
    %c0_15 = arith.constant 0 : index
    %16 = vector.load %arg2[%c0_13, %15, %c0_14, %c0_15] : memref<1x20x8x400xf32, #tpu.memory_space<vmem>>, vector<1x1x8x400xf32>
    %17 = vector.shape_cast %16 : vector<1x1x8x400xf32> to vector<8x400xf32>
    %18 = tpu.concatenate %7, %12, %17 in 0 : vector<8x400xf32>, vector<8x400xf32>, vector<8x400xf32> -> vector<24x400xf32>
    %19 = vector.extract_strided_slice %18 {offsets = [0, 0], sizes = [24, 316], strides = [1, 1]} : vector<24x400xf32> to vector<24x316xf32>
    %20 = vector.extract_strided_slice %18 {offsets = [0, 2], sizes = [24, 316], strides = [1, 1]} : vector<24x400xf32> to vector<24x316xf32>
    %21 = vector.extract_strided_slice %18 {offsets = [0, 4], sizes = [24, 316], strides = [1, 1]} : vector<24x400xf32> to vector<24x316xf32>
    %22 = vector.extract_strided_slice %18 {offsets = [0, 40], sizes = [24, 316], strides = [1, 1]} : vector<24x400xf32> to vector<24x316xf32>
    %23 = vector.extract_strided_slice %18 {offsets = [0, 42], sizes = [24, 316], strides = [1, 1]} : vector<24x400xf32> to vector<24x316xf32>
    %24 = vector.extract_strided_slice %18 {offsets = [0, 44], sizes = [24, 316], strides = [1, 1]} : vector<24x400xf32> to vector<24x316xf32>
    %25 = vector.extract_strided_slice %18 {offsets = [0, 80], sizes = [24, 316], strides = [1, 1]} : vector<24x400xf32> to vector<24x316xf32>
    %26 = vector.extract_strided_slice %18 {offsets = [0, 82], sizes = [24, 316], strides = [1, 1]} : vector<24x400xf32> to vector<24x316xf32>
    %27 = vector.extract_strided_slice %18 {offsets = [0, 84], sizes = [24, 316], strides = [1, 1]} : vector<24x400xf32> to vector<24x316xf32>
    %28 = tpu.concatenate %19, %20, %21, %22, %23, %24, %25, %26, %27 in 0 : vector<24x316xf32>, vector<24x316xf32>, vector<24x316xf32>, vector<24x316xf32>, vector<24x316xf32>, vector<24x316xf32>, vector<24x316xf32>, vector<24x316xf32>, vector<24x316xf32> -> vector<216x316xf32>
    %cst = arith.constant dense<0.000000e+00> : vector<8x316xf32>
    %29 = tpu.matmul %0, %28, %cst {dimension_numbers = #tpu.dot_dimension_numbers<[1], [0], [0], [1], [0, 0, 1, 1], [], []>} : vector<8x216xf32>, vector<216x316xf32>, vector<8x316xf32> -> vector<8x316xf32>
    %30 = vector.broadcast %1 : vector<8x1xf32> to vector<8x316xf32>
    %31 = arith.addf %29, %30 : vector<8x316xf32>
    %cst_16 = arith.constant 0.000000e+00 : f32
    %32 = vector.broadcast %cst_16 : f32 to vector<8x316xf32>
    %33 = arith.maximumf %31, %32 : vector<8x316xf32>
    %c0_17 = arith.constant 0 : index
    %c0_18 = arith.constant 0 : index
    %c0_19 = arith.constant 0 : index
    %c0_20 = arith.constant 0 : index
    %34 = vector.load %arg5[%c0_17, %c0_18, %c0_19, %c0_20] : memref<1x4x8x316xf32, #tpu.memory_space<vmem>>, vector<1x1x8x316xf32>
    %35 = vector.shape_cast %34 : vector<1x1x8x316xf32> to vector<8x316xf32>
    %36 = vector.shape_cast %33 : vector<8x316xf32> to vector<1x1x8x316xf32>
    tpu.vector_store %arg5[%c0_17, %c0_18, %c0_19, %c0_20], %36 {strides = array<i32>} : memref<1x4x8x316xf32, #tpu.memory_space<vmem>>, vector<1x1x8x316xf32>,
    %c1_i32 = arith.constant 1 : i32
    %37 = arith.addi %2, %c1_i32 : i32
    %c0_i32_21 = arith.constant 0 : i32
    %38 = arith.addi %37, %c0_i32_21 : i32
    %c0_22 = arith.constant 0 : index
    %39 = arith.index_cast %38 : i32 to index
    %c0_23 = arith.constant 0 : index
    %c0_24 = arith.constant 0 : index
    %40 = vector.load %arg2[%c0_22, %39, %c0_23, %c0_24] : memref<1x20x8x400xf32, #tpu.memory_space<vmem>>, vector<1x1x8x400xf32>
    %41 = vector.shape_cast %40 : vector<1x1x8x400xf32> to vector<8x400xf32>
    %c1_i32_25 = arith.constant 1 : i32
    %42 = arith.addi %2, %c1_i32_25 : i32
    %c2_i32_26 = arith.constant 2 : i32
    %43 = arith.addi %42, %c2_i32_26 : i32
    %c0_27 = arith.constant 0 : index
    %44 = arith.index_cast %43 : i32 to index
    %c0_28 = arith.constant 0 : index
    %c0_29 = arith.constant 0 : index
    %45 = vector.load %arg2[%c0_27, %44, %c0_28, %c0_29] : memref<1x20x8x400xf32, #tpu.memory_space<vmem>>, vector<1x1x8x400xf32>
    %46 = vector.shape_cast %45 : vector<1x1x8x400xf32> to vector<8x400xf32>
    %c1_i32_30 = arith.constant 1 : i32
    %47 = arith.addi %2, %c1_i32_30 : i32
    %c4_i32_31 = arith.constant 4 : i32
    %48 = arith.addi %47, %c4_i32_31 : i32
    %c0_32 = arith.constant 0 : index
    %49 = arith.index_cast %48 : i32 to index
    %c0_33 = arith.constant 0 : index
    %c0_34 = arith.constant 0 : index
    %50 = vector.load %arg2[%c0_32, %49, %c0_33, %c0_34] : memref<1x20x8x400xf32, #tpu.memory_space<vmem>>, vector<1x1x8x400xf32>
    %51 = vector.shape_cast %50 : vector<1x1x8x400xf32> to vector<8x400xf32>
    %52 = tpu.concatenate %41, %46, %51 in 0 : vector<8x400xf32>, vector<8x400xf32>, vector<8x400xf32> -> vector<24x400xf32>
    %53 = vector.extract_strided_slice %52 {offsets = [0, 0], sizes = [24, 316], strides = [1, 1]} : vector<24x400xf32> to vector<24x316xf32>
    %54 = vector.extract_strided_slice %52 {offsets = [0, 2], sizes = [24, 316], strides = [1, 1]} : vector<24x400xf32> to vector<24x316xf32>
    %55 = vector.extract_strided_slice %52 {offsets = [0, 4], sizes = [24, 316], strides = [1, 1]} : vector<24x400xf32> to vector<24x316xf32>
    %56 = vector.extract_strided_slice %52 {offsets = [0, 40], sizes = [24, 316], strides = [1, 1]} : vector<24x400xf32> to vector<24x316xf32>
    %57 = vector.extract_strided_slice %52 {offsets = [0, 42], sizes = [24, 316], strides = [1, 1]} : vector<24x400xf32> to vector<24x316xf32>
    %58 = vector.extract_strided_slice %52 {offsets = [0, 44], sizes = [24, 316], strides = [1, 1]} : vector<24x400xf32> to vector<24x316xf32>
    %59 = vector.extract_strided_slice %52 {offsets = [0, 80], sizes = [24, 316], strides = [1, 1]} : vector<24x400xf32> to vector<24x316xf32>
    %60 = vector.extract_strided_slice %52 {offsets = [0, 82], sizes = [24, 316], strides = [1, 1]} : vector<24x400xf32> to vector<24x316xf32>
    %61 = vector.extract_strided_slice %52 {offsets = [0, 84], sizes = [24, 316], strides = [1, 1]} : vector<24x400xf32> to vector<24x316xf32>
    %62 = tpu.concatenate %53, %54, %55, %56, %57, %58, %59, %60, %61 in 0 : vector<24x316xf32>, vector<24x316xf32>, vector<24x316xf32>, vector<24x316xf32>, vector<24x316xf32>, vector<24x316xf32>, vector<24x316xf32>, vector<24x316xf32>, vector<24x316xf32> -> vector<216x316xf32>
    %cst_35 = arith.constant dense<0.000000e+00> : vector<8x316xf32>
    %63 = tpu.matmul %0, %62, %cst_35 {dimension_numbers = #tpu.dot_dimension_numbers<[1], [0], [0], [1], [0, 0, 1, 1], [], []>} : vector<8x216xf32>, vector<216x316xf32>, vector<8x316xf32> -> vector<8x316xf32>
    %64 = vector.broadcast %1 : vector<8x1xf32> to vector<8x316xf32>
    %65 = arith.addf %63, %64 : vector<8x316xf32>
    %cst_36 = arith.constant 0.000000e+00 : f32
    %66 = vector.broadcast %cst_36 : f32 to vector<8x316xf32>
    %67 = arith.maximumf %65, %66 : vector<8x316xf32>
    %c0_37 = arith.constant 0 : index
    %c1 = arith.constant 1 : index
    %c0_38 = arith.constant 0 : index
    %c0_39 = arith.constant 0 : index
    %68 = vector.load %arg5[%c0_37, %c1, %c0_38, %c0_39] : memref<1x4x8x316xf32, #tpu.memory_space<vmem>>, vector<1x1x8x316xf32>
    %69 = vector.shape_cast %68 : vector<1x1x8x316xf32> to vector<8x316xf32>
    %70 = vector.shape_cast %67 : vector<8x316xf32> to vector<1x1x8x316xf32>
    tpu.vector_store %arg5[%c0_37, %c1, %c0_38, %c0_39], %70 {strides = array<i32>} : memref<1x4x8x316xf32, #tpu.memory_space<vmem>>, vector<1x1x8x316xf32>,
    %c2_i32_40 = arith.constant 2 : i32
    %71 = arith.addi %2, %c2_i32_40 : i32
    %c0_i32_41 = arith.constant 0 : i32
    %72 = arith.addi %71, %c0_i32_41 : i32
    %c0_42 = arith.constant 0 : index
    %73 = arith.index_cast %72 : i32 to index
    %c0_43 = arith.constant 0 : index
    %c0_44 = arith.constant 0 : index
    %74 = vector.load %arg2[%c0_42, %73, %c0_43, %c0_44] : memref<1x20x8x400xf32, #tpu.memory_space<vmem>>, vector<1x1x8x400xf32>
    %75 = vector.shape_cast %74 : vector<1x1x8x400xf32> to vector<8x400xf32>
    %c2_i32_45 = arith.constant 2 : i32
    %76 = arith.addi %2, %c2_i32_45 : i32
    %c2_i32_46 = arith.constant 2 : i32
    %77 = arith.addi %76, %c2_i32_46 : i32
    %c0_47 = arith.constant 0 : index
    %78 = arith.index_cast %77 : i32 to index
    %c0_48 = arith.constant 0 : index
    %c0_49 = arith.constant 0 : index
    %79 = vector.load %arg2[%c0_47, %78, %c0_48, %c0_49] : memref<1x20x8x400xf32, #tpu.memory_space<vmem>>, vector<1x1x8x400xf32>
    %80 = vector.shape_cast %79 : vector<1x1x8x400xf32> to vector<8x400xf32>
    %c2_i32_50 = arith.constant 2 : i32
    %81 = arith.addi %2, %c2_i32_50 : i32
    %c4_i32_51 = arith.constant 4 : i32
    %82 = arith.addi %81, %c4_i32_51 : i32
    %c0_52 = arith.constant 0 : index
    %83 = arith.index_cast %82 : i32 to index
    %c0_53 = arith.constant 0 : index
    %c0_54 = arith.constant 0 : index
    %84 = vector.load %arg2[%c0_52, %83, %c0_53, %c0_54] : memref<1x20x8x400xf32, #tpu.memory_space<vmem>>, vector<1x1x8x400xf32>
    %85 = vector.shape_cast %84 : vector<1x1x8x400xf32> to vector<8x400xf32>
    %86 = tpu.concatenate %75, %80, %85 in 0 : vector<8x400xf32>, vector<8x400xf32>, vector<8x400xf32> -> vector<24x400xf32>
    %87 = vector.extract_strided_slice %86 {offsets = [0, 0], sizes = [24, 316], strides = [1, 1]} : vector<24x400xf32> to vector<24x316xf32>
    %88 = vector.extract_strided_slice %86 {offsets = [0, 2], sizes = [24, 316], strides = [1, 1]} : vector<24x400xf32> to vector<24x316xf32>
    %89 = vector.extract_strided_slice %86 {offsets = [0, 4], sizes = [24, 316], strides = [1, 1]} : vector<24x400xf32> to vector<24x316xf32>
    %90 = vector.extract_strided_slice %86 {offsets = [0, 40], sizes = [24, 316], strides = [1, 1]} : vector<24x400xf32> to vector<24x316xf32>
    %91 = vector.extract_strided_slice %86 {offsets = [0, 42], sizes = [24, 316], strides = [1, 1]} : vector<24x400xf32> to vector<24x316xf32>
    %92 = vector.extract_strided_slice %86 {offsets = [0, 44], sizes = [24, 316], strides = [1, 1]} : vector<24x400xf32> to vector<24x316xf32>
    %93 = vector.extract_strided_slice %86 {offsets = [0, 80], sizes = [24, 316], strides = [1, 1]} : vector<24x400xf32> to vector<24x316xf32>
    %94 = vector.extract_strided_slice %86 {offsets = [0, 82], sizes = [24, 316], strides = [1, 1]} : vector<24x400xf32> to vector<24x316xf32>
    %95 = vector.extract_strided_slice %86 {offsets = [0, 84], sizes = [24, 316], strides = [1, 1]} : vector<24x400xf32> to vector<24x316xf32>
    %96 = tpu.concatenate %87, %88, %89, %90, %91, %92, %93, %94, %95 in 0 : vector<24x316xf32>, vector<24x316xf32>, vector<24x316xf32>, vector<24x316xf32>, vector<24x316xf32>, vector<24x316xf32>, vector<24x316xf32>, vector<24x316xf32>, vector<24x316xf32> -> vector<216x316xf32>
    %cst_55 = arith.constant dense<0.000000e+00> : vector<8x316xf32>
    %97 = tpu.matmul %0, %96, %cst_55 {dimension_numbers = #tpu.dot_dimension_numbers<[1], [0], [0], [1], [0, 0, 1, 1], [], []>} : vector<8x216xf32>, vector<216x316xf32>, vector<8x316xf32> -> vector<8x316xf32>
    %98 = vector.broadcast %1 : vector<8x1xf32> to vector<8x316xf32>
    %99 = arith.addf %97, %98 : vector<8x316xf32>
    %cst_56 = arith.constant 0.000000e+00 : f32
    %100 = vector.broadcast %cst_56 : f32 to vector<8x316xf32>
    %101 = arith.maximumf %99, %100 : vector<8x316xf32>
    %c0_57 = arith.constant 0 : index
    %c2 = arith.constant 2 : index
    %c0_58 = arith.constant 0 : index
    %c0_59 = arith.constant 0 : index
    %102 = vector.load %arg5[%c0_57, %c2, %c0_58, %c0_59] : memref<1x4x8x316xf32, #tpu.memory_space<vmem>>, vector<1x1x8x316xf32>
    %103 = vector.shape_cast %102 : vector<1x1x8x316xf32> to vector<8x316xf32>
    %104 = vector.shape_cast %101 : vector<8x316xf32> to vector<1x1x8x316xf32>
    tpu.vector_store %arg5[%c0_57, %c2, %c0_58, %c0_59], %104 {strides = array<i32>} : memref<1x4x8x316xf32, #tpu.memory_space<vmem>>, vector<1x1x8x316xf32>,
    %c3_i32 = arith.constant 3 : i32
    %105 = arith.addi %2, %c3_i32 : i32
    %c0_i32_60 = arith.constant 0 : i32
    %106 = arith.addi %105, %c0_i32_60 : i32
    %c0_61 = arith.constant 0 : index
    %107 = arith.index_cast %106 : i32 to index
    %c0_62 = arith.constant 0 : index
    %c0_63 = arith.constant 0 : index
    %108 = vector.load %arg2[%c0_61, %107, %c0_62, %c0_63] : memref<1x20x8x400xf32, #tpu.memory_space<vmem>>, vector<1x1x8x400xf32>
    %109 = vector.shape_cast %108 : vector<1x1x8x400xf32> to vector<8x400xf32>
    %c3_i32_64 = arith.constant 3 : i32
    %110 = arith.addi %2, %c3_i32_64 : i32
    %c2_i32_65 = arith.constant 2 : i32
    %111 = arith.addi %110, %c2_i32_65 : i32
    %c0_66 = arith.constant 0 : index
    %112 = arith.index_cast %111 : i32 to index
    %c0_67 = arith.constant 0 : index
    %c0_68 = arith.constant 0 : index
    %113 = vector.load %arg2[%c0_66, %112, %c0_67, %c0_68] : memref<1x20x8x400xf32, #tpu.memory_space<vmem>>, vector<1x1x8x400xf32>
    %114 = vector.shape_cast %113 : vector<1x1x8x400xf32> to vector<8x400xf32>
    %c3_i32_69 = arith.constant 3 : i32
    %115 = arith.addi %2, %c3_i32_69 : i32
    %c4_i32_70 = arith.constant 4 : i32
    %116 = arith.addi %115, %c4_i32_70 : i32
    %c0_71 = arith.constant 0 : index
    %117 = arith.index_cast %116 : i32 to index
    %c0_72 = arith.constant 0 : index
    %c0_73 = arith.constant 0 : index
    %118 = vector.load %arg2[%c0_71, %117, %c0_72, %c0_73] : memref<1x20x8x400xf32, #tpu.memory_space<vmem>>, vector<1x1x8x400xf32>
    %119 = vector.shape_cast %118 : vector<1x1x8x400xf32> to vector<8x400xf32>
    %120 = tpu.concatenate %109, %114, %119 in 0 : vector<8x400xf32>, vector<8x400xf32>, vector<8x400xf32> -> vector<24x400xf32>
    %121 = vector.extract_strided_slice %120 {offsets = [0, 0], sizes = [24, 316], strides = [1, 1]} : vector<24x400xf32> to vector<24x316xf32>
    %122 = vector.extract_strided_slice %120 {offsets = [0, 2], sizes = [24, 316], strides = [1, 1]} : vector<24x400xf32> to vector<24x316xf32>
    %123 = vector.extract_strided_slice %120 {offsets = [0, 4], sizes = [24, 316], strides = [1, 1]} : vector<24x400xf32> to vector<24x316xf32>
    %124 = vector.extract_strided_slice %120 {offsets = [0, 40], sizes = [24, 316], strides = [1, 1]} : vector<24x400xf32> to vector<24x316xf32>
    %125 = vector.extract_strided_slice %120 {offsets = [0, 42], sizes = [24, 316], strides = [1, 1]} : vector<24x400xf32> to vector<24x316xf32>
    %126 = vector.extract_strided_slice %120 {offsets = [0, 44], sizes = [24, 316], strides = [1, 1]} : vector<24x400xf32> to vector<24x316xf32>
    %127 = vector.extract_strided_slice %120 {offsets = [0, 80], sizes = [24, 316], strides = [1, 1]} : vector<24x400xf32> to vector<24x316xf32>
    %128 = vector.extract_strided_slice %120 {offsets = [0, 82], sizes = [24, 316], strides = [1, 1]} : vector<24x400xf32> to vector<24x316xf32>
    %129 = vector.extract_strided_slice %120 {offsets = [0, 84], sizes = [24, 316], strides = [1, 1]} : vector<24x400xf32> to vector<24x316xf32>
    %130 = tpu.concatenate %121, %122, %123, %124, %125, %126, %127, %128, %129 in 0 : vector<24x316xf32>, vector<24x316xf32>, vector<24x316xf32>, vector<24x316xf32>, vector<24x316xf32>, vector<24x316xf32>, vector<24x316xf32>, vector<24x316xf32>, vector<24x316xf32> -> vector<216x316xf32>
    %cst_74 = arith.constant dense<0.000000e+00> : vector<8x316xf32>
    %131 = tpu.matmul %0, %130, %cst_74 {dimension_numbers = #tpu.dot_dimension_numbers<[1], [0], [0], [1], [0, 0, 1, 1], [], []>} : vector<8x216xf32>, vector<216x316xf32>, vector<8x316xf32> -> vector<8x316xf32>
    %132 = vector.broadcast %1 : vector<8x1xf32> to vector<8x316xf32>
    %133 = arith.addf %131, %132 : vector<8x316xf32>
    %cst_75 = arith.constant 0.000000e+00 : f32
    %134 = vector.broadcast %cst_75 : f32 to vector<8x316xf32>
    %135 = arith.maximumf %133, %134 : vector<8x316xf32>
    %c0_76 = arith.constant 0 : index
    %c3 = arith.constant 3 : index
    %c0_77 = arith.constant 0 : index
    %c0_78 = arith.constant 0 : index
    %136 = vector.load %arg5[%c0_76, %c3, %c0_77, %c0_78] : memref<1x4x8x316xf32, #tpu.memory_space<vmem>>, vector<1x1x8x316xf32>
    %137 = vector.shape_cast %136 : vector<1x1x8x316xf32> to vector<8x316xf32>
    %138 = vector.shape_cast %135 : vector<8x316xf32> to vector<1x1x8x316xf32>
    tpu.vector_store %arg5[%c0_76, %c3, %c0_77, %c0_78], %138 {strides = array<i32>} : memref<1x4x8x316xf32, #tpu.memory_space<vmem>>, vector<1x1x8x316xf32>,
    return
  }
  func.func @transform_0(%arg0: i32, %arg1: i32) -> (i32, i32, i32, i32) {
    %c0_i32 = arith.constant 0 : i32
    %c0_i32_0 = arith.constant 0 : i32
    %c0_i32_1 = arith.constant 0 : i32
    %c0_i32_2 = arith.constant 0 : i32
    return %arg0, %c0_i32, %c0_i32_0, %c0_i32_1 : i32, i32, i32, i32
  }
  func.func @transform_1(%arg0: i32, %arg1: i32) -> (i32, i32) {
    %c0_i32 = arith.constant 0 : i32
    %c0_i32_0 = arith.constant 0 : i32
    %c0_i32_1 = arith.constant 0 : i32
    return %c0_i32, %c0_i32_0 : i32, i32
  }
  func.func @transform_2(%arg0: i32, %arg1: i32) -> (i32, i32) {
    %c0_i32 = arith.constant 0 : i32
    %c0_i32_0 = arith.constant 0 : i32
    %c0_i32_1 = arith.constant 0 : i32
    return %c0_i32, %c0_i32_0 : i32, i32
  }
  func.func @transform_3(%arg0: i32, %arg1: i32) -> (i32, i32, i32, i32) {
    %c0_i32 = arith.constant 0 : i32
    %c0_i32_0 = arith.constant 0 : i32
    %c0_i32_1 = arith.constant 0 : i32
    return %arg0, %arg1, %c0_i32, %c0_i32_0 : i32, i32, i32, i32
  }
}

module attributes {stable_mosaic.version = 11 : i64} {
  func.func @_strided4_kernel(%arg0: i32, %arg1: i32, %arg2: memref<1x18x8x162xf32, #tpu.memory_space<vmem>>, %arg3: memref<1x18x8x162xf32, #tpu.memory_space<vmem>>, %arg4: memref<8x512xf32, #tpu.memory_space<vmem>>, %arg5: memref<8x1xf32, #tpu.memory_space<vmem>>, %arg6: memref<1x2x8x134xf32, #tpu.memory_space<vmem>>) attributes {dimension_semantics = [#tpu.dimension_semantics<parallel>, #tpu.dimension_semantics<parallel>], iteration_bounds = array<i64: 2, 4>, scalar_prefetch = 0 : i64, scratch_operands = 0 : i64, tpu.core_type = #tpu.core_type<tc>, window_params = [{transform_indices = @transform_0, window_bounds = array<i64: 1, 18, 8, 162>}, {transform_indices = @transform_1, window_bounds = array<i64: 1, 18, 8, 162>}, {pipeline_mode = #tpu.pipeline_mode<synchronous>, transform_indices = @transform_2, window_bounds = array<i64: 8, 512>}, {pipeline_mode = #tpu.pipeline_mode<synchronous>, transform_indices = @transform_3, window_bounds = array<i64: 8, 1>}, {transform_indices = @transform_4, window_bounds = array<i64: 1, 2, 8, 134>}]} {
    %c0 = arith.constant 0 : index
    %c0_0 = arith.constant 0 : index
    %0 = vector.load %arg4[%c0, %c0_0] : memref<8x512xf32, #tpu.memory_space<vmem>>, vector<8x512xf32>
    %c0_1 = arith.constant 0 : index
    %c0_2 = arith.constant 0 : index
    %1 = vector.load %arg5[%c0_1, %c0_2] : memref<8x1xf32, #tpu.memory_space<vmem>>, vector<8x1xf32>
    %c2_i32 = arith.constant 2 : i32
    %2 = arith.muli %arg1, %c2_i32 : i32
    %c0_i32 = arith.constant 0 : i32
    %3 = arith.addi %2, %c0_i32 : i32
    %c2_i32_3 = arith.constant 2 : i32
    %4 = arith.muli %c2_i32_3, %3 : i32
    %c0_i32_4 = arith.constant 0 : i32
    %5 = arith.addi %4, %c0_i32_4 : i32
    %c0_5 = arith.constant 0 : index
    %6 = arith.index_cast %5 : i32 to index
    %c0_6 = arith.constant 0 : index
    %c0_7 = arith.constant 0 : index
    %7 = vector.load %arg2[%c0_5, %6, %c0_6, %c0_7] : memref<1x18x8x162xf32, #tpu.memory_space<vmem>>, vector<1x1x8x162xf32>
    %8 = vector.shape_cast %7 : vector<1x1x8x162xf32> to vector<8x162xf32>
    %c2_i32_8 = arith.constant 2 : i32
    %9 = arith.muli %c2_i32_8, %3 : i32
    %c1_i32 = arith.constant 1 : i32
    %10 = arith.addi %9, %c1_i32 : i32
    %c0_9 = arith.constant 0 : index
    %11 = arith.index_cast %10 : i32 to index
    %c0_10 = arith.constant 0 : index
    %c0_11 = arith.constant 0 : index
    %12 = vector.load %arg2[%c0_9, %11, %c0_10, %c0_11] : memref<1x18x8x162xf32, #tpu.memory_space<vmem>>, vector<1x1x8x162xf32>
    %13 = vector.shape_cast %12 : vector<1x1x8x162xf32> to vector<8x162xf32>
    %c2_i32_12 = arith.constant 2 : i32
    %14 = arith.muli %c2_i32_12, %3 : i32
    %c2_i32_13 = arith.constant 2 : i32
    %15 = arith.addi %14, %c2_i32_13 : i32
    %c0_14 = arith.constant 0 : index
    %16 = arith.index_cast %15 : i32 to index
    %c0_15 = arith.constant 0 : index
    %c0_16 = arith.constant 0 : index
    %17 = vector.load %arg2[%c0_14, %16, %c0_15, %c0_16] : memref<1x18x8x162xf32, #tpu.memory_space<vmem>>, vector<1x1x8x162xf32>
    %18 = vector.shape_cast %17 : vector<1x1x8x162xf32> to vector<8x162xf32>
    %c2_i32_17 = arith.constant 2 : i32
    %19 = arith.muli %c2_i32_17, %3 : i32
    %c3_i32 = arith.constant 3 : i32
    %20 = arith.addi %19, %c3_i32 : i32
    %c0_18 = arith.constant 0 : index
    %21 = arith.index_cast %20 : i32 to index
    %c0_19 = arith.constant 0 : index
    %c0_20 = arith.constant 0 : index
    %22 = vector.load %arg2[%c0_18, %21, %c0_19, %c0_20] : memref<1x18x8x162xf32, #tpu.memory_space<vmem>>, vector<1x1x8x162xf32>
    %23 = vector.shape_cast %22 : vector<1x1x8x162xf32> to vector<8x162xf32>
    %24 = tpu.concatenate %8, %13, %18, %23 in 0 : vector<8x162xf32>, vector<8x162xf32>, vector<8x162xf32>, vector<8x162xf32> -> vector<32x162xf32>
    %c2_i32_21 = arith.constant 2 : i32
    %25 = arith.muli %c2_i32_21, %3 : i32
    %c0_i32_22 = arith.constant 0 : i32
    %26 = arith.addi %25, %c0_i32_22 : i32
    %c0_23 = arith.constant 0 : index
    %27 = arith.index_cast %26 : i32 to index
    %c0_24 = arith.constant 0 : index
    %c0_25 = arith.constant 0 : index
    %28 = vector.load %arg3[%c0_23, %27, %c0_24, %c0_25] : memref<1x18x8x162xf32, #tpu.memory_space<vmem>>, vector<1x1x8x162xf32>
    %29 = vector.shape_cast %28 : vector<1x1x8x162xf32> to vector<8x162xf32>
    %c2_i32_26 = arith.constant 2 : i32
    %30 = arith.muli %c2_i32_26, %3 : i32
    %c1_i32_27 = arith.constant 1 : i32
    %31 = arith.addi %30, %c1_i32_27 : i32
    %c0_28 = arith.constant 0 : index
    %32 = arith.index_cast %31 : i32 to index
    %c0_29 = arith.constant 0 : index
    %c0_30 = arith.constant 0 : index
    %33 = vector.load %arg3[%c0_28, %32, %c0_29, %c0_30] : memref<1x18x8x162xf32, #tpu.memory_space<vmem>>, vector<1x1x8x162xf32>
    %34 = vector.shape_cast %33 : vector<1x1x8x162xf32> to vector<8x162xf32>
    %c2_i32_31 = arith.constant 2 : i32
    %35 = arith.muli %c2_i32_31, %3 : i32
    %c2_i32_32 = arith.constant 2 : i32
    %36 = arith.addi %35, %c2_i32_32 : i32
    %c0_33 = arith.constant 0 : index
    %37 = arith.index_cast %36 : i32 to index
    %c0_34 = arith.constant 0 : index
    %c0_35 = arith.constant 0 : index
    %38 = vector.load %arg3[%c0_33, %37, %c0_34, %c0_35] : memref<1x18x8x162xf32, #tpu.memory_space<vmem>>, vector<1x1x8x162xf32>
    %39 = vector.shape_cast %38 : vector<1x1x8x162xf32> to vector<8x162xf32>
    %c2_i32_36 = arith.constant 2 : i32
    %40 = arith.muli %c2_i32_36, %3 : i32
    %c3_i32_37 = arith.constant 3 : i32
    %41 = arith.addi %40, %c3_i32_37 : i32
    %c0_38 = arith.constant 0 : index
    %42 = arith.index_cast %41 : i32 to index
    %c0_39 = arith.constant 0 : index
    %c0_40 = arith.constant 0 : index
    %43 = vector.load %arg3[%c0_38, %42, %c0_39, %c0_40] : memref<1x18x8x162xf32, #tpu.memory_space<vmem>>, vector<1x1x8x162xf32>
    %44 = vector.shape_cast %43 : vector<1x1x8x162xf32> to vector<8x162xf32>
    %45 = tpu.concatenate %29, %34, %39, %44 in 0 : vector<8x162xf32>, vector<8x162xf32>, vector<8x162xf32>, vector<8x162xf32> -> vector<32x162xf32>
    %46 = vector.extract_strided_slice %24 {offsets = [0, 0], sizes = [32, 134], strides = [1, 1]} : vector<32x162xf32> to vector<32x134xf32>
    %47 = vector.extract_strided_slice %45 {offsets = [0, 0], sizes = [32, 134], strides = [1, 1]} : vector<32x162xf32> to vector<32x134xf32>
    %48 = vector.extract_strided_slice %24 {offsets = [0, 1], sizes = [32, 134], strides = [1, 1]} : vector<32x162xf32> to vector<32x134xf32>
    %49 = vector.extract_strided_slice %45 {offsets = [0, 1], sizes = [32, 134], strides = [1, 1]} : vector<32x162xf32> to vector<32x134xf32>
    %50 = vector.extract_strided_slice %24 {offsets = [0, 9], sizes = [32, 134], strides = [1, 1]} : vector<32x162xf32> to vector<32x134xf32>
    %51 = vector.extract_strided_slice %45 {offsets = [0, 9], sizes = [32, 134], strides = [1, 1]} : vector<32x162xf32> to vector<32x134xf32>
    %52 = vector.extract_strided_slice %24 {offsets = [0, 10], sizes = [32, 134], strides = [1, 1]} : vector<32x162xf32> to vector<32x134xf32>
    %53 = vector.extract_strided_slice %45 {offsets = [0, 10], sizes = [32, 134], strides = [1, 1]} : vector<32x162xf32> to vector<32x134xf32>
    %54 = vector.extract_strided_slice %24 {offsets = [0, 18], sizes = [32, 134], strides = [1, 1]} : vector<32x162xf32> to vector<32x134xf32>
    %55 = vector.extract_strided_slice %45 {offsets = [0, 18], sizes = [32, 134], strides = [1, 1]} : vector<32x162xf32> to vector<32x134xf32>
    %56 = vector.extract_strided_slice %24 {offsets = [0, 19], sizes = [32, 134], strides = [1, 1]} : vector<32x162xf32> to vector<32x134xf32>
    %57 = vector.extract_strided_slice %45 {offsets = [0, 19], sizes = [32, 134], strides = [1, 1]} : vector<32x162xf32> to vector<32x134xf32>
    %58 = vector.extract_strided_slice %24 {offsets = [0, 27], sizes = [32, 134], strides = [1, 1]} : vector<32x162xf32> to vector<32x134xf32>
    %59 = vector.extract_strided_slice %45 {offsets = [0, 27], sizes = [32, 134], strides = [1, 1]} : vector<32x162xf32> to vector<32x134xf32>
    %60 = vector.extract_strided_slice %24 {offsets = [0, 28], sizes = [32, 134], strides = [1, 1]} : vector<32x162xf32> to vector<32x134xf32>
    %61 = vector.extract_strided_slice %45 {offsets = [0, 28], sizes = [32, 134], strides = [1, 1]} : vector<32x162xf32> to vector<32x134xf32>
    %62 = tpu.concatenate %46, %47, %48, %49, %50, %51, %52, %53, %54, %55, %56, %57, %58, %59, %60, %61 in 0 : vector<32x134xf32>, vector<32x134xf32>, vector<32x134xf32>, vector<32x134xf32>, vector<32x134xf32>, vector<32x134xf32>, vector<32x134xf32>, vector<32x134xf32>, vector<32x134xf32>, vector<32x134xf32>, vector<32x134xf32>, vector<32x134xf32>, vector<32x134xf32>, vector<32x134xf32>, vector<32x134xf32>, vector<32x134xf32> -> vector<512x134xf32>
    %cst = arith.constant dense<0.000000e+00> : vector<8x134xf32>
    %63 = tpu.matmul %0, %62, %cst {dimension_numbers = #tpu.dot_dimension_numbers<[1], [0], [0], [1], [0, 0, 1, 1], [], []>} : vector<8x512xf32>, vector<512x134xf32>, vector<8x134xf32> -> vector<8x134xf32>
    %64 = vector.broadcast %1 : vector<8x1xf32> to vector<8x134xf32>
    %65 = arith.addf %63, %64 : vector<8x134xf32>
    %cst_41 = arith.constant 0.000000e+00 : f32
    %66 = vector.broadcast %cst_41 : f32 to vector<8x134xf32>
    %67 = arith.maximumf %65, %66 : vector<8x134xf32>
    %c0_42 = arith.constant 0 : index
    %c0_43 = arith.constant 0 : index
    %c0_44 = arith.constant 0 : index
    %c0_45 = arith.constant 0 : index
    %68 = vector.load %arg6[%c0_42, %c0_43, %c0_44, %c0_45] : memref<1x2x8x134xf32, #tpu.memory_space<vmem>>, vector<1x1x8x134xf32>
    %69 = vector.shape_cast %68 : vector<1x1x8x134xf32> to vector<8x134xf32>
    %70 = vector.shape_cast %67 : vector<8x134xf32> to vector<1x1x8x134xf32>
    tpu.vector_store %arg6[%c0_42, %c0_43, %c0_44, %c0_45], %70 {strides = array<i32>} : memref<1x2x8x134xf32, #tpu.memory_space<vmem>>, vector<1x1x8x134xf32>,
    %c1_i32_46 = arith.constant 1 : i32
    %71 = arith.addi %2, %c1_i32_46 : i32
    %c2_i32_47 = arith.constant 2 : i32
    %72 = arith.muli %c2_i32_47, %71 : i32
    %c0_i32_48 = arith.constant 0 : i32
    %73 = arith.addi %72, %c0_i32_48 : i32
    %c0_49 = arith.constant 0 : index
    %74 = arith.index_cast %73 : i32 to index
    %c0_50 = arith.constant 0 : index
    %c0_51 = arith.constant 0 : index
    %75 = vector.load %arg2[%c0_49, %74, %c0_50, %c0_51] : memref<1x18x8x162xf32, #tpu.memory_space<vmem>>, vector<1x1x8x162xf32>
    %76 = vector.shape_cast %75 : vector<1x1x8x162xf32> to vector<8x162xf32>
    %c2_i32_52 = arith.constant 2 : i32
    %77 = arith.muli %c2_i32_52, %71 : i32
    %c1_i32_53 = arith.constant 1 : i32
    %78 = arith.addi %77, %c1_i32_53 : i32
    %c0_54 = arith.constant 0 : index
    %79 = arith.index_cast %78 : i32 to index
    %c0_55 = arith.constant 0 : index
    %c0_56 = arith.constant 0 : index
    %80 = vector.load %arg2[%c0_54, %79, %c0_55, %c0_56] : memref<1x18x8x162xf32, #tpu.memory_space<vmem>>, vector<1x1x8x162xf32>
    %81 = vector.shape_cast %80 : vector<1x1x8x162xf32> to vector<8x162xf32>
    %c2_i32_57 = arith.constant 2 : i32
    %82 = arith.muli %c2_i32_57, %71 : i32
    %c2_i32_58 = arith.constant 2 : i32
    %83 = arith.addi %82, %c2_i32_58 : i32
    %c0_59 = arith.constant 0 : index
    %84 = arith.index_cast %83 : i32 to index
    %c0_60 = arith.constant 0 : index
    %c0_61 = arith.constant 0 : index
    %85 = vector.load %arg2[%c0_59, %84, %c0_60, %c0_61] : memref<1x18x8x162xf32, #tpu.memory_space<vmem>>, vector<1x1x8x162xf32>
    %86 = vector.shape_cast %85 : vector<1x1x8x162xf32> to vector<8x162xf32>
    %c2_i32_62 = arith.constant 2 : i32
    %87 = arith.muli %c2_i32_62, %71 : i32
    %c3_i32_63 = arith.constant 3 : i32
    %88 = arith.addi %87, %c3_i32_63 : i32
    %c0_64 = arith.constant 0 : index
    %89 = arith.index_cast %88 : i32 to index
    %c0_65 = arith.constant 0 : index
    %c0_66 = arith.constant 0 : index
    %90 = vector.load %arg2[%c0_64, %89, %c0_65, %c0_66] : memref<1x18x8x162xf32, #tpu.memory_space<vmem>>, vector<1x1x8x162xf32>
    %91 = vector.shape_cast %90 : vector<1x1x8x162xf32> to vector<8x162xf32>
    %92 = tpu.concatenate %76, %81, %86, %91 in 0 : vector<8x162xf32>, vector<8x162xf32>, vector<8x162xf32>, vector<8x162xf32> -> vector<32x162xf32>
    %c2_i32_67 = arith.constant 2 : i32
    %93 = arith.muli %c2_i32_67, %71 : i32
    %c0_i32_68 = arith.constant 0 : i32
    %94 = arith.addi %93, %c0_i32_68 : i32
    %c0_69 = arith.constant 0 : index
    %95 = arith.index_cast %94 : i32 to index
    %c0_70 = arith.constant 0 : index
    %c0_71 = arith.constant 0 : index
    %96 = vector.load %arg3[%c0_69, %95, %c0_70, %c0_71] : memref<1x18x8x162xf32, #tpu.memory_space<vmem>>, vector<1x1x8x162xf32>
    %97 = vector.shape_cast %96 : vector<1x1x8x162xf32> to vector<8x162xf32>
    %c2_i32_72 = arith.constant 2 : i32
    %98 = arith.muli %c2_i32_72, %71 : i32
    %c1_i32_73 = arith.constant 1 : i32
    %99 = arith.addi %98, %c1_i32_73 : i32
    %c0_74 = arith.constant 0 : index
    %100 = arith.index_cast %99 : i32 to index
    %c0_75 = arith.constant 0 : index
    %c0_76 = arith.constant 0 : index
    %101 = vector.load %arg3[%c0_74, %100, %c0_75, %c0_76] : memref<1x18x8x162xf32, #tpu.memory_space<vmem>>, vector<1x1x8x162xf32>
    %102 = vector.shape_cast %101 : vector<1x1x8x162xf32> to vector<8x162xf32>
    %c2_i32_77 = arith.constant 2 : i32
    %103 = arith.muli %c2_i32_77, %71 : i32
    %c2_i32_78 = arith.constant 2 : i32
    %104 = arith.addi %103, %c2_i32_78 : i32
    %c0_79 = arith.constant 0 : index
    %105 = arith.index_cast %104 : i32 to index
    %c0_80 = arith.constant 0 : index
    %c0_81 = arith.constant 0 : index
    %106 = vector.load %arg3[%c0_79, %105, %c0_80, %c0_81] : memref<1x18x8x162xf32, #tpu.memory_space<vmem>>, vector<1x1x8x162xf32>
    %107 = vector.shape_cast %106 : vector<1x1x8x162xf32> to vector<8x162xf32>
    %c2_i32_82 = arith.constant 2 : i32
    %108 = arith.muli %c2_i32_82, %71 : i32
    %c3_i32_83 = arith.constant 3 : i32
    %109 = arith.addi %108, %c3_i32_83 : i32
    %c0_84 = arith.constant 0 : index
    %110 = arith.index_cast %109 : i32 to index
    %c0_85 = arith.constant 0 : index
    %c0_86 = arith.constant 0 : index
    %111 = vector.load %arg3[%c0_84, %110, %c0_85, %c0_86] : memref<1x18x8x162xf32, #tpu.memory_space<vmem>>, vector<1x1x8x162xf32>
    %112 = vector.shape_cast %111 : vector<1x1x8x162xf32> to vector<8x162xf32>
    %113 = tpu.concatenate %97, %102, %107, %112 in 0 : vector<8x162xf32>, vector<8x162xf32>, vector<8x162xf32>, vector<8x162xf32> -> vector<32x162xf32>
    %114 = vector.extract_strided_slice %92 {offsets = [0, 0], sizes = [32, 134], strides = [1, 1]} : vector<32x162xf32> to vector<32x134xf32>
    %115 = vector.extract_strided_slice %113 {offsets = [0, 0], sizes = [32, 134], strides = [1, 1]} : vector<32x162xf32> to vector<32x134xf32>
    %116 = vector.extract_strided_slice %92 {offsets = [0, 1], sizes = [32, 134], strides = [1, 1]} : vector<32x162xf32> to vector<32x134xf32>
    %117 = vector.extract_strided_slice %113 {offsets = [0, 1], sizes = [32, 134], strides = [1, 1]} : vector<32x162xf32> to vector<32x134xf32>
    %118 = vector.extract_strided_slice %92 {offsets = [0, 9], sizes = [32, 134], strides = [1, 1]} : vector<32x162xf32> to vector<32x134xf32>
    %119 = vector.extract_strided_slice %113 {offsets = [0, 9], sizes = [32, 134], strides = [1, 1]} : vector<32x162xf32> to vector<32x134xf32>
    %120 = vector.extract_strided_slice %92 {offsets = [0, 10], sizes = [32, 134], strides = [1, 1]} : vector<32x162xf32> to vector<32x134xf32>
    %121 = vector.extract_strided_slice %113 {offsets = [0, 10], sizes = [32, 134], strides = [1, 1]} : vector<32x162xf32> to vector<32x134xf32>
    %122 = vector.extract_strided_slice %92 {offsets = [0, 18], sizes = [32, 134], strides = [1, 1]} : vector<32x162xf32> to vector<32x134xf32>
    %123 = vector.extract_strided_slice %113 {offsets = [0, 18], sizes = [32, 134], strides = [1, 1]} : vector<32x162xf32> to vector<32x134xf32>
    %124 = vector.extract_strided_slice %92 {offsets = [0, 19], sizes = [32, 134], strides = [1, 1]} : vector<32x162xf32> to vector<32x134xf32>
    %125 = vector.extract_strided_slice %113 {offsets = [0, 19], sizes = [32, 134], strides = [1, 1]} : vector<32x162xf32> to vector<32x134xf32>
    %126 = vector.extract_strided_slice %92 {offsets = [0, 27], sizes = [32, 134], strides = [1, 1]} : vector<32x162xf32> to vector<32x134xf32>
    %127 = vector.extract_strided_slice %113 {offsets = [0, 27], sizes = [32, 134], strides = [1, 1]} : vector<32x162xf32> to vector<32x134xf32>
    %128 = vector.extract_strided_slice %92 {offsets = [0, 28], sizes = [32, 134], strides = [1, 1]} : vector<32x162xf32> to vector<32x134xf32>
    %129 = vector.extract_strided_slice %113 {offsets = [0, 28], sizes = [32, 134], strides = [1, 1]} : vector<32x162xf32> to vector<32x134xf32>
    %130 = tpu.concatenate %114, %115, %116, %117, %118, %119, %120, %121, %122, %123, %124, %125, %126, %127, %128, %129 in 0 : vector<32x134xf32>, vector<32x134xf32>, vector<32x134xf32>, vector<32x134xf32>, vector<32x134xf32>, vector<32x134xf32>, vector<32x134xf32>, vector<32x134xf32>, vector<32x134xf32>, vector<32x134xf32>, vector<32x134xf32>, vector<32x134xf32>, vector<32x134xf32>, vector<32x134xf32>, vector<32x134xf32>, vector<32x134xf32> -> vector<512x134xf32>
    %cst_87 = arith.constant dense<0.000000e+00> : vector<8x134xf32>
    %131 = tpu.matmul %0, %130, %cst_87 {dimension_numbers = #tpu.dot_dimension_numbers<[1], [0], [0], [1], [0, 0, 1, 1], [], []>} : vector<8x512xf32>, vector<512x134xf32>, vector<8x134xf32> -> vector<8x134xf32>
    %132 = vector.broadcast %1 : vector<8x1xf32> to vector<8x134xf32>
    %133 = arith.addf %131, %132 : vector<8x134xf32>
    %cst_88 = arith.constant 0.000000e+00 : f32
    %134 = vector.broadcast %cst_88 : f32 to vector<8x134xf32>
    %135 = arith.maximumf %133, %134 : vector<8x134xf32>
    %c0_89 = arith.constant 0 : index
    %c1 = arith.constant 1 : index
    %c0_90 = arith.constant 0 : index
    %c0_91 = arith.constant 0 : index
    %136 = vector.load %arg6[%c0_89, %c1, %c0_90, %c0_91] : memref<1x2x8x134xf32, #tpu.memory_space<vmem>>, vector<1x1x8x134xf32>
    %137 = vector.shape_cast %136 : vector<1x1x8x134xf32> to vector<8x134xf32>
    %138 = vector.shape_cast %135 : vector<8x134xf32> to vector<1x1x8x134xf32>
    tpu.vector_store %arg6[%c0_89, %c1, %c0_90, %c0_91], %138 {strides = array<i32>} : memref<1x2x8x134xf32, #tpu.memory_space<vmem>>, vector<1x1x8x134xf32>,
    return
  }
  func.func @transform_0(%arg0: i32, %arg1: i32) -> (i32, i32, i32, i32) {
    %c0_i32 = arith.constant 0 : i32
    %c0_i32_0 = arith.constant 0 : i32
    %c0_i32_1 = arith.constant 0 : i32
    %c0_i32_2 = arith.constant 0 : i32
    return %arg0, %c0_i32, %c0_i32_0, %c0_i32_1 : i32, i32, i32, i32
  }
  func.func @transform_1(%arg0: i32, %arg1: i32) -> (i32, i32, i32, i32) {
    %c0_i32 = arith.constant 0 : i32
    %c0_i32_0 = arith.constant 0 : i32
    %c0_i32_1 = arith.constant 0 : i32
    %c0_i32_2 = arith.constant 0 : i32
    return %arg0, %c0_i32, %c0_i32_0, %c0_i32_1 : i32, i32, i32, i32
  }
  func.func @transform_2(%arg0: i32, %arg1: i32) -> (i32, i32) {
    %c0_i32 = arith.constant 0 : i32
    %c0_i32_0 = arith.constant 0 : i32
    %c0_i32_1 = arith.constant 0 : i32
    return %c0_i32, %c0_i32_0 : i32, i32
  }
  func.func @transform_3(%arg0: i32, %arg1: i32) -> (i32, i32) {
    %c0_i32 = arith.constant 0 : i32
    %c0_i32_0 = arith.constant 0 : i32
    %c0_i32_1 = arith.constant 0 : i32
    return %c0_i32, %c0_i32_0 : i32, i32
  }
  func.func @transform_4(%arg0: i32, %arg1: i32) -> (i32, i32, i32, i32) {
    %c0_i32 = arith.constant 0 : i32
    %c0_i32_0 = arith.constant 0 : i32
    %c0_i32_1 = arith.constant 0 : i32
    return %arg0, %arg1, %c0_i32, %c0_i32_0 : i32, i32, i32, i32
  }
}

module attributes {stable_mosaic.version = 11 : i64} {
  func.func @_maxpool2_kernel(%arg0: i32, %arg1: i32, %arg2: memref<1x16x8x128xf32, #tpu.memory_space<vmem>>, %arg3: memref<1x16x8x128xf32, #tpu.memory_space<vmem>>, %arg4: memref<1x2x8x120xf32, #tpu.memory_space<vmem>>) attributes {dimension_semantics = [#tpu.dimension_semantics<parallel>, #tpu.dimension_semantics<parallel>], iteration_bounds = array<i64: 2, 4>, scalar_prefetch = 0 : i64, scratch_operands = 0 : i64, tpu.core_type = #tpu.core_type<tc>, window_params = [{transform_indices = @transform_0, window_bounds = array<i64: 1, 16, 8, 128>}, {transform_indices = @transform_1, window_bounds = array<i64: 1, 16, 8, 128>}, {transform_indices = @transform_2, window_bounds = array<i64: 1, 2, 8, 120>}]} {
    %c2_i32 = arith.constant 2 : i32
    %0 = arith.muli %arg1, %c2_i32 : i32
    %c0_i32 = arith.constant 0 : i32
    %1 = arith.addi %0, %c0_i32 : i32
    %c2_i32_0 = arith.constant 2 : i32
    %2 = arith.muli %c2_i32_0, %1 : i32
    %c0_i32_1 = arith.constant 0 : i32
    %3 = arith.addi %2, %c0_i32_1 : i32
    %c0 = arith.constant 0 : index
    %4 = arith.index_cast %3 : i32 to index
    %c0_2 = arith.constant 0 : index
    %c0_3 = arith.constant 0 : index
    %5 = vector.load %arg2[%c0, %4, %c0_2, %c0_3] : memref<1x16x8x128xf32, #tpu.memory_space<vmem>>, vector<1x1x8x128xf32>
    %6 = vector.shape_cast %5 : vector<1x1x8x128xf32> to vector<8x128xf32>
    %c2_i32_4 = arith.constant 2 : i32
    %7 = arith.muli %c2_i32_4, %1 : i32
    %c0_i32_5 = arith.constant 0 : i32
    %8 = arith.addi %7, %c0_i32_5 : i32
    %c0_6 = arith.constant 0 : index
    %9 = arith.index_cast %8 : i32 to index
    %c0_7 = arith.constant 0 : index
    %c0_8 = arith.constant 0 : index
    %10 = vector.load %arg3[%c0_6, %9, %c0_7, %c0_8] : memref<1x16x8x128xf32, #tpu.memory_space<vmem>>, vector<1x1x8x128xf32>
    %11 = vector.shape_cast %10 : vector<1x1x8x128xf32> to vector<8x128xf32>
    %12 = vector.extract_strided_slice %6 {offsets = [0, 0], sizes = [8, 120], strides = [1, 1]} : vector<8x128xf32> to vector<8x120xf32>
    %13 = vector.extract_strided_slice %11 {offsets = [0, 0], sizes = [8, 120], strides = [1, 1]} : vector<8x128xf32> to vector<8x120xf32>
    %14 = arith.maximumf %12, %13 : vector<8x120xf32>
    %15 = vector.extract_strided_slice %6 {offsets = [0, 8], sizes = [8, 120], strides = [1, 1]} : vector<8x128xf32> to vector<8x120xf32>
    %16 = arith.maximumf %14, %15 : vector<8x120xf32>
    %17 = vector.extract_strided_slice %11 {offsets = [0, 8], sizes = [8, 120], strides = [1, 1]} : vector<8x128xf32> to vector<8x120xf32>
    %18 = arith.maximumf %16, %17 : vector<8x120xf32>
    %c2_i32_9 = arith.constant 2 : i32
    %19 = arith.muli %c2_i32_9, %1 : i32
    %c1_i32 = arith.constant 1 : i32
    %20 = arith.addi %19, %c1_i32 : i32
    %c0_10 = arith.constant 0 : index
    %21 = arith.index_cast %20 : i32 to index
    %c0_11 = arith.constant 0 : index
    %c0_12 = arith.constant 0 : index
    %22 = vector.load %arg2[%c0_10, %21, %c0_11, %c0_12] : memref<1x16x8x128xf32, #tpu.memory_space<vmem>>, vector<1x1x8x128xf32>
    %23 = vector.shape_cast %22 : vector<1x1x8x128xf32> to vector<8x128xf32>
    %c2_i32_13 = arith.constant 2 : i32
    %24 = arith.muli %c2_i32_13, %1 : i32
    %c1_i32_14 = arith.constant 1 : i32
    %25 = arith.addi %24, %c1_i32_14 : i32
    %c0_15 = arith.constant 0 : index
    %26 = arith.index_cast %25 : i32 to index
    %c0_16 = arith.constant 0 : index
    %c0_17 = arith.constant 0 : index
    %27 = vector.load %arg3[%c0_15, %26, %c0_16, %c0_17] : memref<1x16x8x128xf32, #tpu.memory_space<vmem>>, vector<1x1x8x128xf32>
    %28 = vector.shape_cast %27 : vector<1x1x8x128xf32> to vector<8x128xf32>
    %29 = vector.extract_strided_slice %23 {offsets = [0, 0], sizes = [8, 120], strides = [1, 1]} : vector<8x128xf32> to vector<8x120xf32>
    %30 = arith.maximumf %18, %29 : vector<8x120xf32>
    %31 = vector.extract_strided_slice %28 {offsets = [0, 0], sizes = [8, 120], strides = [1, 1]} : vector<8x128xf32> to vector<8x120xf32>
    %32 = arith.maximumf %30, %31 : vector<8x120xf32>
    %33 = vector.extract_strided_slice %23 {offsets = [0, 8], sizes = [8, 120], strides = [1, 1]} : vector<8x128xf32> to vector<8x120xf32>
    %34 = arith.maximumf %32, %33 : vector<8x120xf32>
    %35 = vector.extract_strided_slice %28 {offsets = [0, 8], sizes = [8, 120], strides = [1, 1]} : vector<8x128xf32> to vector<8x120xf32>
    %36 = arith.maximumf %34, %35 : vector<8x120xf32>
    %c0_18 = arith.constant 0 : index
    %c0_19 = arith.constant 0 : index
    %c0_20 = arith.constant 0 : index
    %c0_21 = arith.constant 0 : index
    %37 = vector.load %arg4[%c0_18, %c0_19, %c0_20, %c0_21] : memref<1x2x8x120xf32, #tpu.memory_space<vmem>>, vector<1x1x8x120xf32>
    %38 = vector.shape_cast %37 : vector<1x1x8x120xf32> to vector<8x120xf32>
    %39 = vector.shape_cast %36 : vector<8x120xf32> to vector<1x1x8x120xf32>
    tpu.vector_store %arg4[%c0_18, %c0_19, %c0_20, %c0_21], %39 {strides = array<i32>} : memref<1x2x8x120xf32, #tpu.memory_space<vmem>>, vector<1x1x8x120xf32>,
    %c1_i32_22 = arith.constant 1 : i32
    %40 = arith.addi %0, %c1_i32_22 : i32
    %c2_i32_23 = arith.constant 2 : i32
    %41 = arith.muli %c2_i32_23, %40 : i32
    %c0_i32_24 = arith.constant 0 : i32
    %42 = arith.addi %41, %c0_i32_24 : i32
    %c0_25 = arith.constant 0 : index
    %43 = arith.index_cast %42 : i32 to index
    %c0_26 = arith.constant 0 : index
    %c0_27 = arith.constant 0 : index
    %44 = vector.load %arg2[%c0_25, %43, %c0_26, %c0_27] : memref<1x16x8x128xf32, #tpu.memory_space<vmem>>, vector<1x1x8x128xf32>
    %45 = vector.shape_cast %44 : vector<1x1x8x128xf32> to vector<8x128xf32>
    %c2_i32_28 = arith.constant 2 : i32
    %46 = arith.muli %c2_i32_28, %40 : i32
    %c0_i32_29 = arith.constant 0 : i32
    %47 = arith.addi %46, %c0_i32_29 : i32
    %c0_30 = arith.constant 0 : index
    %48 = arith.index_cast %47 : i32 to index
    %c0_31 = arith.constant 0 : index
    %c0_32 = arith.constant 0 : index
    %49 = vector.load %arg3[%c0_30, %48, %c0_31, %c0_32] : memref<1x16x8x128xf32, #tpu.memory_space<vmem>>, vector<1x1x8x128xf32>
    %50 = vector.shape_cast %49 : vector<1x1x8x128xf32> to vector<8x128xf32>
    %51 = vector.extract_strided_slice %45 {offsets = [0, 0], sizes = [8, 120], strides = [1, 1]} : vector<8x128xf32> to vector<8x120xf32>
    %52 = vector.extract_strided_slice %50 {offsets = [0, 0], sizes = [8, 120], strides = [1, 1]} : vector<8x128xf32> to vector<8x120xf32>
    %53 = arith.maximumf %51, %52 : vector<8x120xf32>
    %54 = vector.extract_strided_slice %45 {offsets = [0, 8], sizes = [8, 120], strides = [1, 1]} : vector<8x128xf32> to vector<8x120xf32>
    %55 = arith.maximumf %53, %54 : vector<8x120xf32>
    %56 = vector.extract_strided_slice %50 {offsets = [0, 8], sizes = [8, 120], strides = [1, 1]} : vector<8x128xf32> to vector<8x120xf32>
    %57 = arith.maximumf %55, %56 : vector<8x120xf32>
    %c2_i32_33 = arith.constant 2 : i32
    %58 = arith.muli %c2_i32_33, %40 : i32
    %c1_i32_34 = arith.constant 1 : i32
    %59 = arith.addi %58, %c1_i32_34 : i32
    %c0_35 = arith.constant 0 : index
    %60 = arith.index_cast %59 : i32 to index
    %c0_36 = arith.constant 0 : index
    %c0_37 = arith.constant 0 : index
    %61 = vector.load %arg2[%c0_35, %60, %c0_36, %c0_37] : memref<1x16x8x128xf32, #tpu.memory_space<vmem>>, vector<1x1x8x128xf32>
    %62 = vector.shape_cast %61 : vector<1x1x8x128xf32> to vector<8x128xf32>
    %c2_i32_38 = arith.constant 2 : i32
    %63 = arith.muli %c2_i32_38, %40 : i32
    %c1_i32_39 = arith.constant 1 : i32
    %64 = arith.addi %63, %c1_i32_39 : i32
    %c0_40 = arith.constant 0 : index
    %65 = arith.index_cast %64 : i32 to index
    %c0_41 = arith.constant 0 : index
    %c0_42 = arith.constant 0 : index
    %66 = vector.load %arg3[%c0_40, %65, %c0_41, %c0_42] : memref<1x16x8x128xf32, #tpu.memory_space<vmem>>, vector<1x1x8x128xf32>
    %67 = vector.shape_cast %66 : vector<1x1x8x128xf32> to vector<8x128xf32>
    %68 = vector.extract_strided_slice %62 {offsets = [0, 0], sizes = [8, 120], strides = [1, 1]} : vector<8x128xf32> to vector<8x120xf32>
    %69 = arith.maximumf %57, %68 : vector<8x120xf32>
    %70 = vector.extract_strided_slice %67 {offsets = [0, 0], sizes = [8, 120], strides = [1, 1]} : vector<8x128xf32> to vector<8x120xf32>
    %71 = arith.maximumf %69, %70 : vector<8x120xf32>
    %72 = vector.extract_strided_slice %62 {offsets = [0, 8], sizes = [8, 120], strides = [1, 1]} : vector<8x128xf32> to vector<8x120xf32>
    %73 = arith.maximumf %71, %72 : vector<8x120xf32>
    %74 = vector.extract_strided_slice %67 {offsets = [0, 8], sizes = [8, 120], strides = [1, 1]} : vector<8x128xf32> to vector<8x120xf32>
    %75 = arith.maximumf %73, %74 : vector<8x120xf32>
    %c0_43 = arith.constant 0 : index
    %c1 = arith.constant 1 : index
    %c0_44 = arith.constant 0 : index
    %c0_45 = arith.constant 0 : index
    %76 = vector.load %arg4[%c0_43, %c1, %c0_44, %c0_45] : memref<1x2x8x120xf32, #tpu.memory_space<vmem>>, vector<1x1x8x120xf32>
    %77 = vector.shape_cast %76 : vector<1x1x8x120xf32> to vector<8x120xf32>
    %78 = vector.shape_cast %75 : vector<8x120xf32> to vector<1x1x8x120xf32>
    tpu.vector_store %arg4[%c0_43, %c1, %c0_44, %c0_45], %78 {strides = array<i32>} : memref<1x2x8x120xf32, #tpu.memory_space<vmem>>, vector<1x1x8x120xf32>,
    return
  }
  func.func @transform_0(%arg0: i32, %arg1: i32) -> (i32, i32, i32, i32) {
    %c0_i32 = arith.constant 0 : i32
    %c0_i32_0 = arith.constant 0 : i32
    %c0_i32_1 = arith.constant 0 : i32
    %c0_i32_2 = arith.constant 0 : i32
    return %arg0, %c0_i32, %c0_i32_0, %c0_i32_1 : i32, i32, i32, i32
  }
  func.func @transform_1(%arg0: i32, %arg1: i32) -> (i32, i32, i32, i32) {
    %c0_i32 = arith.constant 0 : i32
    %c0_i32_0 = arith.constant 0 : i32
    %c0_i32_1 = arith.constant 0 : i32
    %c0_i32_2 = arith.constant 0 : i32
    return %arg0, %c0_i32, %c0_i32_0, %c0_i32_1 : i32, i32, i32, i32
  }
  func.func @transform_2(%arg0: i32, %arg1: i32) -> (i32, i32, i32, i32) {
    %c0_i32 = arith.constant 0 : i32
    %c0_i32_0 = arith.constant 0 : i32
    %c0_i32_1 = arith.constant 0 : i32
    return %arg0, %arg1, %c0_i32, %c0_i32_0 : i32, i32, i32, i32
  }
}

module attributes {stable_mosaic.version = 11 : i64} {
  func.func @_dilated3_dual_kernel(%arg0: i32, %arg1: i32, %arg2: memref<1x12x8x144xf32, #tpu.memory_space<vmem>>, %arg3: memref<1x12x8x144xf32, #tpu.memory_space<vmem>>, %arg4: memref<16x432xf32, #tpu.memory_space<vmem>>, %arg5: memref<16x1xf32, #tpu.memory_space<vmem>>, %arg6: memref<1x2x16x92xf32, #tpu.memory_space<vmem>>) attributes {dimension_semantics = [#tpu.dimension_semantics<parallel>, #tpu.dimension_semantics<parallel>], iteration_bounds = array<i64: 2, 4>, scalar_prefetch = 0 : i64, scratch_operands = 0 : i64, tpu.core_type = #tpu.core_type<tc>, window_params = [{transform_indices = @transform_0, window_bounds = array<i64: 1, 12, 8, 144>}, {transform_indices = @transform_1, window_bounds = array<i64: 1, 12, 8, 144>}, {pipeline_mode = #tpu.pipeline_mode<synchronous>, transform_indices = @transform_2, window_bounds = array<i64: 16, 432>}, {pipeline_mode = #tpu.pipeline_mode<synchronous>, transform_indices = @transform_3, window_bounds = array<i64: 16, 1>}, {transform_indices = @transform_4, window_bounds = array<i64: 1, 2, 16, 92>}]} {
    %c0 = arith.constant 0 : index
    %c0_0 = arith.constant 0 : index
    %0 = vector.load %arg4[%c0, %c0_0] : memref<16x432xf32, #tpu.memory_space<vmem>>, vector<16x432xf32>
    %c0_1 = arith.constant 0 : index
    %c0_2 = arith.constant 0 : index
    %1 = vector.load %arg5[%c0_1, %c0_2] : memref<16x1xf32, #tpu.memory_space<vmem>>, vector<16x1xf32>
    %c2_i32 = arith.constant 2 : i32
    %2 = arith.muli %arg1, %c2_i32 : i32
    %c0_i32 = arith.constant 0 : i32
    %3 = arith.addi %2, %c0_i32 : i32
    %c0_i32_3 = arith.constant 0 : i32
    %4 = arith.addi %3, %c0_i32_3 : i32
    %c0_4 = arith.constant 0 : index
    %5 = arith.index_cast %4 : i32 to index
    %c0_5 = arith.constant 0 : index
    %c0_6 = arith.constant 0 : index
    %6 = vector.load %arg2[%c0_4, %5, %c0_5, %c0_6] : memref<1x12x8x144xf32, #tpu.memory_space<vmem>>, vector<1x1x8x144xf32>
    %7 = vector.shape_cast %6 : vector<1x1x8x144xf32> to vector<8x144xf32>
    %c0_i32_7 = arith.constant 0 : i32
    %8 = arith.addi %2, %c0_i32_7 : i32
    %c0_i32_8 = arith.constant 0 : i32
    %9 = arith.addi %8, %c0_i32_8 : i32
    %c0_9 = arith.constant 0 : index
    %10 = arith.index_cast %9 : i32 to index
    %c0_10 = arith.constant 0 : index
    %c0_11 = arith.constant 0 : index
    %11 = vector.load %arg3[%c0_9, %10, %c0_10, %c0_11] : memref<1x12x8x144xf32, #tpu.memory_space<vmem>>, vector<1x1x8x144xf32>
    %12 = vector.shape_cast %11 : vector<1x1x8x144xf32> to vector<8x144xf32>
    %c0_i32_12 = arith.constant 0 : i32
    %13 = arith.addi %2, %c0_i32_12 : i32
    %c2_i32_13 = arith.constant 2 : i32
    %14 = arith.addi %13, %c2_i32_13 : i32
    %c0_14 = arith.constant 0 : index
    %15 = arith.index_cast %14 : i32 to index
    %c0_15 = arith.constant 0 : index
    %c0_16 = arith.constant 0 : index
    %16 = vector.load %arg2[%c0_14, %15, %c0_15, %c0_16] : memref<1x12x8x144xf32, #tpu.memory_space<vmem>>, vector<1x1x8x144xf32>
    %17 = vector.shape_cast %16 : vector<1x1x8x144xf32> to vector<8x144xf32>
    %c0_i32_17 = arith.constant 0 : i32
    %18 = arith.addi %2, %c0_i32_17 : i32
    %c2_i32_18 = arith.constant 2 : i32
    %19 = arith.addi %18, %c2_i32_18 : i32
    %c0_19 = arith.constant 0 : index
    %20 = arith.index_cast %19 : i32 to index
    %c0_20 = arith.constant 0 : index
    %c0_21 = arith.constant 0 : index
    %21 = vector.load %arg3[%c0_19, %20, %c0_20, %c0_21] : memref<1x12x8x144xf32, #tpu.memory_space<vmem>>, vector<1x1x8x144xf32>
    %22 = vector.shape_cast %21 : vector<1x1x8x144xf32> to vector<8x144xf32>
    %c0_i32_22 = arith.constant 0 : i32
    %23 = arith.addi %2, %c0_i32_22 : i32
    %c4_i32 = arith.constant 4 : i32
    %24 = arith.addi %23, %c4_i32 : i32
    %c0_23 = arith.constant 0 : index
    %25 = arith.index_cast %24 : i32 to index
    %c0_24 = arith.constant 0 : index
    %c0_25 = arith.constant 0 : index
    %26 = vector.load %arg2[%c0_23, %25, %c0_24, %c0_25] : memref<1x12x8x144xf32, #tpu.memory_space<vmem>>, vector<1x1x8x144xf32>
    %27 = vector.shape_cast %26 : vector<1x1x8x144xf32> to vector<8x144xf32>
    %c0_i32_26 = arith.constant 0 : i32
    %28 = arith.addi %2, %c0_i32_26 : i32
    %c4_i32_27 = arith.constant 4 : i32
    %29 = arith.addi %28, %c4_i32_27 : i32
    %c0_28 = arith.constant 0 : index
    %30 = arith.index_cast %29 : i32 to index
    %c0_29 = arith.constant 0 : index
    %c0_30 = arith.constant 0 : index
    %31 = vector.load %arg3[%c0_28, %30, %c0_29, %c0_30] : memref<1x12x8x144xf32, #tpu.memory_space<vmem>>, vector<1x1x8x144xf32>
    %32 = vector.shape_cast %31 : vector<1x1x8x144xf32> to vector<8x144xf32>
    %33 = tpu.concatenate %7, %12, %17, %22, %27, %32 in 0 : vector<8x144xf32>, vector<8x144xf32>, vector<8x144xf32>, vector<8x144xf32>, vector<8x144xf32>, vector<8x144xf32> -> vector<48x144xf32>
    %34 = vector.extract_strided_slice %33 {offsets = [0, 0], sizes = [48, 92], strides = [1, 1]} : vector<48x144xf32> to vector<48x92xf32>
    %35 = vector.extract_strided_slice %33 {offsets = [0, 2], sizes = [48, 92], strides = [1, 1]} : vector<48x144xf32> to vector<48x92xf32>
    %36 = vector.extract_strided_slice %33 {offsets = [0, 4], sizes = [48, 92], strides = [1, 1]} : vector<48x144xf32> to vector<48x92xf32>
    %37 = vector.extract_strided_slice %33 {offsets = [0, 24], sizes = [48, 92], strides = [1, 1]} : vector<48x144xf32> to vector<48x92xf32>
    %38 = vector.extract_strided_slice %33 {offsets = [0, 26], sizes = [48, 92], strides = [1, 1]} : vector<48x144xf32> to vector<48x92xf32>
    %39 = vector.extract_strided_slice %33 {offsets = [0, 28], sizes = [48, 92], strides = [1, 1]} : vector<48x144xf32> to vector<48x92xf32>
    %40 = vector.extract_strided_slice %33 {offsets = [0, 48], sizes = [48, 92], strides = [1, 1]} : vector<48x144xf32> to vector<48x92xf32>
    %41 = vector.extract_strided_slice %33 {offsets = [0, 50], sizes = [48, 92], strides = [1, 1]} : vector<48x144xf32> to vector<48x92xf32>
    %42 = vector.extract_strided_slice %33 {offsets = [0, 52], sizes = [48, 92], strides = [1, 1]} : vector<48x144xf32> to vector<48x92xf32>
    %43 = tpu.concatenate %34, %35, %36, %37, %38, %39, %40, %41, %42 in 0 : vector<48x92xf32>, vector<48x92xf32>, vector<48x92xf32>, vector<48x92xf32>, vector<48x92xf32>, vector<48x92xf32>, vector<48x92xf32>, vector<48x92xf32>, vector<48x92xf32> -> vector<432x92xf32>
    %cst = arith.constant dense<0.000000e+00> : vector<16x92xf32>
    %44 = tpu.matmul %0, %43, %cst {dimension_numbers = #tpu.dot_dimension_numbers<[1], [0], [0], [1], [0, 0, 1, 1], [], []>} : vector<16x432xf32>, vector<432x92xf32>, vector<16x92xf32> -> vector<16x92xf32>
    %45 = vector.broadcast %1 : vector<16x1xf32> to vector<16x92xf32>
    %46 = arith.addf %44, %45 : vector<16x92xf32>
    %cst_31 = arith.constant 0.000000e+00 : f32
    %47 = vector.broadcast %cst_31 : f32 to vector<16x92xf32>
    %48 = arith.maximumf %46, %47 : vector<16x92xf32>
    %c0_32 = arith.constant 0 : index
    %c0_33 = arith.constant 0 : index
    %c0_34 = arith.constant 0 : index
    %c0_35 = arith.constant 0 : index
    %49 = vector.load %arg6[%c0_32, %c0_33, %c0_34, %c0_35] : memref<1x2x16x92xf32, #tpu.memory_space<vmem>>, vector<1x1x16x92xf32>
    %50 = vector.shape_cast %49 : vector<1x1x16x92xf32> to vector<16x92xf32>
    %51 = vector.shape_cast %48 : vector<16x92xf32> to vector<1x1x16x92xf32>
    tpu.vector_store %arg6[%c0_32, %c0_33, %c0_34, %c0_35], %51 {strides = array<i32>} : memref<1x2x16x92xf32, #tpu.memory_space<vmem>>, vector<1x1x16x92xf32>,
    %c1_i32 = arith.constant 1 : i32
    %52 = arith.addi %2, %c1_i32 : i32
    %c0_i32_36 = arith.constant 0 : i32
    %53 = arith.addi %52, %c0_i32_36 : i32
    %c0_37 = arith.constant 0 : index
    %54 = arith.index_cast %53 : i32 to index
    %c0_38 = arith.constant 0 : index
    %c0_39 = arith.constant 0 : index
    %55 = vector.load %arg2[%c0_37, %54, %c0_38, %c0_39] : memref<1x12x8x144xf32, #tpu.memory_space<vmem>>, vector<1x1x8x144xf32>
    %56 = vector.shape_cast %55 : vector<1x1x8x144xf32> to vector<8x144xf32>
    %c1_i32_40 = arith.constant 1 : i32
    %57 = arith.addi %2, %c1_i32_40 : i32
    %c0_i32_41 = arith.constant 0 : i32
    %58 = arith.addi %57, %c0_i32_41 : i32
    %c0_42 = arith.constant 0 : index
    %59 = arith.index_cast %58 : i32 to index
    %c0_43 = arith.constant 0 : index
    %c0_44 = arith.constant 0 : index
    %60 = vector.load %arg3[%c0_42, %59, %c0_43, %c0_44] : memref<1x12x8x144xf32, #tpu.memory_space<vmem>>, vector<1x1x8x144xf32>
    %61 = vector.shape_cast %60 : vector<1x1x8x144xf32> to vector<8x144xf32>
    %c1_i32_45 = arith.constant 1 : i32
    %62 = arith.addi %2, %c1_i32_45 : i32
    %c2_i32_46 = arith.constant 2 : i32
    %63 = arith.addi %62, %c2_i32_46 : i32
    %c0_47 = arith.constant 0 : index
    %64 = arith.index_cast %63 : i32 to index
    %c0_48 = arith.constant 0 : index
    %c0_49 = arith.constant 0 : index
    %65 = vector.load %arg2[%c0_47, %64, %c0_48, %c0_49] : memref<1x12x8x144xf32, #tpu.memory_space<vmem>>, vector<1x1x8x144xf32>
    %66 = vector.shape_cast %65 : vector<1x1x8x144xf32> to vector<8x144xf32>
    %c1_i32_50 = arith.constant 1 : i32
    %67 = arith.addi %2, %c1_i32_50 : i32
    %c2_i32_51 = arith.constant 2 : i32
    %68 = arith.addi %67, %c2_i32_51 : i32
    %c0_52 = arith.constant 0 : index
    %69 = arith.index_cast %68 : i32 to index
    %c0_53 = arith.constant 0 : index
    %c0_54 = arith.constant 0 : index
    %70 = vector.load %arg3[%c0_52, %69, %c0_53, %c0_54] : memref<1x12x8x144xf32, #tpu.memory_space<vmem>>, vector<1x1x8x144xf32>
    %71 = vector.shape_cast %70 : vector<1x1x8x144xf32> to vector<8x144xf32>
    %c1_i32_55 = arith.constant 1 : i32
    %72 = arith.addi %2, %c1_i32_55 : i32
    %c4_i32_56 = arith.constant 4 : i32
    %73 = arith.addi %72, %c4_i32_56 : i32
    %c0_57 = arith.constant 0 : index
    %74 = arith.index_cast %73 : i32 to index
    %c0_58 = arith.constant 0 : index
    %c0_59 = arith.constant 0 : index
    %75 = vector.load %arg2[%c0_57, %74, %c0_58, %c0_59] : memref<1x12x8x144xf32, #tpu.memory_space<vmem>>, vector<1x1x8x144xf32>
    %76 = vector.shape_cast %75 : vector<1x1x8x144xf32> to vector<8x144xf32>
    %c1_i32_60 = arith.constant 1 : i32
    %77 = arith.addi %2, %c1_i32_60 : i32
    %c4_i32_61 = arith.constant 4 : i32
    %78 = arith.addi %77, %c4_i32_61 : i32
    %c0_62 = arith.constant 0 : index
    %79 = arith.index_cast %78 : i32 to index
    %c0_63 = arith.constant 0 : index
    %c0_64 = arith.constant 0 : index
    %80 = vector.load %arg3[%c0_62, %79, %c0_63, %c0_64] : memref<1x12x8x144xf32, #tpu.memory_space<vmem>>, vector<1x1x8x144xf32>
    %81 = vector.shape_cast %80 : vector<1x1x8x144xf32> to vector<8x144xf32>
    %82 = tpu.concatenate %56, %61, %66, %71, %76, %81 in 0 : vector<8x144xf32>, vector<8x144xf32>, vector<8x144xf32>, vector<8x144xf32>, vector<8x144xf32>, vector<8x144xf32> -> vector<48x144xf32>
    %83 = vector.extract_strided_slice %82 {offsets = [0, 0], sizes = [48, 92], strides = [1, 1]} : vector<48x144xf32> to vector<48x92xf32>
    %84 = vector.extract_strided_slice %82 {offsets = [0, 2], sizes = [48, 92], strides = [1, 1]} : vector<48x144xf32> to vector<48x92xf32>
    %85 = vector.extract_strided_slice %82 {offsets = [0, 4], sizes = [48, 92], strides = [1, 1]} : vector<48x144xf32> to vector<48x92xf32>
    %86 = vector.extract_strided_slice %82 {offsets = [0, 24], sizes = [48, 92], strides = [1, 1]} : vector<48x144xf32> to vector<48x92xf32>
    %87 = vector.extract_strided_slice %82 {offsets = [0, 26], sizes = [48, 92], strides = [1, 1]} : vector<48x144xf32> to vector<48x92xf32>
    %88 = vector.extract_strided_slice %82 {offsets = [0, 28], sizes = [48, 92], strides = [1, 1]} : vector<48x144xf32> to vector<48x92xf32>
    %89 = vector.extract_strided_slice %82 {offsets = [0, 48], sizes = [48, 92], strides = [1, 1]} : vector<48x144xf32> to vector<48x92xf32>
    %90 = vector.extract_strided_slice %82 {offsets = [0, 50], sizes = [48, 92], strides = [1, 1]} : vector<48x144xf32> to vector<48x92xf32>
    %91 = vector.extract_strided_slice %82 {offsets = [0, 52], sizes = [48, 92], strides = [1, 1]} : vector<48x144xf32> to vector<48x92xf32>
    %92 = tpu.concatenate %83, %84, %85, %86, %87, %88, %89, %90, %91 in 0 : vector<48x92xf32>, vector<48x92xf32>, vector<48x92xf32>, vector<48x92xf32>, vector<48x92xf32>, vector<48x92xf32>, vector<48x92xf32>, vector<48x92xf32>, vector<48x92xf32> -> vector<432x92xf32>
    %cst_65 = arith.constant dense<0.000000e+00> : vector<16x92xf32>
    %93 = tpu.matmul %0, %92, %cst_65 {dimension_numbers = #tpu.dot_dimension_numbers<[1], [0], [0], [1], [0, 0, 1, 1], [], []>} : vector<16x432xf32>, vector<432x92xf32>, vector<16x92xf32> -> vector<16x92xf32>
    %94 = vector.broadcast %1 : vector<16x1xf32> to vector<16x92xf32>
    %95 = arith.addf %93, %94 : vector<16x92xf32>
    %cst_66 = arith.constant 0.000000e+00 : f32
    %96 = vector.broadcast %cst_66 : f32 to vector<16x92xf32>
    %97 = arith.maximumf %95, %96 : vector<16x92xf32>
    %c0_67 = arith.constant 0 : index
    %c1 = arith.constant 1 : index
    %c0_68 = arith.constant 0 : index
    %c0_69 = arith.constant 0 : index
    %98 = vector.load %arg6[%c0_67, %c1, %c0_68, %c0_69] : memref<1x2x16x92xf32, #tpu.memory_space<vmem>>, vector<1x1x16x92xf32>
    %99 = vector.shape_cast %98 : vector<1x1x16x92xf32> to vector<16x92xf32>
    %100 = vector.shape_cast %97 : vector<16x92xf32> to vector<1x1x16x92xf32>
    tpu.vector_store %arg6[%c0_67, %c1, %c0_68, %c0_69], %100 {strides = array<i32>} : memref<1x2x16x92xf32, #tpu.memory_space<vmem>>, vector<1x1x16x92xf32>,
    return
  }
  func.func @transform_0(%arg0: i32, %arg1: i32) -> (i32, i32, i32, i32) {
    %c0_i32 = arith.constant 0 : i32
    %c0_i32_0 = arith.constant 0 : i32
    %c0_i32_1 = arith.constant 0 : i32
    %c0_i32_2 = arith.constant 0 : i32
    return %arg0, %c0_i32, %c0_i32_0, %c0_i32_1 : i32, i32, i32, i32
  }
  func.func @transform_1(%arg0: i32, %arg1: i32) -> (i32, i32, i32, i32) {
    %c0_i32 = arith.constant 0 : i32
    %c0_i32_0 = arith.constant 0 : i32
    %c0_i32_1 = arith.constant 0 : i32
    %c0_i32_2 = arith.constant 0 : i32
    return %arg0, %c0_i32, %c0_i32_0, %c0_i32_1 : i32, i32, i32, i32
  }
  func.func @transform_2(%arg0: i32, %arg1: i32) -> (i32, i32) {
    %c0_i32 = arith.constant 0 : i32
    %c0_i32_0 = arith.constant 0 : i32
    %c0_i32_1 = arith.constant 0 : i32
    return %c0_i32, %c0_i32_0 : i32, i32
  }
  func.func @transform_3(%arg0: i32, %arg1: i32) -> (i32, i32) {
    %c0_i32 = arith.constant 0 : i32
    %c0_i32_0 = arith.constant 0 : i32
    %c0_i32_1 = arith.constant 0 : i32
    return %c0_i32, %c0_i32_0 : i32, i32
  }
  func.func @transform_4(%arg0: i32, %arg1: i32) -> (i32, i32, i32, i32) {
    %c0_i32 = arith.constant 0 : i32
    %c0_i32_0 = arith.constant 0 : i32
    %c0_i32_1 = arith.constant 0 : i32
    return %arg0, %arg1, %c0_i32, %c0_i32_0 : i32, i32, i32, i32
  }
}

</mosaic_0001>

<bundles_post_ra>
// kernel: ppcd_forward.5
= control target key start
LH: loop header
LB: loop body
LE: loop exit
PB: predicated region body
PF: predicated region fallthrough
CT: control target
= control target key end

     0   :  { %s3201_s12 = smov 0   ;;  %s3203_s13 = smov 0   ;;  %s5058_s0 = inlined_call_operand.vmem [shape: f32[2,20,8,400], index: 0, kind: input, shape index: {}]   ;;  %s5059_s1 = inlined_call_operand.vmem [shape: f32[8,216], index: 1, kind: input, shape index: {}]   ;;  %s5060_s2 = inlined_call_operand.vmem [shape: f32[8,1], index: 2, kind: input, shape index: {}]   ;;  %s5061_s3 = inlined_call_operand.vmem [shape: f32[2,16,8,316], index: 3, kind: output, shape index: {}]  }
   0x1   :  { %s3205_s14 = smov 0   ;;  %s3207_s15 = smov 0  }
   0x2   :  { %s3209_s16 = smov 0  }
   0x3 LB: > { %s22_s17 = sadd.s32 1, %s3162_s14  ;;  %s25_s18 = sadd.s32 1, %s3166_s15  ;;  %s3170_s16 = sphi %s3209_s16, %s13_s16   ;;  %s3166_s15 = sphi %s3207_s15, %s5206_s15   ;;  %s3162_s14 = sphi %s3205_s14, %s5205_s14   ;;  %s3158_s13 = sphi %s3203_s13, %s5204_s13   ;;  %s3154_s12 = sphi %s3201_s12, %s5203_s12  }
   0x4   : > { %p23_p0 = scmp.ge.s32.totalorder %s22_s17, 4  ;;  %p2139_p1 = scmp.ge.s32.totalorder %s3170_s16, 1 }
   0x5   : > { %p151_p2 = scmp.lt.s32.totalorder %s3170_s16, 9 }
   0x6   : > { %s5208_s17 = smov (%p23_p0, %s22_s17), 0  ;;  %s5210_s18 = smov (!%p23_p0, %s25_s18), %s3166_s15 }
   0x7   : > { %p152_p3 = pnand %p2139_p1, %p151_p2  ;;  %p27_p4 = scmp.ge.s32.totalorder %s5210_s18, 2 }
   0x9   : > { %s5212_s18 = smov (%p27_p4, %s5210_s18), 0  ;;  %155 = sbr.rel (%p152_p3) target bundleno = 735 (0x2df), region = 32 }
   0xe   : > { %p180_p5 = scmp.lt.s32.totalorder %s3158_s13, 1  ;;  %s2228_s20 = sshll.u32 %s3154_s12, 7  ;;  %v3178_v21 = vmov 0   ;;  %v198_v29 = vld [vmem:[%s5060_s2] sm:$0xff]  ;;  %vm386_vm0 = vcmask 687104   ;;  %vm352_vm1 = vcmask 703488  }
   0xf   : > { %s3172_s25 = smov 126   ;;  %s3173_s26 = smov 124   ;;  %2503 = vset.pattern.permute.xlu1 %v3178_v21  ;;  %3099 = vset.pattern.permute.xlu0 %v3178_v21  ;;  %vm318_vm2 = vcmask 719872   ;;  %vm284_vm3 = vcmask 1014784   ;;  %vm250_vm4 = vcmask 1031168   ;;  %vm515_vm5 = vcmask 359424  }
  0x10   : > { %s5214_s13 = smov (!%p180_p5, %s3158_s13), 1  ;;  %s3174_s27 = smov 88   ;;  %vm472_vm6 = vcmask 375808   ;;  %vm429_vm7 = vcmask 392192   ;;  %vm667_vm8 = vcmask 490496  }
  0x11   : > { %s2236_s19 = smul.u32 640, %s5214_s13  ;;  %s3175_s28 = smov 86  }
  0x12   : > { %s3176_s29 = smov 84   ;;  %s3177_s30 = smov 48  }
  0x13   : > { %s184_s23 = scalar_lea.vmem %s5058_s0, %s2236_s19  ;;  %s3179_s4 = smov 46  }
  0x14   : > { %s3240_s24 = scalar_lea.vmem %s184_s23, %s2228_s20  ;;  %s3180_s5 = smov 44  }
  0x15   : > { %v3243_v0 = vld [vmem:[%s3240_s24 + $0x90] sm:$0xff]  ;;  %v3246_v1 = vld [vmem:[%s3240_s24 + $0x20] sm:$0xff]  ;;  %v3249_v2 = vld [vmem:[%s3240_s24 + $0x48] sm:$0xff]  ;;  %s2141_s19 = sshll.u32 %s3154_s12, 2  ;;  %s2238_s20 = smul.u32 48, %s5214_s13 }
  0x16   : > { %v2308_v3 = vpack.i.bf16 %v3246_v1, %v3243_v0  ;;  %v3254_v4 = vld [vmem:[%s3240_s24 + $0x50] sm:$0xff]  ;;  %v3257_v5 = vld [vmem:[%s3240_s24] sm:$0xff]  ;;  %v3260_v6 = vld [vmem:[%s3240_s24 + $0x8] sm:$0xff]  ;;  %p4329_p6 = scmp.lt.s32.totalorder %s2141_s19, 15 }
  0x17   : > { %v2298_v7 = vpack.i.bf16 %v3254_v4, %v3249_v2  ;;  %v2288_v8 = vpack.i.bf16 %v3260_v6, %v3257_v5  ;;  %v3270_v9 = vld [vmem:[%s3240_s24 + $0x80] sm:$0xff]  ;;  %v3273_v10 = vld [vmem:[%s3240_s24 + $0x88] sm:$0xff]  ;;  %v3276_v11 = vld [vmem:[%s3240_s24 + $0x10] sm:$0xff] }
  0x18   : > { %2309 = vrot.lane.b32.xlu2 %v2308_v3, %s3172_s25  ;;  %v3279_v12 = vld [vmem:[%s3240_s24 + $0x40] sm:$0xff]  ;;  %v2303_v13 = vpack.i.bf16 %v3273_v10, %v3270_v9  ;;  %v206_v15 = vld [vmem:[%s3240_s24 + $0x18] sm:$0xff]  ;;  %v3342_v25 = vld [vmem:[%s3240_s24 + $0x28] sm:$0xff]  ;;  %s5216_s19 = smov (!%p4329_p6, %s2141_s19), 15 }
  0x19   : > { %2299 = vrot.lane.b32.xlu1 %v2298_v7, %s3172_s25  ;;  %2289 = vrot.lane.b32.xlu0 %v2288_v8, %s3172_s25  ;;  %v2293_v14 = vpack.i.bf16 %v3279_v12, %v3276_v11  ;;  %v2418_v16 = vpack.i.bf16 %v206_v15, %v3276_v11  ;;  %v2151_v17 = vld [vmem:[%s3240_s24 + $0x58] sm:$0xff]  ;;  %v3315_v19 = vpack.i.bf16 %v3249_v2, %v3279_v12  ;;  %v3345_v26 = vld [vmem:[%s3240_s24 + $0x30] sm:$0xff]  ;;  %s2237_s21 = smul.u32 3, %s5216_s19 }
  0x1a   : > { %v2428_v18 = vpack.i.bf16 %v2151_v17, %v3254_v4  ;;  %v2157_v20 = vld [vmem:[%s3240_s24 + $0x98] sm:$0xff]  ;;  %v2504_v28 = vpack.i.bf16 %v3345_v26, %v3342_v25  ;;  %v3357_v30 = vld [vmem:[%s3240_s24 + $0x70] sm:$0xff]  ;;  %v3360_v31 = vld [vmem:[%s3240_s24 + $0xa8] sm:$0xff]  ;;  %v3453_v15 = vpack.i.bf16 %v3342_v25, %v3246_v1 }
  0x1b   : > { %v2438_v22 = vpack.i.bf16 %v2157_v20, %v3243_v0  ;;  %v3363_v32 = vld [vmem:[%s3240_s24 + $0xb0] sm:$0xff]  ;;  %v3368_v34 = vld [vmem:[%s3240_s24 + $0xa0] sm:$0xff]  ;;  %v2170_v36 = vld [vmem:[%s3240_s24 + $0x68] sm:$0xff]  ;;  %s192_s13 = sadd.s32 %s2238_s20, %s2237_s21 }
  0x1c   : > { %v3371_v35 = vld [vmem:[%s3240_s24 + $0x60] sm:$0xff]  ;;  %v2519_v39 = vpack.i.bf16 %v3363_v32, %v3360_v31  ;;  %v2514_v40 = vpack.i.bf16 %v3368_v34, %v3357_v30  ;;  %v2166_v60 = vld [vmem:[%s3240_s24 + $0x38] sm:$0xff]  ;;  %s2142_s22 = sshll.u32 %s192_s13, 3 }
  0x1d   : > { %v3383_v41 = vpack.i.bf16 %v2170_v36, %v3371_v35  ;;  %v2172_v25 = vld [vmem:[%s3240_s24 + $0x78] sm:$0xff]  ;;  %s4399_s6 = scalar_lea.vmem %s5061_s3, %s2142_s22 }
  0x20   : > { %2314 = vrot.lane.b32.xlu2 %v2288_v8, %s3173_s26 }
  0x21   : > { %2304 = vrot.lane.b32.xlu1 %v2303_v13, %s3172_s25  ;;  %2294 = vrot.lane.b32.xlu0 %v2293_v14, %s3172_s25 }
  0x28   : > { %2329 = vrot.lane.b32.xlu2 %v2303_v13, %s3173_s26 }
  0x29   : > { %2324 = vrot.lane.b32.xlu1 %v2298_v7, %s3173_s26  ;;  %2319 = vrot.lane.b32.xlu0 %v2293_v14, %s3173_s26 }
  0x30   : > { %2344 = vrot.lane.b32.xlu2 %v2293_v14, %s3174_s27 }
  0x31   : > { %2339 = vrot.lane.b32.xlu1 %v2288_v8, %s3174_s27  ;;  %2334 = vrot.lane.b32.xlu0 %v2308_v3, %s3173_s26 }
  0x38   : > { %2359 = vrot.lane.b32.xlu2 %v2308_v3, %s3174_s27 }
  0x39   : > { %2354 = vrot.lane.b32.xlu1 %v2303_v13, %s3174_s27  ;;  %2349 = vrot.lane.b32.xlu0 %v2298_v7, %s3174_s27 }
  0x40   : > { %2374 = vrot.lane.b32.xlu2 %v2298_v7, %s3175_s28 }
  0x41   : > { %2369 = vrot.lane.b32.xlu1 %v2293_v14, %s3175_s28  ;;  %2364 = vrot.lane.b32.xlu0 %v2288_v8, %s3175_s28 }
  0x48   : > { %2389 = vrot.lane.b32.xlu2 %v2288_v8, %s3176_s29 }
  0x49   : > { %2384 = vrot.lane.b32.xlu1 %v2308_v3, %s3175_s28  ;;  %2379 = vrot.lane.b32.xlu0 %v2303_v13, %s3175_s28 }
  0x50   : > { %2404 = vrot.lane.b32.xlu2 %v2303_v13, %s3176_s29 }
  0x51   : > { %2399 = vrot.lane.b32.xlu1 %v2298_v7, %s3176_s29  ;;  %2394 = vrot.lane.b32.xlu0 %v2293_v14, %s3176_s29 }
  0x58   : > { %2419 = vrot.lane.b32.xlu2 %v2418_v16, %s3177_s30 }
  0x59   : > { %2414 = vrot.lane.b32.xlu1 %v2288_v8, %s3177_s30  ;;  %2409 = vrot.lane.b32.xlu0 %v2308_v3, %s3176_s29 }
  0x60   : > { %2434 = vrot.lane.b32.xlu2 %v2303_v13, %s3177_s30 }
  0x61   : > { %2429 = vrot.lane.b32.xlu1 %v2428_v18, %s3177_s30  ;;  %2424 = vrot.lane.b32.xlu0 %v3315_v19, %s3177_s30 }
  0x68   : > { %2449 = vrot.lane.b32.xlu2 %v2418_v16, %s3179_s4 }
  0x69   : > { %2444 = vrot.lane.b32.xlu1 %v2288_v8, %s3179_s4  ;;  %2439 = vrot.lane.b32.xlu0 %v2438_v22, %s3177_s30 }
  0x70   : > { %2464 = vrot.lane.b32.xlu2 %v2303_v13, %s3179_s4 }
  0x71   : > { %2459 = vrot.lane.b32.xlu1 %v2428_v18, %s3179_s4  ;;  %2454 = vrot.lane.b32.xlu0 %v3315_v19, %s3179_s4 }
  0x72   : > { %v3330_v23 = vpop.permute.xlu2 %2309 }
  0x78   : > { %2479 = vrot.lane.b32.xlu2 %v2418_v16, %s3180_s5 }
  0x79   : > { %2474 = vrot.lane.b32.xlu1 %v2288_v8, %s3180_s5  ;;  %2469 = vrot.lane.b32.xlu0 %v2438_v22, %s3179_s4  ;;  %v3447_v8 = vpack.i.bf16 %v2166_v60, %v3345_v26 }
  0x7a   : > { %v3335_v24 = vpop.permute.xlu2 %2314 }
  0x80   : > { %2494 = vrot.lane.b32.xlu2 %v2303_v13, %s3180_s5 }
  0x81   : > { %2489 = vrot.lane.b32.xlu1 %v2428_v18, %s3180_s5  ;;  %2484 = vrot.lane.b32.xlu0 %v3315_v19, %s3180_s5 }
  0x82   : > { %v3347_v27 = vpop.permute.xlu2 %2329 }
  0x88   : > { %2505 = vrot.lane.b32.xlu2 %v2504_v28, %s3172_s25 }
  0x89   : > { %536 = vperm.xlu1 %2503, %v198_v29   ;;  %2499 = vrot.lane.b32.xlu0 %v2438_v22, %s3180_s5 }
  0x8a   : > { %v3365_v33 = vpop.permute.xlu2 %2344 }
  0x8b   : > { %v3374_v37 = vpop.permute.xlu1 %2299  ;;  %v3376_v38 = vpop.permute.xlu0 %2289  ;;  %v2347_v26 = vunpack.i.h.bf16 %v3365_v33 }
  0x90   : > { %2520 = vrot.lane.b32.xlu2 %v2519_v39, %s3172_s25 }
  0x91   : > { %2515 = vrot.lane.b32.xlu1 %v2514_v40, %s3172_s25  ;;  %2510 = vrot.lane.b32.xlu0 %v3383_v41, %s3172_s25 }
  0x92   : > { %v3389_v42 = vpop.permute.xlu2 %2359 }
  0x93   : > { %v3391_v43 = vpop.permute.xlu1 %2304  ;;  %v3393_v44 = vpop.permute.xlu0 %2294 }
  0x98   : > { %2535 = vrot.lane.b32.xlu2 %v2514_v40, %s3173_s26 }
  0x99   : > { %2530 = vrot.lane.b32.xlu1 %v3383_v41, %s3173_s26  ;;  %2525 = vrot.lane.b32.xlu0 %v2504_v28, %s3173_s26 }
  0x9a   : > { %v3399_v45 = vpop.permute.xlu2 %2374 }
  0x9b   : > { %v3401_v46 = vpop.permute.xlu1 %2324  ;;  %v3403_v47 = vpop.permute.xlu0 %2319  ;;  %v2376_v13 = vunpack.i.l.bf16 %v3399_v45 }
  0xa0   : > { %2550 = vrot.lane.b32.xlu2 %v3383_v41, %s3174_s27 }
  0xa1   : > { %2545 = vrot.lane.b32.xlu1 %v2504_v28, %s3174_s27  ;;  %2540 = vrot.lane.b32.xlu0 %v2519_v39, %s3173_s26 }
  0xa2   : > { %v3409_v48 = vpop.permute.xlu2 %2389 }
  0xa3   : > { %v3411_v49 = vpop.permute.xlu1 %2339  ;;  %v2392_v50 = vunpack.i.h.bf16 %v3409_v48  ;;  %v2391_v51 = vunpack.i.l.bf16 %v3409_v48  ;;  %v3415_v52 = vpop.permute.xlu0 %2334 }
  0xa4   : > { %v2341_v60 = vunpack.i.l.bf16 %v3411_v49 }
  0xa5   : > { %v387_v53 = vsel %vm386_vm0, %v2391_v51, %v2392_v50 }
  0xa6   : > { %542 = vmatpush.msra.mxu0 %v387_v53 }
  0xa8   : > { %2565 = vrot.lane.b32.xlu2 %v2504_v28, %s3175_s28 }
  0xa9   : > { %2560 = vrot.lane.b32.xlu1 %v2519_v39, %s3174_s27  ;;  %2555 = vrot.lane.b32.xlu0 %v2514_v40, %s3174_s27 }
  0xaa   : > { %v3421_v54 = vpop.permute.xlu2 %2404 }
  0xab   : > { %v3423_v55 = vpop.permute.xlu1 %2354  ;;  %v3425_v56 = vpop.permute.xlu0 %2349 }
  0xac   : > { %v5067_v18 = vunpack.i.h.bf16 %v3423_v55  ;;  %v2356_v20 = vunpack.i.l.bf16 %v3423_v55  ;;  %v5066_v29 = vunpack.i.l.bf16 %v3425_v56 }
  0xb0   : > { %2580 = vrot.lane.b32.xlu2 %v2519_v39, %s3175_s28 }
  0xb1   : > { %2575 = vrot.lane.b32.xlu1 %v2514_v40, %s3175_s28  ;;  %2570 = vrot.lane.b32.xlu0 %v3383_v41, %s3175_s28 }
  0xb2   : > { %v3431_v57 = vpop.permute.xlu2 %2419 }
  0xb3   : > { %v3433_v58 = vpop.permute.xlu1 %2369  ;;  %v3435_v59 = vpop.permute.xlu0 %2364 }
  0xb4   : > { %v2372_v14 = vunpack.i.h.bf16 %v3433_v58  ;;  %v2366_v17 = vunpack.i.l.bf16 %v3435_v59  ;;  %v2367_v21 = vunpack.i.h.bf16 %v3435_v59  ;;  %v3482_v59 = vpack.i.bf16 %v3360_v31, %v3368_v34 }
  0xb5   : > { %v2332_v34 = vunpack.i.h.bf16 %v3347_v27 }
  0xb6   : > { %v355_v1 = vsel %vm352_vm1, %v2372_v14, %v2376_v13  ;;  %v353_v48 = vsel %vm352_vm1, %v2366_v17, %v2367_v21  ;;  %v3490_v14 = vpack.i.bf16 %v2172_v25, %v3357_v30  ;;  %v2331_v17 = vunpack.i.l.bf16 %v3347_v27 }
  0xb7   : > { %v321_v30 = vsel %vm318_vm2, %v2347_v26, %v5066_v29  ;;  %v5072_v25 = vunpack.i.l.bf16 %v3433_v58 }
  0xb8   : > { %2595 = vrot.lane.b32.xlu2 %v2514_v40, %s3176_s29 }
  0xb9   : > { %2590 = vrot.lane.b32.xlu1 %v3383_v41, %s3176_s29  ;;  %2585 = vrot.lane.b32.xlu0 %v2504_v28, %s3176_s29  ;;  %v5065_v28 = vunpack.i.h.bf16 %v3411_v49 }
  0xba   : > { %v3442_v61 = vpop.permute.xlu2 %2434 }
  0xbb   : > { %v3444_v62 = vpop.permute.xlu1 %2384  ;;  %v2380_v63 = vpop.permute.xlu0 %2379  ;;  %v319_v26 = vsel %vm318_vm2, %v2341_v60, %v5065_v28  ;;  %v289_v60 = vsel %vm284_vm3, %v2331_v17, %v2332_v34  ;;  %v354_v17 = vsel %vm352_vm1, %v2367_v21, %v5072_v25 }
  0xbc   : > { %v2382_v3 = vunpack.i.h.bf16 %v2380_v63  ;;  %v2381_v7 = vunpack.i.l.bf16 %v2380_v63  ;;  %v5064_v63 = vunpack.i.l.bf16 %v3444_v62 }
  0xbe   : > { %v357_v16 = vsel %vm352_vm1, %v2381_v7, %v2382_v3  ;;  %v323_v7 = vsel %vm318_vm2, %v2356_v20, %v5067_v18  ;;  %v5069_v20 = vunpack.i.l.bf16 %v3401_v46  ;;  %v5081_v18 = vunpack.i.h.bf16 %v3421_v54 }
  0xbf   : > { %543 = vmatpush.msra.mxu0 %v357_v16 }
  0xc0   : > { %2610 = vrot.lane.b32.xlu2 %v3447_v8, %s3177_s30 }
  0xc1   : > { %2605 = vrot.lane.b32.xlu1 %v3453_v15, %s3177_s30  ;;  %2600 = vrot.lane.b32.xlu0 %v2519_v39, %s3176_s29 }
  0xc2   : > { %544 = vmatpush.msra.mxu0 %v355_v1  ;;  %v3466_v22 = vpop.permute.xlu2 %2449  ;;  %v5068_v1 = vunpack.i.h.bf16 %v3399_v45 }
  0xc3   : > { %v3472_v36 = vpop.permute.xlu1 %2399  ;;  %v3474_v40 = vpop.permute.xlu0 %2394 }
  0xc4   : > { %v5062_v39 = vunpack.i.l.bf16 %v3472_v36  ;;  %v2397_v51 = vunpack.i.h.bf16 %v3474_v40  ;;  %v5063_v53 = vunpack.i.l.bf16 %v3474_v40  ;;  %545 = vmatpush.msra.mxu0 %v353_v48  ;;  %v358_v48 = vsel %vm352_vm1, %v2382_v3, %v5064_v63 }
  0xc5   : > { %v356_v3 = vsel %vm352_vm1, %v2376_v13, %v5068_v1  ;;  %v2306_v63 = vunpack.i.l.bf16 %v3391_v43  ;;  %v5080_v13 = vunpack.i.h.bf16 %v3425_v56 }
  0xc6   : > { %546 = vmatpush.msra.mxu0 %v323_v7  ;;  %v388_v16 = vsel %vm386_vm0, %v2392_v50, %v5063_v53  ;;  %v3498_v31 = vsel %vm386_vm0, %v2397_v51, %v5062_v39  ;;  %v2322_v50 = vunpack.i.h.bf16 %v3403_v47  ;;  %v2317_v51 = vunpack.i.h.bf16 %v3335_v24 }
  0xc7   : > { %582 = vmatpush.msra.mxu2 %v388_v16  ;;  %v2316_v16 = vunpack.i.l.bf16 %v3335_v24  ;;  %v5073_v24 = vunpack.i.l.bf16 %v3393_v44 }
  0xc8   : > { %547 = vmatpush.msra.mxu0 %v321_v30  ;;  %2625 = vrot.lane.b32.xlu2 %v3482_v59, %s3177_s30  ;;  %v5071_v30 = vunpack.i.l.bf16 %v3389_v42  ;;  %v287_v29 = vsel %vm284_vm3, %v2322_v50, %v5069_v20  ;;  %v5126_v50 = vunpack.i.h.bf16 %v3423_v55  ;;  %v2291_v55 = vunpack.i.l.bf16 %v3376_v38 }
  0xc9   : > { %2620 = vrot.lane.b32.xlu1 %v3490_v14, %s3177_s30  ;;  %2615 = vrot.lane.b32.xlu0 %v3383_v41, %s3177_s30 }
  0xca   : > { %548 = vmatpush.msra.mxu0 %v319_v26  ;;  %583 = vmatpush.msra.mxu2 %v358_v48  ;;  %v3522_v7 = vpop.permute.xlu2 %2464  ;;  %v2178_v26 = vld [vmem:[%s3240_s24 + $0xb8] sm:$0xff]  ;;  %v2307_v48 = vunpack.i.h.bf16 %v3391_v43  ;;  %v324_v20 = vsel %vm318_vm2, %v5126_v50, %v5071_v30  ;;  %v5077_v30 = vunpack.i.h.bf16 %v3401_v46 }
  0xcb   : > { %v3526_v39 = vpop.permute.xlu1 %2414  ;;  %v3528_v53 = vpop.permute.xlu0 %2409  ;;  %v3549_v1 = vpack.i.bf16 %v2178_v26, %v3363_v32  ;;  %v5079_v32 = vunpack.i.l.bf16 %v3365_v33 }
  0xcc   : > { %v5070_v28 = vunpack.i.l.bf16 %v3528_v53  ;;  %549 = vmatpush.msra.mxu0 %v289_v60  ;;  %584 = vmatpush.msra.mxu2 %v356_v3  ;;  %v2297_v60 = vunpack.i.h.bf16 %v3393_v44  ;;  %v285_v3 = vsel %vm284_vm3, %v2316_v16, %v2317_v51  ;;  %v2292_v16 = vunpack.i.h.bf16 %v3376_v38 }
  0xcd   : > { %v255_v26 = vsel %vm250_vm4, %v2306_v63, %v2307_v48  ;;  %v5127_v38 = vunpack.i.l.bf16 %v3425_v56 }
  0xce   : > { %550 = vmatpush.msra.mxu0 %v287_v29  ;;  %585 = vmatpush.msra.mxu2 %v354_v17  ;;  %v3565_v21 = vsel %vm386_vm0, %v5081_v18, %v5070_v28  ;;  %v2301_v29 = vunpack.i.l.bf16 %v3374_v37  ;;  %v5078_v17 = vunpack.i.l.bf16 %v3415_v52  ;;  %v252_v43 = vsel %vm250_vm4, %v2292_v16, %v5073_v24 }
  0xcf   : > { %v2467_v24 = vunpack.i.h.bf16 %v3522_v7 }
  0xd0   : > { %551 = vmatpush.msra.mxu0 %v285_v3  ;;  %586 = vmatpush.msra.mxu2 %v324_v20  ;;  %v322_v20 = vsel %vm318_vm2, %v5127_v38, %v5080_v13  ;;  %v253_v63 = vsel %vm250_vm4, %v2297_v60, %v2301_v29  ;;  %v251_v38 = vsel %vm250_vm4, %v2291_v55, %v2292_v16  ;;  %v5075_v55 = vunpack.i.l.bf16 %v3330_v23 }
  0xd1   : > { %2635 = vrot.lane.b32.xlu1 %v3453_v15, %s3179_s4  ;;  %2640 = vrot.lane.b32.xlu2 %v3447_v8, %s3179_s4  ;;  %v290_v60 = vsel %vm284_vm3, %v2332_v34, %v5078_v17 }
  0xd2   : > { %2630 = vrot.lane.b32.xlu0 %v3549_v1, %s3177_s30  ;;  %552 = vmatpush.msra.mxu0 %v255_v26  ;;  %v3586_v3 = vpop.permute.xlu2 %2479  ;;  %v5128_v26 = vunpack.i.h.bf16 %v3411_v49  ;;  %v5129_v49 = vunpack.i.l.bf16 %v3401_v46 }
  0xd3   : > { %587 = vmatpush.msra.mxu2 %v322_v20  ;;  %v3588_v50 = vpop.permute.xlu1 %2429  ;;  %v3590_v28 = vpop.permute.xlu0 %2424  ;;  %v5076_v20 = vunpack.i.l.bf16 %v3403_v47  ;;  %v2481_v13 = vunpack.i.l.bf16 %v3586_v3 }
  0xd4   : > { %553 = vmatpush.msra.mxu0 %v253_v63  ;;  %v320_v25 = vsel %vm318_vm2, %v5128_v26, %v5079_v32  ;;  %v5074_v63 = vunpack.i.h.bf16 %v3374_v37  ;;  %v2426_v17 = vunpack.i.l.bf16 %v3590_v28  ;;  %v2427_v18 = vunpack.i.h.bf16 %v3590_v28 }
  0xd5   : > { %588 = vmatpush.msra.mxu2 %v320_v25  ;;  %v288_v25 = vsel %vm284_vm3, %v5129_v49, %v5077_v30  ;;  %v286_v27 = vsel %vm284_vm3, %v2317_v51, %v5076_v20  ;;  %v3716_v30 = vpack.i.bf16 %v3243_v0, %v3273_v10 }
  0xd6   : > { %554 = vmatpush.msra.mxu0 %v251_v38  ;;  %v433_v28 = vsel %vm429_vm7, %v2426_v17, %v2427_v18 }
  0xd7   : > { %589 = vmatpush.msra.mxu2 %v290_v60 }
  0xd8   : > { %555 = vmatpush.msra.mxu0 %v3270_v9 }
  0xd9   : > { %590 = vmatpush.msra.mxu2 %v288_v25  ;;  %2650 = vrot.lane.b32.xlu1 %v3490_v14, %s3179_s4  ;;  %v3637_v25 = vld [vmem:[%s5059_s1] sm:$0xff] }
  0xda   : > { %2655 = vrot.lane.b32.xlu2 %v3482_v59, %s3179_s4  ;;  %2645 = vrot.lane.b32.xlu0 %v3383_v41, %s3179_s4  ;;  %v3625_v34 = vpop.permute.xlu2 %2494 }
  0xdb   : > { %556 = vmatpush.msra.mxu0 %v3279_v12  ;;  %591 = vmatpush.msra.mxu2 %v286_v27  ;;  %v3628_v26 = vpop.permute.xlu1 %2444  ;;  %v2497_v38 = vunpack.i.h.bf16 %v3625_v34  ;;  %v2496_v60 = vunpack.i.l.bf16 %v3625_v34  ;;  %v3632_v49 = vpop.permute.xlu0 %2439  ;;  %v256_v12 = vsel %vm250_vm4, %v2307_v48, %v5075_v55  ;;  %v254_v27 = vsel %vm250_vm4, %v2301_v29, %v5074_v63 }
  0xdc   : > { %v2406_v34 = vunpack.i.l.bf16 %v3421_v54 }
  0xdd   : > { %557 = vmatpush.msra.mxu0 %v3257_v5  ;;  %592 = vmatpush.msra.mxu2 %v256_v12  ;;  %v522_v51 = vsel %vm515_vm5, %v2496_v60, %v2497_v38  ;;  %v3701_v12 = vld [vmem:[%s3240_s24 + $0xd0] sm:$0xff] }
  0xde   : > { %558 = vmatmul.f32.vlgmr.msra.gmra.mxu0 %v3637_v25  ;;  %567 = vmatpush.msra.mxu1 %v522_v51  ;;  %v3712_v20 = vpack.i.bf16 %v3371_v35, %v3701_v12 }
  0xdf   : > { %593 = vmatpush.msra.mxu2 %v254_v27 }
  0xe1   : > { %594 = vmatpush.msra.mxu2 %v252_v43  ;;  %2665 = vrot.lane.b32.xlu1 %v3453_v15, %s3180_s5 }
  0xe2   : > { %2670 = vrot.lane.b32.xlu2 %v3447_v8, %s3180_s5  ;;  %2660 = vrot.lane.b32.xlu0 %v3549_v1, %s3179_s4  ;;  %v3662_v5 = vpop.permute.xlu2 %2505 }
  0xe3   : > { %595 = vmatpush.msra.mxu2 %v3273_v10  ;;  %v3665_v48 = vpop.permute.xlu1 %2459  ;;  %v3667_v29 = vpop.permute.xlu0 %2454 }
  0xe4   : > { %v2457_v35 = vunpack.i.h.bf16 %v3667_v29 }
  0xe5   : > { %596 = vmatpush.msra.mxu2 %v3249_v2  ;;  %v3686_v2 = vpack.i.bf16 %v3270_v9, %v3254_v4 }
  0xe7   : > { %597 = vmatpush.msra.mxu2 %v3260_v6 }
  0xe8   : > { %598 = vmatmul.f32.vlgmr.msra.gmra.mxu2 %v3637_v25 }
  0xe9   : > { %2680 = vrot.lane.b32.xlu1 %v3490_v14, %s3180_s5 }
  0xea   : > { %2685 = vrot.lane.b32.xlu2 %v3482_v59, %s3180_s5  ;;  %2675 = vrot.lane.b32.xlu0 %v3383_v41, %s3180_s5  ;;  %v3678_v8 = vpop.permute.xlu2 %2520  ;;  %v2195_v41 = vld [vmem:[%s3240_s24 + $0xc0] sm:$0xff]  ;;  %v2196_v59 = vld [vmem:[%s3240_s24 + $0xc8] sm:$0xff] }
  0xeb   : > { %v3680_v15 = vpop.permute.xlu1 %2474  ;;  %v3682_v16 = vpop.permute.xlu0 %2469  ;;  %v3706_v63 = vpack.i.bf16 %v2196_v59, %v2195_v41  ;;  %v2446_v41 = vunpack.i.l.bf16 %v3628_v26  ;;  %v2437_v59 = vunpack.i.h.bf16 %v3442_v61 }
  0xec   : > { %v2477_v9 = vunpack.i.h.bf16 %v3680_v15  ;;  %v2476_v51 = vunpack.i.l.bf16 %v3680_v15  ;;  %v2456_v15 = vunpack.i.l.bf16 %v3667_v29 }
  0xee   : > { %v476_v29 = vsel %vm472_vm6, %v2456_v15, %v2457_v35  ;;  %v2417_v15 = vunpack.i.h.bf16 %v3526_v39 }
  0xf1   : > { %2695 = vrot.lane.b32.xlu1 %v3315_v19, %s3172_s25 }
  0xf2   : > { %2700 = vrot.lane.b32.xlu2 %v3686_v2, %s3172_s25  ;;  %2690 = vrot.lane.b32.xlu0 %v3549_v1, %s3180_s5  ;;  %v3694_v6 = vpop.permute.xlu2 %2535  ;;  %v2466_v1 = vunpack.i.l.bf16 %v3522_v7  ;;  %v2447_v7 = vunpack.i.h.bf16 %v3628_v26 }
  0xf3   : > { %v3698_v14 = vpop.permute.xlu1 %2489  ;;  %v2485_v60 = vpop.permute.xlu0 %2484 }
  0xf4   : > { %v2487_v27 = vunpack.i.h.bf16 %v2485_v60  ;;  %v2486_v43 = vunpack.i.l.bf16 %v2485_v60  ;;  %v516_v60 = vsel %vm515_vm5, %v2476_v51, %v2477_v9  ;;  %v2436_v51 = vunpack.i.l.bf16 %v3442_v61 }
  0xf5   : > { %v5083_v32 = vunpack.i.l.bf16 %v3698_v14 }
  0xf6   : > { %v519_v55 = vsel %vm515_vm5, %v2486_v43, %v2487_v27 }
  0xf7   : > { %568 = vmatpush.msra.mxu1 %v519_v55  ;;  %v479_v55 = vsel %vm472_vm6, %v2466_v1, %v2467_v24  ;;  %v473_v1 = vsel %vm472_vm6, %v2446_v41, %v2447_v7 }
  0xf9   : > { %2710 = vrot.lane.b32.xlu1 %v3706_v63, %s3172_s25  ;;  %569 = vmatpush.msra.mxu1 %v516_v60 }
  0xfa   : > { %2715 = vrot.lane.b32.xlu2 %v3712_v20, %s3172_s25  ;;  %2705 = vrot.lane.b32.xlu0 %v3716_v30, %s3172_s25  ;;  %v3729_v10 = vpop.permute.xlu2 %2550 }
  0xfb   : > { %v3734_v43 = vpop.permute.xlu1 %536  ;;  %v3736_v60 = vpop.permute.xlu0 %2499  ;;  %570 = vmatpush.msra.mxu1 %v479_v55  ;;  %v436_v55 = vsel %vm429_vm7, %v2436_v51, %v2437_v59 }
  0xfc   : > { %v5082_v26 = vunpack.i.l.bf16 %v3736_v60 }
  0xfd   : > { %571 = vmatpush.msra.mxu1 %v476_v29  ;;  %v2416_v29 = vunpack.i.l.bf16 %v3526_v39  ;;  %v520_v39 = vsel %vm515_vm5, %v2487_v27, %v5083_v32  ;;  %v2451_v27 = vunpack.i.l.bf16 %v3466_v22  ;;  %v2441_v32 = vunpack.i.l.bf16 %v3632_v49 }
  0xfe   : > { %v523_v61 = vsel %vm515_vm5, %v2497_v38, %v5082_v26  ;;  %v2471_v38 = vunpack.i.l.bf16 %v3682_v16 }
  0xff   : > { %572 = vmatpush.msra.mxu1 %v473_v1  ;;  %607 = vmatpush.msra.mxu3 %v523_v61  ;;  %v2461_v61 = vunpack.i.l.bf16 %v3665_v48  ;;  %v430_v26 = vsel %vm429_vm7, %v2416_v29, %v2417_v15 }
 0x100   : > { %v480_v17 = vsel %vm472_vm6, %v2467_v24, %v2471_v38  ;;  %v3792_v24 = vld [vmem:[%s5059_s1 + $0x8] sm:$0xff] }
 0x101   : > { %2725 = vrot.lane.b32.xlu1 %v3686_v2, %s3173_s26  ;;  %573 = vmatpush.msra.mxu1 %v436_v55  ;;  %v517_v55 = vsel %vm515_vm5, %v2477_v9, %v2481_v13  ;;  %v477_v9 = vsel %vm472_vm6, %v2457_v35, %v2461_v61  ;;  %v474_v35 = vsel %vm472_vm6, %v2447_v7, %v2451_v27  ;;  %v5131_v7 = vunpack.i.l.bf16 %v3474_v40 }
 0x102   : > { %2730 = vrot.lane.b32.xlu2 %v3716_v30, %s3173_s26  ;;  %2720 = vrot.lane.b32.xlu0 %v3315_v19, %s3173_s26  ;;  %v3764_v41 = vpop.permute.xlu2 %2565  ;;  %v2502_v40 = vunpack.i.h.bf16 %v3736_v60 }
 0x103   : > { %608 = vmatpush.msra.mxu3 %v520_v39  ;;  %v3767_v51 = vpop.permute.xlu1 %2515  ;;  %v3769_v1 = vpop.permute.xlu0 %2510  ;;  %574 = vmatpush.msra.mxu1 %v433_v28  ;;  %v5130_v39 = vunpack.i.h.bf16 %v3421_v54  ;;  %v2431_v54 = vunpack.i.l.bf16 %v3588_v50 }
 0x105   : > { %609 = vmatpush.msra.mxu3 %v517_v55  ;;  %575 = vmatpush.msra.mxu1 %v430_v26  ;;  %v391_v28 = vsel %vm386_vm0, %v2406_v34, %v5130_v39  ;;  %v5085_v55 = vunpack.i.l.bf16 %v3431_v57  ;;  %v5132_v39 = vunpack.i.l.bf16 %v3444_v62 }
 0x107   : > { %610 = vmatpush.msra.mxu3 %v480_v17  ;;  %576 = vmatpush.msra.mxu1 %v391_v28  ;;  %v437_v17 = vsel %vm429_vm7, %v2437_v59, %v2441_v32  ;;  %v431_v28 = vsel %vm429_vm7, %v2417_v15, %v5085_v55  ;;  %v5133_v59 = vunpack.i.h.bf16 %v3399_v45 }
 0x109   : > { %611 = vmatpush.msra.mxu3 %v477_v9  ;;  %2740 = vrot.lane.b32.xlu1 %v3712_v20, %s3173_s26  ;;  %v5084_v9 = vunpack.i.h.bf16 %v3472_v36 }
 0x10a   : > { %2745 = vrot.lane.b32.xlu2 %v3315_v19, %s3174_s27  ;;  %2735 = vrot.lane.b32.xlu0 %v3706_v63, %s3173_s26  ;;  %v3802_v26 = vpop.permute.xlu2 %2580 }
 0x10b   : > { %577 = vmatpush.msra.mxu1 %v3498_v31  ;;  %612 = vmatpush.msra.mxu3 %v474_v35  ;;  %v3805_v29 = vpop.permute.xlu1 %2530  ;;  %v3807_v34 = vpop.permute.xlu0 %2525  ;;  %v434_v31 = vsel %vm429_vm7, %v2427_v18, %v2431_v54  ;;  %v5134_v35 = vunpack.i.l.bf16 %v3433_v58 }
 0x10c   : > { %2158 = vmatmul.msk.f32.vlgmr.msra.gmra.mxu1 %vm318_vm2, %v3792_v24 }
 0x10d   : > { %622 = vmatpush.msrb.mxu1 %v5131_v7  ;;  %613 = vmatpush.msra.mxu3 %v437_v17  ;;  %v2492_v17 = vunpack.i.h.bf16 %v3698_v14  ;;  %v5135_v7 = vunpack.i.l.bf16 %v3389_v42 }
 0x10f   : > { %623 = vmatpush.msrb.mxu1 %v5132_v39  ;;  %614 = vmatpush.msra.mxu3 %v434_v31  ;;  %v5136_v31 = vunpack.i.l.bf16 %v3472_v36  ;;  %v3853_v39 = vld [vmem:[%s3240_s24 + $0xe0] sm:$0xff] }
 0x111   : > { %624 = vmatpush.msrb.mxu1 %v5133_v59  ;;  %615 = vmatpush.msra.mxu3 %v431_v28  ;;  %v390_v58 = vsel %vm386_vm0, %v5136_v31, %v5084_v9  ;;  %v2482_v28 = vunpack.i.h.bf16 %v3586_v3  ;;  %v5138_v59 = vunpack.i.l.bf16 %v3736_v60  ;;  %v2472_v31 = vunpack.i.h.bf16 %v3682_v16 }
 0x112   : > { %2755 = vrot.lane.b32.xlu1 %v3716_v30, %s3174_s27  ;;  %2760 = vrot.lane.b32.xlu2 %v3706_v63, %s3174_s27  ;;  %v3832_v18 = vpop.permute.xlu2 %2595  ;;  %v5140_v9 = vunpack.i.l.bf16 %v3698_v14  ;;  %v2462_v60 = vunpack.i.h.bf16 %v3665_v48  ;;  %v2422_v48 = vunpack.i.h.bf16 %v3431_v57 }
 0x113   : > { %625 = vmatpush.msrb.mxu1 %v5134_v35  ;;  %2750 = vrot.lane.b32.xlu0 %v3686_v2, %s3174_s27  ;;  %v3839_v15 = vpop.permute.xlu1 %2545  ;;  %v3841_v45 = vpop.permute.xlu0 %2540  ;;  %v524_v35 = vsel %vm515_vm5, %v5138_v59, %v2502_v40  ;;  %v5141_v40 = vunpack.i.l.bf16 %v3415_v52  ;;  %v481_v3 = vsel %vm472_vm6, %v2471_v38, %v2472_v31  ;;  %v2432_v59 = vunpack.i.h.bf16 %v3588_v50 }
 0x114   : > { %616 = vmatpush.msra.mxu3 %v3565_v21  ;;  %v5137_v21 = vunpack.i.h.bf16 %v3425_v56  ;;  %v521_v55 = vsel %vm515_vm5, %v5140_v9, %v2492_v17  ;;  %v2452_v9 = vunpack.i.h.bf16 %v3466_v22  ;;  %v5142_v17 = vunpack.i.h.bf16 %v3401_v46 }
 0x115   : > { %626 = vmatpush.msrb.mxu1 %v5135_v7  ;;  %v2764_v7 = vpack.i.bf16 %v3853_v39, %v3701_v12  ;;  %v5144_v46 = vunpack.i.l.bf16 %v3330_v23  ;;  %v5145_v38 = vunpack.i.h.bf16 %v3374_v37  ;;  %v435_v37 = vsel %vm429_vm7, %v2431_v54, %v2432_v59 }
 0x116   : > { %617 = vmatpush.msra.mxu3 %v390_v58  ;;  %v5139_v58 = vunpack.i.l.bf16 %v3365_v33  ;;  %v518_v33 = vsel %vm515_vm5, %v2481_v13, %v2482_v28  ;;  %v2442_v13 = vunpack.i.h.bf16 %v3632_v49  ;;  %v5143_v28 = vunpack.i.l.bf16 %v3403_v47 }
 0x117   : > { %2159 = vmatmul.msk.f32.vlgmr.msra.gmra.mxu3 %vm318_vm2, %v3792_v24  ;;  %627 = vmatpush.msrb.mxu1 %v5137_v21  ;;  %v478_v21 = vsel %vm472_vm6, %v2461_v61, %v2462_v60  ;;  %v475_v16 = vsel %vm472_vm6, %v2451_v27, %v2452_v9  ;;  %v5148_v31 = vunpack.i.l.bf16 %v3528_v53  ;;  %v5098_v54 = vunpack.i.h.bf16 %v3802_v26 }
 0x118   : > { %647 = vmatpush.msrb.mxu3 %v524_v35  ;;  %v438_v61 = vsel %vm429_vm7, %v2441_v32, %v2442_v13  ;;  %v5146_v35 = vunpack.i.l.bf16 %v3393_v44  ;;  %v5147_v32 = vunpack.i.l.bf16 %v3431_v57  ;;  %v2412_v57 = vunpack.i.h.bf16 %v3528_v53 }
 0x119   : > { %628 = vmatpush.msrb.mxu1 %v5139_v58  ;;  %v2387_v59 = vunpack.i.h.bf16 %v3444_v62 }
 0x11a   : > { %648 = vmatpush.msrb.mxu3 %v521_v55  ;;  %2770 = vrot.lane.b32.xlu1 %v3315_v19, %s3175_s28  ;;  %v3873_v56 = vpop.permute.xlu2 %2610  ;;  %v432_v49 = vsel %vm429_vm7, %v5147_v32, %v2422_v48  ;;  %v2552_v32 = vunpack.i.l.bf16 %v3729_v10 }
 0x11b   : > { %629 = vmatpush.msrb.mxu1 %v5141_v40  ;;  %2775 = vrot.lane.b32.xlu2 %v3686_v2, %s3175_s28  ;;  %v3883_v14 = vpop.permute.xlu1 %2560  ;;  %v3885_v55 = vpop.permute.xlu0 %2555 }
 0x11c   : > { %649 = vmatpush.msrb.mxu3 %v518_v33  ;;  %2765 = vrot.lane.b32.xlu0 %v2764_v7, %s3174_s27 }
 0x11d   : > { %630 = vmatpush.msrb.mxu1 %v5142_v17 }
 0x11e   : > { %650 = vmatpush.msrb.mxu3 %v481_v3  ;;  %v2567_v3 = vunpack.i.l.bf16 %v3764_v41 }
 0x11f   : > { %631 = vmatpush.msrb.mxu1 %v5143_v28  ;;  %v5096_v28 = vunpack.i.h.bf16 %v3764_v41 }
 0x120   : > { %651 = vmatpush.msrb.mxu3 %v478_v21 }
 0x121   : > { %632 = vmatpush.msrb.mxu1 %v5144_v46  ;;  %v2562_v46 = vunpack.i.l.bf16 %v3883_v14 }
 0x122   : > { %652 = vmatpush.msrb.mxu3 %v475_v16  ;;  %2785 = vrot.lane.b32.xlu1 %v3706_v63, %s3175_s28  ;;  %v3908_v47 = vpop.permute.xlu2 %2625  ;;  %v2558_v16 = vunpack.i.h.bf16 %v3885_v55 }
 0x123   : > { %633 = vmatpush.msrb.mxu1 %v5145_v38  ;;  %2790 = vrot.lane.b32.xlu2 %v2764_v7, %s3175_s28  ;;  %v3917_v22 = vpop.permute.xlu1 %2575  ;;  %v2571_v27 = vpop.permute.xlu0 %2570  ;;  %v5094_v7 = vunpack.i.l.bf16 %v3832_v18  ;;  %v5095_v38 = vunpack.i.h.bf16 %v3883_v14 }
 0x124   : > { %653 = vmatpush.msrb.mxu3 %v438_v61  ;;  %2780 = vrot.lane.b32.xlu0 %v3716_v30, %s3175_s28  ;;  %v2572_v60 = vunpack.i.l.bf16 %v2571_v27  ;;  %v5097_v9 = vunpack.i.l.bf16 %v3917_v22  ;;  %v2573_v17 = vunpack.i.h.bf16 %v2571_v27 }
 0x125   : > { %634 = vmatpush.msrb.mxu1 %v5146_v35  ;;  %v2192_v35 = vld [vmem:[%s3240_s24 + $0x98] sm:$0xff] }
 0x126   : > { %654 = vmatpush.msrb.mxu3 %v435_v37  ;;  %v822_v27 = vsel %vm352_vm1, %v2573_v17, %v5097_v9  ;;  %v2553_v37 = vunpack.i.h.bf16 %v3729_v10  ;;  %v2547_v10 = vunpack.i.l.bf16 %v3839_v15  ;;  %v2210_v9 = vld [vmem:[%s3240_s24 + $0xa8] sm:$0xff] }
 0x127   : > { %635 = vmatpush.msrb.mxu1 %v3243_v0 }
 0x128   : > { %655 = vmatpush.msrb.mxu3 %v432_v49  ;;  %v819_v49 = vsel %vm352_vm1, %v2387_v59, %v2567_v3  ;;  %v2362_v59 = vunpack.i.h.bf16 %v3389_v42  ;;  %v2532_v42 = vunpack.i.l.bf16 %v3805_v29 }
 0x129   : > { %636 = vmatpush.msrb.mxu1 %v3254_v4  ;;  %v5149_v4 = vunpack.i.h.bf16 %v3472_v36 }
 0x12a   : > { %656 = vmatpush.msrb.mxu3 %v5148_v31  ;;  %2800 = vrot.lane.b32.xlu1 %v3686_v2, %s3176_s29  ;;  %v2188_v31 = vld [vmem:[%s3240_s24 + $0x58] sm:$0xff] }
 0x12b   : > { %637 = vmatpush.msrb.mxu1 %v3276_v11  ;;  %2805 = vrot.lane.b32.xlu2 %v3716_v30, %s3176_s29  ;;  %v3939_v0 = vpop.permute.xlu1 %2590  ;;  %v3941_v44 = vpop.permute.xlu2 %2640  ;;  %v2582_v11 = vunpack.i.l.bf16 %v3802_v26  ;;  %v2578_v30 = vunpack.i.h.bf16 %v3917_v22 }
 0x12c   : > { %657 = vmatpush.msrb.mxu3 %v5149_v4  ;;  %2795 = vrot.lane.b32.xlu0 %v3315_v19, %s3176_s29  ;;  %v5100_v50 = vunpack.i.h.bf16 %v3939_v0  ;;  %v3949_v2 = vpop.permute.xlu0 %2585  ;;  %v820_v4 = vsel %vm352_vm1, %v2567_v3, %v5096_v28  ;;  %v791_v3 = vsel %vm318_vm2, %v2562_v46, %v5095_v38  ;;  %v4189_v28 = vld [vmem:[%s3240_s24 + $0xb0] sm:$0xff] }
 0x12d   : > { %638 = vmatmul.f32.vlgmr.msrb.gmra.mxu1 %v3637_v25  ;;  %2160 = vmatmul.msk.f32.vlgmr.msrb.gmra.mxu3 %vm318_vm2, %v3792_v24  ;;  %v5099_v53 = vunpack.i.h.bf16 %v3949_v2  ;;  %v2587_v36 = vunpack.i.l.bf16 %v3949_v2  ;;  %v823_v13 = vsel %vm352_vm1, %v2578_v30, %v2582_v11  ;;  %v824_v21 = vsel %vm352_vm1, %v2582_v11, %v5098_v54  ;;  %v4007_v11 = vld [vmem:[%s3240_s24 + $0x80] sm:$0xff]  ;;  %v4010_v30 = vld [vmem:[%s3240_s24 + $0x88] sm:$0xff] }
 0x12e   : > { %v3964_v58 = vsel %vm386_vm0, %v5100_v50, %v5094_v7  ;;  %5150 = vst [vmem:[#allocation2_spill] sm:$0xff] %v4007_v11  ;;  %v4197_v54 = vld [vmem:[%s3240_s24 + $0xe8] sm:$0xff]  ;;  %v2627_v50 = vunpack.i.l.bf16 %v3908_v47 }
 0x12f   : > { %v852_v40 = vsel %vm386_vm0, %v2412_v57, %v2587_v36  ;;  %v853_v33 = vsel %vm386_vm0, %v2587_v36, %v5099_v53  ;;  %v5086_v57 = vunpack.i.l.bf16 %v3885_v55  ;;  %5151 = vst [vmem:[#allocation3_spill] sm:$0xff] %v4010_v30  ;;  %v4014_v36 = vpack.i.bf16 %v4010_v30, %v4007_v11  ;;  %v4200_v53 = vld [vmem:[%s3240_s24 + $0xf0] sm:$0xff] }
 0x130   : > { %996 = vmatpush.msrb.mxu0 %v852_v40  ;;  %1036 = vmatpush.msra.mxu3 %v853_v33  ;;  %v3102_v40 = vld [vmem:[%s3240_s24 + $0x90] sm:$0xff]  ;;  %v2919_v30 = vpack.i.bf16 %v3853_v39, %v4189_v28 }
 0x131   : > { %v4019_v33 = vpack.i.bf16 %v2192_v35, %v3102_v40  ;;  %v2538_v35 = vunpack.i.h.bf16 %v3694_v6 }
 0x132   : > { %2815 = vrot.lane.b32.xlu1 %v3712_v20, %s3176_s29  ;;  %997 = vmatpush.msrb.mxu0 %v823_v13  ;;  %v821_v20 = vsel %vm352_vm1, %v2572_v60, %v2573_v17  ;;  %v790_v60 = vsel %vm318_vm2, %v2558_v16, %v2562_v46  ;;  %v5093_v17 = vunpack.i.h.bf16 %v3839_v15  ;;  %v3103_v13 = vld [vmem:[%s3240_s24 + $0x50] sm:$0xff]  ;;  %v788_v16 = vsel %vm318_vm2, %v2552_v32, %v2553_v37 }
 0x133   : > { %2820 = vrot.lane.b32.xlu2 %v3315_v19, %s3177_s30  ;;  %1037 = vmatpush.msra.mxu3 %v824_v21  ;;  %v3984_v48 = vpop.permute.xlu1 %2605  ;;  %v4026_v21 = vpack.i.bf16 %v2188_v31, %v3103_v13  ;;  %v789_v46 = vsel %vm318_vm2, %v2553_v37, %v5086_v57  ;;  %v786_v31 = vsel %vm318_vm2, %v2362_v59, %v2547_v10  ;;  %v5087_v59 = vunpack.i.h.bf16 %v3807_v34 }
 0x134   : > { %2810 = vrot.lane.b32.xlu0 %v3706_v63, %s3176_s29  ;;  %v3990_v62 = vpop.permute.xlu2 %2655  ;;  %v3992_v61 = vpop.permute.xlu0 %2600  ;;  %998 = vmatpush.msrb.mxu0 %v821_v20  ;;  %v2542_v20 = vunpack.i.l.bf16 %v3841_v45  ;;  %v2522_v57 = vunpack.i.l.bf16 %v3678_v8 }
 0x135   : > { %1038 = vmatpush.msra.mxu3 %v822_v27  ;;  %v5092_v27 = vunpack.i.h.bf16 %v3841_v45 }
 0x136   : > { %999 = vmatpush.msrb.mxu0 %v819_v49  ;;  %v2533_v49 = vunpack.i.h.bf16 %v3805_v29  ;;  %v787_v29 = vsel %vm318_vm2, %v2547_v10, %v5093_v17  ;;  %v757_v13 = vsel %vm284_vm3, %v2538_v35, %v2542_v20  ;;  %v2518_v10 = vunpack.i.h.bf16 %v3767_v51 }
 0x137   : > { %1039 = vmatpush.msra.mxu3 %v820_v4  ;;  %v2198_v4 = vld [vmem:[%s3240_s24 + $0xd8] sm:$0xff]  ;;  %v5091_v35 = vunpack.i.h.bf16 %v3678_v8 }
 0x138   : > { %1000 = vmatpush.msrb.mxu0 %v790_v60  ;;  %v5088_v60 = vunpack.i.l.bf16 %v3694_v6 }
 0x139   : > { %1040 = vmatpush.msra.mxu3 %v791_v3  ;;  %v2527_v3 = vunpack.i.l.bf16 %v3807_v34 }
 0x13a   : > { %2830 = vrot.lane.b32.xlu1 %v4014_v36, %s3177_s30  ;;  %1001 = vmatpush.msrb.mxu0 %v788_v16  ;;  %v758_v16 = vsel %vm284_vm3, %v2542_v20, %v5092_v27  ;;  %v2512_v20 = vunpack.i.l.bf16 %v3769_v1 }
 0x13b   : > { %2835 = vrot.lane.b32.xlu2 %v4019_v33, %s3177_s30  ;;  %1041 = vmatpush.msra.mxu3 %v789_v46  ;;  %v4042_v32 = vpop.permute.xlu1 %2620  ;;  %v4063_v46 = vpack.i.bf16 %v2198_v4, %v3701_v12  ;;  %v2513_v4 = vunpack.i.h.bf16 %v3769_v1  ;;  %v5089_v1 = vunpack.i.h.bf16 %v3662_v5 }
 0x13c   : > { %2825 = vrot.lane.b32.xlu0 %v4026_v21, %s3177_s30  ;;  %v4049_v37 = vpop.permute.xlu2 %2670  ;;  %v4051_v40 = vpop.permute.xlu0 %2615  ;;  %1002 = vmatpush.msrb.mxu0 %v786_v31  ;;  %v2337_v31 = vunpack.i.h.bf16 %v3415_v52  ;;  %v5090_v52 = vunpack.i.l.bf16 %v3767_v51 }
 0x13d   : > { %1042 = vmatpush.msra.mxu3 %v787_v29  ;;  %v755_v29 = vsel %vm284_vm3, %v2532_v42, %v2533_v49  ;;  %v754_v42 = vsel %vm284_vm3, %v2527_v3, %v5087_v59  ;;  %v722_v59 = vsel %vm250_vm4, %v2512_v20, %v2513_v4  ;;  %v3105_v20 = vld [vmem:[%s3240_s24 + $0xa8] sm:$0xff] }
 0x13e   : > { %1003 = vmatpush.msrb.mxu0 %v757_v13  ;;  %v756_v13 = vsel %vm284_vm3, %v2533_v49, %v5088_v60  ;;  %v753_v12 = vsel %vm284_vm3, %v2337_v31, %v2527_v3  ;;  %v724_v31 = vsel %vm250_vm4, %v2518_v10, %v2522_v57  ;;  %v725_v3 = vsel %vm250_vm4, %v2522_v57, %v5091_v35 }
 0x13f   : > { %1043 = vmatpush.msra.mxu3 %v758_v16  ;;  %v2507_v16 = vunpack.i.l.bf16 %v3662_v5  ;;  %v2657_v35 = vunpack.i.l.bf16 %v3990_v62 }
 0x140   : > { %1004 = vmatpush.msrb.mxu0 %v755_v29 }
 0x141   : > { %1044 = vmatpush.msra.mxu3 %v756_v13  ;;  %v721_v57 = vsel %vm250_vm4, %v2507_v16, %v5089_v1 }
 0x142   : > { %2845 = vrot.lane.b32.xlu1 %v4063_v46, %s3177_s30  ;;  %1005 = vmatpush.msrb.mxu0 %v753_v12  ;;  %v2312_v12 = vunpack.i.h.bf16 %v3330_v23 }
 0x143   : > { %2850 = vrot.lane.b32.xlu2 %v3315_v19, %s3179_s4  ;;  %1045 = vmatpush.msra.mxu3 %v754_v42  ;;  %v4085_v49 = vpop.permute.xlu1 %2635 }
 0x144   : > { %2840 = vrot.lane.b32.xlu0 %v3706_v63, %s3177_s30  ;;  %v4091_v29 = vpop.permute.xlu2 %2685  ;;  %v4093_v13 = vpop.permute.xlu0 %2630  ;;  %1006 = vmatpush.msrb.mxu0 %v724_v31  ;;  %v723_v31 = vsel %vm250_vm4, %v2513_v4, %v5090_v52  ;;  %v720_v60 = vsel %vm250_vm4, %v2312_v12, %v2507_v16  ;;  %v3107_v12 = vld [vmem:[%s3240_s24 + $0x68] sm:$0xff]  ;;  %v2637_v38 = vunpack.i.l.bf16 %v4085_v49 }
 0x145   : > { %v5102_v42 = vunpack.i.h.bf16 %v4091_v29  ;;  %v2687_v10 = vunpack.i.l.bf16 %v4091_v29  ;;  %1046 = vmatpush.msra.mxu3 %v725_v3  ;;  %v4127_v3 = vld [vmem:[%s3240_s24 + $0x60] sm:$0xff] }
 0x146   : > { %1007 = vmatpush.msrb.mxu0 %v722_v59  ;;  %v3104_v59 = vld [vmem:[%s3240_s24 + $0xa0] sm:$0xff] }
 0x147   : > { %1047 = vmatpush.msra.mxu3 %v723_v31  ;;  %v984_v23 = vsel %vm515_vm5, %v2687_v10, %v5102_v42  ;;  %v3108_v10 = vld [vmem:[%s3240_s24 + $0x20] sm:$0xff]  ;;  %v3109_v31 = vld [vmem:[%s3240_s24 + $0x28] sm:$0xff] }
 0x148   : > { %1008 = vmatpush.msrb.mxu0 %v720_v60  ;;  %1021 = vmatpush.msrb.mxu2 %v984_v23 }
 0x149   : > { %1048 = vmatpush.msra.mxu3 %v721_v57 }
 0x14a   : > { %2860 = vrot.lane.b32.xlu1 %v4014_v36, %s3179_s4  ;;  %1009 = vmatpush.msrb.mxu0 %v3104_v59 }
 0x14b   : > { %2865 = vrot.lane.b32.xlu2 %v4019_v33, %s3179_s4  ;;  %1049 = vmatpush.msra.mxu3 %v3105_v20  ;;  %v4118_v60 = vpop.permute.xlu1 %2650 }
 0x14c   : > { %2855 = vrot.lane.b32.xlu0 %v4026_v21, %s3179_s4  ;;  %v4122_v4 = vpop.permute.xlu2 %2700  ;;  %v4124_v16 = vpop.permute.xlu0 %2645  ;;  %1010 = vmatpush.msrb.mxu0 %v4127_v3 }
 0x14d   : > { %1050 = vmatpush.msra.mxu3 %v3107_v12  ;;  %v4158_v12 = vld [vmem:[%s3240_s24 + $0x68] sm:$0xff]  ;;  %v2647_v17 = vunpack.i.l.bf16 %v4124_v16 }
 0x14e   : > { %1011 = vmatpush.msrb.mxu0 %v3108_v10  ;;  %v4161_v10 = vld [vmem:[%s3240_s24 + $0x70] sm:$0xff] }
 0x14f   : > { %1051 = vmatpush.msra.mxu3 %v3109_v31  ;;  %1012 = vmatmul.f32.vlgmr.msrb.gmra.mxu0 %v3637_v25  ;;  %v4170_v27 = vpack.i.bf16 %v4161_v10, %v4158_v12 }
 0x150   : > { %1052 = vmatmul.f32.vlgmr.msra.gmra.mxu3 %v3637_v25 }
 0x152   : > { %2875 = vrot.lane.b32.xlu1 %v4063_v46, %s3179_s4 }
 0x153   : > { %2880 = vrot.lane.b32.xlu2 %v3315_v19, %s3180_s5  ;;  %v4139_v23 = vpop.permute.xlu1 %2665 }
 0x154   : > { %2870 = vrot.lane.b32.xlu0 %v3706_v63, %s3179_s4  ;;  %v4143_v57 = vpop.permute.xlu2 %2715  ;;  %v4145_v59 = vpop.permute.xlu0 %2660  ;;  %v5101_v31 = vunpack.i.h.bf16 %v4139_v23  ;;  %v2667_v1 = vunpack.i.l.bf16 %v4139_v23 }
 0x155   : > { %5152 = vst [vmem:[#allocation4_spill] sm:$0xff] %v4143_v57  ;;  %v2617_v57 = vunpack.i.l.bf16 %v4051_v40 }
 0x156   : > { %v978_v7 = vsel %vm515_vm5, %v2667_v1, %v5101_v31 }
 0x15a   : > { %2890 = vrot.lane.b32.xlu1 %v4014_v36, %s3180_s5 }
 0x15b   : > { %2895 = vrot.lane.b32.xlu2 %v4019_v33, %s3180_s5  ;;  %v4151_v25 = vpop.permute.xlu1 %2680  ;;  %v5103_v33 = vunpack.i.h.bf16 %v3990_v62 }
 0x15c   : > { %2885 = vrot.lane.b32.xlu0 %v4026_v21, %s3180_s5  ;;  %v4155_v19 = vpop.permute.xlu2 %2730  ;;  %v2676_v20 = vpop.permute.xlu0 %2675  ;;  %v2683_v11 = vunpack.i.h.bf16 %v4151_v25 }
 0x15d   : > { %5153 = vst [vmem:[#allocation5_spill] sm:$0xff] %v4155_v19  ;;  %v2678_v36 = vunpack.i.h.bf16 %v2676_v20  ;;  %v2677_v52 = vunpack.i.l.bf16 %v2676_v20  ;;  %v5109_v20 = vunpack.i.h.bf16 %v4085_v49  ;;  %v942_v1 = vsel %vm472_vm6, %v2657_v35, %v5103_v33  ;;  %v2209_v33 = vld [vmem:[%s3240_s24 + $0xa0] sm:$0xff] }
 0x15e   : > { %v2662_v19 = vunpack.i.l.bf16 %v4145_v59 }
 0x15f   : > { %v981_v21 = vsel %vm515_vm5, %v2677_v52, %v2678_v36  ;;  %v5107_v52 = vunpack.i.h.bf16 %v4124_v16 }
 0x160   : > { %1022 = vmatpush.msrb.mxu2 %v981_v21 }
 0x161   : > { %v939_v35 = vsel %vm472_vm6, %v2647_v17, %v5107_v52  ;;  %v2924_v52 = vpack.i.bf16 %v4200_v53, %v4197_v54 }
 0x162   : > { %2905 = vrot.lane.b32.xlu1 %v4063_v46, %s3180_s5  ;;  %1023 = vmatpush.msrb.mxu2 %v978_v7 }
 0x163   : > { %2910 = vrot.lane.b32.xlu2 %v4170_v27, %s3172_s25  ;;  %v4183_v21 = vpop.permute.xlu1 %2695 }
 0x164   : > { %5154 = vst [vmem:[#allocation6_spill] sm:$0xff] %v4183_v21  ;;  %2900 = vrot.lane.b32.xlu0 %v3706_v63, %s3180_s5  ;;  %v4194_v7 = vpop.permute.xlu2 %2745  ;;  %v2691_v46 = vpop.permute.xlu0 %2690  ;;  %1024 = vmatpush.msrb.mxu2 %v942_v1  ;;  %v2682_v63 = vunpack.i.l.bf16 %v4151_v25  ;;  %v936_v1 = vsel %vm472_vm6, %v2637_v38, %v5109_v20  ;;  %v4223_v38 = vpack.i.bf16 %v2210_v9, %v2209_v33  ;;  %v2673_v25 = vunpack.i.h.bf16 %v4049_v37 }
 0x165   : > { %v2693_v31 = vunpack.i.h.bf16 %v2691_v46  ;;  %v2692_v42 = vunpack.i.l.bf16 %v2691_v46  ;;  %v5155_v46 = vunpack.i.h.bf16 %v4091_v29  ;;  %v5156_v29 = vunpack.i.h.bf16 %v3908_v47 }
 0x166   : > { %1025 = vmatpush.msrb.mxu2 %v939_v35  ;;  %v2672_v35 = vunpack.i.l.bf16 %v4049_v37  ;;  %v2663_v37 = vunpack.i.h.bf16 %v4145_v59  ;;  %v2652_v20 = vunpack.i.l.bf16 %v4118_v60 }
 0x167   : > { %v985_v21 = vsel %vm515_vm5, %v5155_v46, %v2692_v42  ;;  %v986_v17 = vsel %vm515_vm5, %v2692_v42, %v2693_v31  ;;  %v900_v42 = vsel %vm429_vm7, %v2627_v50, %v5156_v29  ;;  %v2607_v31 = vunpack.i.l.bf16 %v3984_v48 }
 0x168   : > { %1026 = vmatpush.msrb.mxu2 %v936_v1  ;;  %1061 = vmatpush.msra.mxu1 %v985_v21  ;;  %v5112_v46 = vunpack.i.h.bf16 %v4051_v40  ;;  %v982_v21 = vsel %vm515_vm5, %v2678_v36, %v2682_v63  ;;  %v2598_v1 = vunpack.i.h.bf16 %v3832_v18  ;;  %v983_v50 = vsel %vm515_vm5, %v2682_v63, %v2683_v11 }
 0x169   : > { %1101 = vmatpush.msra.mxu0 %v986_v17  ;;  %v5158_v11 = vunpack.i.h.bf16 %v4139_v23  ;;  %v2653_v63 = vunpack.i.h.bf16 %v4118_v60  ;;  %v2592_v29 = vunpack.i.l.bf16 %v3939_v0  ;;  %v5160_v23 = vunpack.i.h.bf16 %v3990_v62 }
 0x16a   : > { %2920 = vrot.lane.b32.xlu1 %v2919_v30, %s3172_s25  ;;  %1027 = vmatpush.msrb.mxu2 %v900_v42  ;;  %v897_v59 = vsel %vm429_vm7, %v2617_v57, %v5112_v46  ;;  %v2703_v42 = vunpack.i.h.bf16 %v4122_v4  ;;  %v2934_v60 = vpack.i.bf16 %v2209_v33, %v4197_v54  ;;  %v2642_v46 = vunpack.i.l.bf16 %v3941_v44 }
 0x16b   : > { %2925 = vrot.lane.b32.xlu2 %v2924_v52, %s3172_s25  ;;  %1062 = vmatpush.msra.mxu1 %v982_v21  ;;  %v4239_v17 = vpop.permute.xlu1 %2710  ;;  %v979_v52 = vsel %vm515_vm5, %v5158_v11, %v2672_v35  ;;  %v943_v11 = vsel %vm472_vm6, %v5160_v23, %v2662_v19  ;;  %v5161_v62 = vunpack.i.l.bf16 %v3992_v61  ;;  %v2613_v23 = vunpack.i.h.bf16 %v3873_v56 }
 0x16c   : > { %5157 = vst [vmem:[#allocation7_spill] sm:$0xff] %v4239_v17  ;;  %2915 = vrot.lane.b32.xlu0 %v4223_v38, %s3172_s25  ;;  %1102 = vmatpush.msra.mxu0 %v983_v50  ;;  %v4245_v30 = vpop.permute.xlu2 %2760  ;;  %v4247_v36 = vpop.permute.xlu0 %2705  ;;  %v980_v50 = vsel %vm515_vm5, %v2672_v35, %v2673_v25  ;;  %v5159_v17 = vunpack.i.h.bf16 %v3984_v48  ;;  %v2939_v35 = vpack.i.bf16 %v4127_v3, %v2210_v9 }
 0x16d   : > { %v2707_v21 = vunpack.i.l.bf16 %v4247_v36  ;;  %1028 = vmatpush.msrb.mxu2 %v897_v59  ;;  %1063 = vmatpush.msra.mxu1 %v979_v52  ;;  %v944_v59 = vsel %vm472_vm6, %v2662_v19, %v2663_v37  ;;  %v856_v33 = vsel %vm386_vm0, %v2598_v1, %v5161_v62  ;;  %v2632_v19 = vunpack.i.l.bf16 %v4093_v13 }
 0x16e   : > { %1103 = vmatpush.msra.mxu0 %v980_v50  ;;  %v894_v57 = vsel %vm429_vm7, %v2607_v31, %v5159_v17  ;;  %v2643_v31 = vunpack.i.h.bf16 %v3941_v44  ;;  %v5162_v17 = vunpack.i.h.bf16 %v4124_v16  ;;  %v941_v9 = vsel %vm472_vm6, %v2652_v20, %v2653_v63 }
 0x16f   : > { %1029 = vmatpush.msrb.mxu2 %v894_v57  ;;  %1064 = vmatpush.msra.mxu1 %v943_v11  ;;  %v4273_v25 = vsel %vm250_vm4, %v2703_v42, %v2707_v21  ;;  %v2633_v37 = vunpack.i.h.bf16 %v4093_v13  ;;  %v5163_v44 = vunpack.i.h.bf16 %v3939_v0  ;;  %v2622_v1 = vunpack.i.l.bf16 %v4042_v32 }
 0x170   : > { %1104 = vmatpush.msra.mxu0 %v944_v59  ;;  %v940_v52 = vsel %vm472_vm6, %v5162_v17, %v2652_v20  ;;  %v5164_v16 = vunpack.i.h.bf16 %v4085_v49  ;;  %v2623_v13 = vunpack.i.h.bf16 %v4042_v32  ;;  %v938_v0 = vsel %vm472_vm6, %v2642_v46, %v2643_v31 }
 0x171   : > { %1030 = vmatpush.msrb.mxu2 %v856_v33  ;;  %1065 = vmatpush.msra.mxu1 %v940_v52  ;;  %v854_v42 = vsel %vm386_vm0, %v2592_v29, %v5163_v44  ;;  %v2612_v63 = vunpack.i.l.bf16 %v3873_v56  ;;  %v5165_v57 = vunpack.i.h.bf16 %v3908_v47  ;;  %v5167_v11 = vunpack.i.h.bf16 %v4051_v40 }
 0x172   : > { %1105 = vmatpush.msra.mxu0 %v941_v9  ;;  %2935 = vrot.lane.b32.xlu1 %v2934_v60, %s3175_s28  ;;  %v937_v50 = vsel %vm472_vm6, %v5164_v16, %v2642_v46  ;;  %v902_v46 = vsel %vm429_vm7, %v2632_v19, %v2633_v37  ;;  %v2603_v31 = vunpack.i.h.bf16 %v3992_v61  ;;  %v5168_v47 = vunpack.i.h.bf16 %v3802_v26 }
 0x173   : > { %2940 = vrot.lane.b32.xlu2 %v2939_v35, %s3175_s28  ;;  %1031 = vmatpush.msrb.mxu2 %v854_v42  ;;  %v4294_v20 = vpop.permute.xlu1 %2725  ;;  %v901_v32 = vsel %vm429_vm7, %v5165_v57, %v2632_v19  ;;  %v898_v59 = vsel %vm429_vm7, %v5167_v11, %v2622_v1  ;;  %v899_v56 = vsel %vm429_vm7, %v2622_v1, %v2623_v13  ;;  %v5171_v40 = vunpack.i.l.bf16 %v3917_v22  ;;  %v2218_v13 = vld [vmem:[%s3240_s24 + $0xf8] sm:$0xff]  ;;  %v4441_v11 = vld [vmem:[%s5059_s1] sm:$0xff] }
 0x174   : > { %2930 = vrot.lane.b32.xlu0 %v4170_v27, %s3176_s29  ;;  %1066 = vmatpush.msra.mxu1 %v937_v50  ;;  %v4300_v29 = vpop.permute.xlu0 %2720  ;;  %v5166_v27 = vunpack.i.h.bf16 %v3949_v2  ;;  %v5169_v2 = vunpack.i.h.bf16 %v3984_v48  ;;  %v4327_v33 = vpack.i.bf16 %v4200_v53, %v4158_v12  ;;  %v896_v26 = vsel %vm429_vm7, %v2612_v63, %v2613_v23  ;;  %v3111_v23 = vld [vmem:[%s3240_s24 + $0x70] sm:$0xff] }
 0x175   : > { %1106 = vmatpush.msra.mxu0 %v938_v0  ;;  %2179 = vmatmul.msk.f32.vlgmr.msrb.gmra.mxu2 %vm318_vm2, %v3792_v24  ;;  %v4305_v49 = vpop.permute.xlu2 %2775  ;;  %v5172_v17 = vunpack.i.h.bf16 %v3764_v41  ;;  %v5173_v52 = vunpack.i.l.bf16 %v3992_v61  ;;  %v5174_v41 = vunpack.i.h.bf16 %v3883_v14  ;;  %v4358_v61 = vpack.i.bf16 %v4197_v54, %v3853_v39  ;;  %v559_v39 = vpop.f32.mrf.mxu0 }
 0x176   : > { %1076 = vmatpush.msra.mxu2 %v5166_v27  ;;  %1067 = vmatpush.msra.mxu1 %v901_v32  ;;  %v895_v62 = vsel %vm429_vm7, %v5169_v2, %v2612_v63  ;;  %v5177_v14 = vunpack.i.h.bf16 %v3839_v15  ;;  %v5179_v15 = vunpack.i.l.bf16 %v3694_v6  ;;  %v4389_v37 = vpack.i.bf16 %v4161_v10, %v4189_v28  ;;  %v3110_v32 = vld [vmem:[%s3240_s24 + $0xb0] sm:$0xff] }
 0x177   : > { %1107 = vmatpush.msra.mxu0 %v902_v46  ;;  %v857_v22 = vsel %vm386_vm0, %v5173_v52, %v2603_v31  ;;  %v560_v44 = vadd.f32 %v559_v39, %v3734_v43  ;;  %v5181_v16 = vunpack.i.h.bf16 %v3678_v8  ;;  %v5182_v8 = vunpack.i.l.bf16 %v3767_v51  ;;  %v3112_v46 = vld [vmem:[%s3240_s24 + $0x30] sm:$0xff] }
 0x178   : > { %1077 = vmatpush.msra.mxu2 %v5168_v47  ;;  %1068 = vmatpush.msra.mxu1 %v898_v59  ;;  %v5183_v63 = vunpack.i.h.bf16 %v3662_v5  ;;  %v4421_v57 = vpack.i.bf16 %v4158_v12, %v4127_v3  ;;  %v4424_v51 = vpack.i.bf16 %v2218_v13, %v4200_v53  ;;  %v2212_v5 = vld [vmem:[%s3240_s24 + $0xb8] sm:$0xff]  ;;  %v599_v12 = vpop.f32.mrf.mxu2 }
 0x179   : > { %1108 = vmatpush.msra.mxu0 %v899_v56  ;;  %v600_v47 = vadd.f32 %v599_v12, %v3734_v43 }
 0x17a   : > { %1078 = vmatpush.msra.mxu2 %v5171_v40  ;;  %1069 = vmatpush.msra.mxu1 %v895_v62 }
 0x17b   : > { %1109 = vmatpush.msra.mxu0 %v896_v26  ;;  %2950 = vrot.lane.b32.xlu1 %v2934_v60, %s3174_s27  ;;  %v4337_v48 = vpop.permute.xlu1 %2740  ;;  %v5175_v60 = vunpack.i.l.bf16 %v3832_v18 }
 0x17c   : > { %1079 = vmatpush.msra.mxu2 %v5172_v17  ;;  %2955 = vrot.lane.b32.xlu2 %v2939_v35, %s3174_s27  ;;  %v4345_v19 = vpop.permute.xlu0 %2735  ;;  %v5176_v35 = vunpack.i.l.bf16 %v3885_v55 }
 0x17d   : > { %2945 = vrot.lane.b32.xlu0 %v4327_v33, %s3175_s28  ;;  %1070 = vmatpush.msra.mxu1 %v857_v22  ;;  %v4349_v9 = vpop.permute.xlu2 %2790 }
 0x17e   : > { %1110 = vmatpush.msra.mxu0 %v2603_v31  ;;  %1080 = vmatpush.msra.mxu2 %v5174_v41  ;;  %v4447_v31 = vpack.i.bf16 %v2212_v5, %v4189_v28  ;;  %v5125_v41 = vunpack.i.l.bf16 %v4349_v9 }
 0x17f   : > { %1071 = vmatpush.msra.mxu1 %v3964_v58  ;;  %v5178_v58 = vunpack.i.h.bf16 %v3841_v45  ;;  %v5180_v45 = vunpack.i.h.bf16 %v3807_v34 }
 0x180   : > { %1111 = vmatpush.msra.mxu0 %v5175_v60  ;;  %2180 = vmatmul.msk.f32.vlgmr.msra.gmra.mxu1 %vm318_vm2, %v3792_v24 }
 0x181   : > { %1081 = vmatpush.msra.mxu2 %v5176_v35  ;;  %2181 = vmatmul.msk.f32.vlgmr.msra.gmra.mxu0 %vm318_vm2, %v3792_v24 }
 0x183   : > { %1082 = vmatpush.msra.mxu2 %v5177_v14  ;;  %2965 = vrot.lane.b32.xlu1 %v4358_v61, %s3173_s26 }
 0x184   : > { %2970 = vrot.lane.b32.xlu2 %v4358_v61, %s3180_s5  ;;  %v4375_v18 = vpop.permute.xlu1 %2755 }
 0x185   : > { %1083 = vmatpush.msra.mxu2 %v5178_v58  ;;  %2960 = vrot.lane.b32.xlu0 %v4327_v33, %s3174_s27  ;;  %v4381_v55 = vpop.permute.xlu2 %2805  ;;  %v4383_v24 = vpop.permute.xlu0 %2750 }
 0x186   : > { %v2807_v2 = vunpack.i.l.bf16 %v4381_v55 }
 0x187   : > { %1084 = vmatpush.msra.mxu2 %v5179_v15 }
 0x189   : > { %1085 = vmatpush.msra.mxu2 %v5180_v45  ;;  %v579_v42 = vpop.f32.mrf.mxu1 }
 0x18a   : > { %v580_v1 = vadd.f32 %v579_v42, %v560_v44 }
 0x18b   : > { %1086 = vmatpush.msra.mxu2 %v5181_v16  ;;  %2980 = vrot.lane.b32.xlu1 %v4389_v37, %s3175_s28  ;;  %v2778_v16 = vunpack.i.h.bf16 %v4305_v49 }
 0x18c   : > { %v662_v6 = vmax.f32 %v580_v1, 0.0  ;;  %2985 = vrot.lane.b32.xlu2 %v4223_v38, %s3180_s5  ;;  %v4405_v34 = vpop.permute.xlu1 %2770 }
 0x18d   : > { %1087 = vmatpush.msra.mxu2 %v5182_v8  ;;  %2975 = vrot.lane.b32.xlu0 %v4223_v38, %s3173_s26  ;;  %v4411_v50 = vpop.permute.xlu2 %2820  ;;  %v2773_v8 = vunpack.i.h.bf16 %v4405_v34  ;;  %v2772_v13 = vunpack.i.l.bf16 %v4405_v34 }
 0x18e   : > { %665 = vst [vmem:[%s4399_s6] sm:$0xff] %v662_v6  ;;  %v4415_v0 = vpop.permute.xlu0 %2765  ;;  %v5116_v6 = vunpack.i.l.bf16 %v4305_v49 }
 0x18f   : > { %1088 = vmatpush.msra.mxu2 %v5183_v63 }
 0x191   : > { %1089 = vmatpush.msra.mxu2 %v3110_v32 }
 0x193   : > { %1090 = vmatpush.msra.mxu2 %v3111_v23  ;;  %2995 = vrot.lane.b32.xlu1 %v4421_v57, %s3180_s5  ;;  %v2763_v23 = vunpack.i.h.bf16 %v4245_v30 }
 0x194   : > { %3000 = vrot.lane.b32.xlu2 %v4424_v51, %s3180_s5  ;;  %v2786_v27 = vpop.permute.xlu1 %2785 }
 0x195   : > { %1091 = vmatpush.msra.mxu2 %v3112_v46  ;;  %2990 = vrot.lane.b32.xlu0 %v4327_v33, %s3173_s26  ;;  %v4436_v3 = vpop.permute.xlu2 %2835  ;;  %v2208_v33 = vld [vmem:[%s3240_s24 + $0x78] sm:$0xff]  ;;  %v2788_v60 = vunpack.i.h.bf16 %v2786_v27  ;;  %v2787_v39 = vunpack.i.l.bf16 %v2786_v27  ;;  %v2762_v27 = vunpack.i.l.bf16 %v4245_v30  ;;  %v5115_v46 = vunpack.i.l.bf16 %v4415_v0 }
 0x196   : > { %1092 = vmatmul.f32.vlgmr.msra.gmra.mxu2 %v4441_v11  ;;  %v4444_v59 = vpop.permute.xlu0 %2780  ;;  %v4466_v14 = vpack.i.bf16 %v2208_v33, %v4161_v10  ;;  %v5114_v30 = vunpack.i.h.bf16 %v4375_v18  ;;  %v2753_v33 = vunpack.i.h.bf16 %v4383_v24 }
 0x197   : > { %v5117_v45 = vunpack.i.h.bf16 %v4444_v59  ;;  %v2782_v42 = vunpack.i.l.bf16 %v4444_v59  ;;  %v1269_v63 = vsel %vm352_vm1, %v2787_v39, %v2788_v60  ;;  %v1270_v32 = vsel %vm352_vm1, %v2788_v60, %v5125_v41 }
 0x198   : > { %v1265_v60 = vsel %vm352_vm1, %v2772_v13, %v2773_v8  ;;  %v2748_v39 = vunpack.i.h.bf16 %v4194_v7 }
 0x19a   : > { %v619_v56 = vpop.f32.mrf.mxu3 }
 0x19b   : > { %v620_v62 = vadd.f32 %v619_v56, %v600_v47  ;;  %3010 = vrot.lane.b32.xlu1 %v4447_v31, %s3180_s5  ;;  %v1267_v47 = vsel %vm352_vm1, %v2778_v16, %v2782_v42  ;;  %v1268_v56 = vsel %vm352_vm1, %v2782_v42, %v5117_v45  ;;  %v1236_v42 = vsel %vm318_vm2, %v2762_v27, %v2763_v23 }
 0x19c   : > { %3015 = vrot.lane.b32.xlu2 %v4389_v37, %s3174_s27  ;;  %v4456_v40 = vpop.permute.xlu1 %2800  ;;  %v5124_v16 = vunpack.i.l.bf16 %v4337_v48 }
 0x19d   : > { %v663_v26 = vmax.f32 %v620_v62, 0.0  ;;  %3005 = vrot.lane.b32.xlu0 %v4358_v61, %s3179_s4  ;;  %v2803_v17 = vunpack.i.h.bf16 %v4456_v40  ;;  %v2802_v52 = vunpack.i.l.bf16 %v4456_v40  ;;  %v4462_v22 = vpop.permute.xlu2 %2850  ;;  %v2757_v62 = vunpack.i.l.bf16 %v4375_v18 }
 0x19e   : > { %v2796_v35 = vpop.permute.xlu0 %2795 }
 0x19f   : > { %666 = vst [vmem:[%s4399_s6 + $0x8] sm:$0xff] %v663_v26  ;;  %v2798_v58 = vunpack.i.h.bf16 %v2796_v35  ;;  %v2797_v15 = vunpack.i.l.bf16 %v2796_v35  ;;  %v4472_v44 = vsel %vm386_vm0, %v2803_v17, %v2807_v2  ;;  %v1266_v35 = vsel %vm352_vm1, %v2773_v8, %v5116_v6 }
 0x1a0   : > { %v2737_v8 = vunpack.i.l.bf16 %v4345_v19  ;;  %v1234_v13 = vsel %vm318_vm2, %v2753_v33, %v2757_v62 }
 0x1a1   : > { %v1298_v1 = vsel %vm386_vm0, %v2797_v15, %v2798_v58  ;;  %v1299_v10 = vsel %vm386_vm0, %v2798_v58, %v2802_v52  ;;  %v2747_v58 = vunpack.i.l.bf16 %v4194_v7  ;;  %v5113_v15 = vunpack.i.l.bf16 %v4383_v24 }
 0x1a2   : > { %1442 = vmatpush.msrb.mxu1 %v1298_v1  ;;  %1482 = vmatpush.msrb.mxu0 %v1299_v10  ;;  %v1237_v1 = vsel %vm318_vm2, %v2763_v23, %v5115_v46  ;;  %v2738_v7 = vunpack.i.h.bf16 %v4345_v19  ;;  %v2728_v19 = vunpack.i.h.bf16 %v4294_v20 }
 0x1a3   : > { %3025 = vrot.lane.b32.xlu1 %v4466_v14, %s3180_s5  ;;  %v1232_v33 = vsel %vm318_vm2, %v2747_v58, %v2748_v39 }
 0x1a4   : > { %1443 = vmatpush.msrb.mxu1 %v1269_v63  ;;  %1483 = vmatpush.msrb.mxu0 %v1270_v32  ;;  %v4492_v5 = vpop.permute.xlu1 %2815  ;;  %v1235_v63 = vsel %vm318_vm2, %v2757_v62, %v5114_v30  ;;  %v5184_v32 = vld [vmem:[#allocation5_spill] sm:$0xff]  ;;  %v1233_v62 = vsel %vm318_vm2, %v2748_v39, %v5113_v15  ;;  %v1203_v58 = vsel %vm284_vm3, %v2737_v8, %v2738_v7  ;;  %v5186_v30 = vld [vmem:[#allocation7_spill] sm:$0xff] }
 0x1a5   : > { %3020 = vrot.lane.b32.xlu0 %v4223_v38, %s3179_s4  ;;  %v2817_v34 = vunpack.i.l.bf16 %v4492_v5  ;;  %v4498_v12 = vpop.permute.xlu2 %2865  ;;  %3030 = vrot.lane.b32.xlu2 %v4421_v57, %s3179_s4  ;;  %v5123_v23 = vunpack.i.h.bf16 %v5184_v32  ;;  %v1204_v39 = vsel %vm284_vm3, %v2738_v7, %v5124_v16  ;;  %v2713_v46 = vunpack.i.h.bf16 %v5186_v30 }
 0x1a6   : > { %v4509_v26 = vpop.permute.xlu0 %2810  ;;  %1444 = vmatpush.msrb.mxu1 %v1267_v47  ;;  %1484 = vmatpush.msrb.mxu0 %v1268_v56  ;;  %v2732_v56 = vunpack.i.l.bf16 %v5184_v32  ;;  %v2712_v6 = vunpack.i.l.bf16 %v5186_v30  ;;  %v5120_v7 = vunpack.i.h.bf16 %v4247_v36 }
 0x1a7   : > { %v2813_v17 = vunpack.i.h.bf16 %v4509_v26 }
 0x1a8   : > { %1445 = vmatpush.msrb.mxu1 %v1265_v60  ;;  %1485 = vmatpush.msrb.mxu0 %v1266_v35  ;;  %v5122_v60 = vunpack.i.l.bf16 %v4294_v20  ;;  %v2723_v35 = vunpack.i.h.bf16 %v4300_v29  ;;  %v1201_v8 = vsel %vm284_vm3, %v2728_v19, %v2732_v56  ;;  %v5187_v19 = vld [vmem:[#allocation6_spill] sm:$0xff] }
 0x1a9   : > { %v4528_v10 = vsel %vm386_vm0, %v2813_v17, %v2817_v34 }
 0x1aa   : > { %1446 = vmatpush.msrb.mxu1 %v1236_v42  ;;  %1486 = vmatpush.msrb.mxu0 %v1237_v1  ;;  %v639_v27 = vpop.f32.mrf.mxu1  ;;  %v2722_v42 = vunpack.i.l.bf16 %v4300_v29  ;;  %v1202_v29 = vsel %vm284_vm3, %v2732_v56, %v5123_v23 }
 0x1ab   : > { %3040 = vrot.lane.b32.xlu1 %v4358_v61, %s3177_s30 }
 0x1ac   : > { %1447 = vmatpush.msrb.mxu1 %v1234_v13  ;;  %1487 = vmatpush.msrb.mxu0 %v1235_v63  ;;  %v4540_v47 = vpop.permute.xlu1 %2830  ;;  %v640_v13 = vadd.f32 %v639_v27, %v3734_v43  ;;  %v5185_v63 = vld [vmem:[#allocation4_spill] sm:$0xff]  ;;  %v1199_v30 = vsel %vm284_vm3, %v2722_v42, %v2723_v35 }
 0x1ad   : > { %3035 = vrot.lane.b32.xlu0 %v4424_v51, %s3179_s4  ;;  %v4546_v61 = vpop.permute.xlu2 %2880  ;;  %3045 = vrot.lane.b32.xlu2 %v4447_v31, %s3179_s4  ;;  %v5121_v15 = vunpack.i.l.bf16 %v5185_v63 }
 0x1ae   : > { %v4557_v1 = vpop.permute.xlu0 %2825  ;;  %1448 = vmatpush.msrb.mxu1 %v1232_v33  ;;  %1488 = vmatpush.msrb.mxu0 %v1233_v62  ;;  %v1200_v62 = vsel %vm284_vm3, %v2723_v35, %v5122_v60  ;;  %v1170_v35 = vsel %vm250_vm4, %v2712_v6, %v2713_v46 }
 0x1b0   : > { %v659_v45 = vpop.f32.mrf.mxu3  ;;  %1449 = vmatpush.msrb.mxu1 %v1203_v58  ;;  %1489 = vmatpush.msrb.mxu0 %v1204_v39  ;;  %v2697_v58 = vunpack.i.l.bf16 %v5187_v19  ;;  %v1171_v39 = vsel %vm250_vm4, %v2713_v46, %v5121_v15  ;;  %v2882_v15 = vunpack.i.l.bf16 %v4546_v61 }
 0x1b1   : > { %v660_v27 = vadd.f32 %v659_v45, %v640_v13  ;;  %v5119_v45 = vunpack.i.l.bf16 %v4122_v4  ;;  %v2698_v13 = vunpack.i.h.bf16 %v5187_v19 }
 0x1b2   : > { %1450 = vmatpush.msrb.mxu1 %v1201_v8  ;;  %1490 = vmatpush.msrb.mxu0 %v1202_v29 }
 0x1b3   : > { %v664_v33 = vmax.f32 %v660_v27, 0.0  ;;  %3055 = vrot.lane.b32.xlu1 %v4223_v38, %s3177_s30  ;;  %v1166_v6 = vsel %vm250_vm4, %v2697_v58, %v2698_v13  ;;  %v1167_v46 = vsel %vm250_vm4, %v2698_v13, %v5119_v45  ;;  %v4608_v27 = vld [vmem:[%s3240_s24 + $0xe0] sm:$0xff]  ;;  %v5189_v13 = vld [vmem:[#allocation3_spill] sm:$0xff] }
 0x1b4   : > { %1451 = vmatpush.msrb.mxu1 %v1199_v30  ;;  %1491 = vmatpush.msrb.mxu0 %v1200_v62  ;;  %v4579_v56 = vpop.permute.xlu1 %2845  ;;  %v3074_v8 = vpack.i.bf16 %v4197_v54, %v4608_v27  ;;  %v2718_v54 = vunpack.i.h.bf16 %v5185_v63  ;;  %v3117_v58 = vld [vmem:[%s3240_s24 + $0x40] sm:$0xff] }
 0x1b5   : > { %668 = vst.msk [vmem:[%s4399_s6 + $0x10] sm:$0xff] %vm667_vm8, %v664_v33  ;;  %3050 = vrot.lane.b32.xlu0 %v4389_v37, %s3173_s26  ;;  %v4587_v42 = vpop.permute.xlu2 %2895  ;;  %3060 = vrot.lane.b32.xlu2 %v4466_v14, %s3179_s4  ;;  %v1169_v37 = vsel %vm250_vm4, %v2707_v21, %v5120_v7  ;;  %v3115_v21 = vld [vmem:[%s3240_s24 + $0xc0] sm:$0xff] }
 0x1b6   : > { %v4595_v29 = vpop.permute.xlu0 %2840  ;;  %1452 = vmatpush.msrb.mxu1 %v1170_v35  ;;  %1492 = vmatpush.msrb.mxu0 %v1171_v39  ;;  %v3118_v35 = vld [vmem:[%s3240_s24 + $0x48] sm:$0xff] }
 0x1b8   : > { %1453 = vmatpush.msrb.mxu1 %v4273_v25  ;;  %1493 = vmatpush.msrb.mxu0 %v1169_v37  ;;  %v3116_v25 = vld [vmem:[%s3240_s24 + $0xc8] sm:$0xff] }
 0x1ba   : > { %1454 = vmatpush.msrb.mxu1 %v1166_v6  ;;  %1494 = vmatpush.msrb.mxu0 %v1167_v46  ;;  %v3094_v46 = vpack.i.bf16 %v4189_v28, %v4200_v53  ;;  %v2883_v28 = vunpack.i.h.bf16 %v4546_v61 }
 0x1bb   : > { %3070 = vrot.lane.b32.xlu1 %v4424_v51, %s3177_s30  ;;  %v5188_v51 = vld [vmem:[#allocation2_spill] sm:$0xff] }
 0x1bc   : > { %1455 = vmatpush.msrb.mxu1 %v3115_v21  ;;  %1495 = vmatpush.msrb.mxu0 %v3116_v25  ;;  %v4616_v33 = vpop.permute.xlu1 %2860 }
 0x1bd   : > { %3065 = vrot.lane.b32.xlu0 %v4421_v57, %s3177_s30  ;;  %v4620_v30 = vpop.permute.xlu2 %2910  ;;  %3075 = vrot.lane.b32.xlu2 %v3074_v8, %s3176_s29 }
 0x1be   : > { %v5118_v62 = vunpack.i.l.bf16 %v4620_v30  ;;  %v4625_v19 = vpop.permute.xlu0 %2855  ;;  %1456 = vmatpush.msrb.mxu1 %v5188_v51  ;;  %1496 = vmatpush.msrb.mxu0 %v5189_v13  ;;  %v2897_v13 = vunpack.i.l.bf16 %v4587_v42 }
 0x1c0   : > { %1457 = vmatpush.msrb.mxu1 %v3117_v58  ;;  %1497 = vmatpush.msrb.mxu0 %v3118_v35  ;;  %v4634_v57 = vsel %vm250_vm4, %v2718_v54, %v5118_v62 }
 0x1c1   : > { %1458 = vmatmul.f32.vlgmr.msrb.gmra.mxu1 %v4441_v11  ;;  %1498 = vmatmul.f32.vlgmr.msrb.gmra.mxu0 %v4441_v11 }
 0x1c3   : > { %3085 = vrot.lane.b32.xlu1 %v4223_v38, %s3176_s29 }
 0x1c4   : > { %v4640_v39 = vpop.permute.xlu1 %2875 }
 0x1c5   : > { %3080 = vrot.lane.b32.xlu0 %v4447_v31, %s3177_s30  ;;  %v4644_v37 = vpop.permute.xlu2 %2925  ;;  %3090 = vrot.lane.b32.xlu2 %v4466_v14, %s3177_s30  ;;  %v2898_v31 = vunpack.i.h.bf16 %v4587_v42  ;;  %v2878_v42 = vunpack.i.h.bf16 %v4640_v39  ;;  %v2877_v16 = vunpack.i.l.bf16 %v4640_v39 }
 0x1c6   : > { %v2871_v6 = vpop.permute.xlu0 %2870 }
 0x1c7   : > { %v2872_v41 = vunpack.i.l.bf16 %v2871_v6 }
 0x1cc   : > { %v2891_v8 = vpop.permute.xlu1 %2890 }
 0x1cd   : > { %3095 = vrot.lane.b32.xlu0 %v3094_v46, %s3176_s29  ;;  %v4651_v21 = vpop.permute.xlu2 %2940  ;;  %v2893_v35 = vunpack.i.h.bf16 %v2891_v8  ;;  %v2892_v62 = vunpack.i.l.bf16 %v2891_v8  ;;  %v1429_v8 = vsel %vm515_vm5, %v2897_v13, %v2898_v31 }
 0x1ce   : > { %v2886_v38 = vpop.permute.xlu0 %2885 }
 0x1cf   : > { %v2888_v46 = vunpack.i.h.bf16 %v2886_v38  ;;  %v2887_v60 = vunpack.i.l.bf16 %v2886_v38  ;;  %v1428_v61 = vsel %vm515_vm5, %v2893_v35, %v2897_v13  ;;  %v2853_v38 = vunpack.i.h.bf16 %v4462_v22 }
 0x1d0   : > { %v2852_v13 = vunpack.i.l.bf16 %v4462_v22 }
 0x1d1   : > { %v1425_v31 = vsel %vm515_vm5, %v2883_v28, %v2887_v60 }
 0x1d4   : > { %v2906_v25 = vpop.permute.xlu1 %2905 }
 0x1d5   : > { %v2908_v54 = vunpack.i.h.bf16 %v2906_v25  ;;  %v2907_v51 = vunpack.i.l.bf16 %v2906_v25 }
 0x1d6   : > { %v4655_v58 = vpop.permute.xlu2 %2955  ;;  %v2901_v14 = vpop.permute.xlu0 %2900 }
 0x1d7   : > { %v2903_v45 = vunpack.i.h.bf16 %v2901_v14  ;;  %v2902_v53 = vunpack.i.l.bf16 %v2901_v14  ;;  %v1432_v7 = vsel %vm515_vm5, %v2907_v51, %v2908_v54  ;;  %v2873_v14 = vunpack.i.h.bf16 %v2871_v6 }
 0x1d8   : > { %1547 = vmatpush.msra.mxu1 %v1432_v7  ;;  %v1427_v54 = vsel %vm515_vm5, %v2892_v62, %v2893_v35  ;;  %v2867_v7 = vunpack.i.l.bf16 %v4498_v12  ;;  %v2862_v6 = vunpack.i.l.bf16 %v4616_v33  ;;  %v1424_v62 = vsel %vm515_vm5, %v2882_v15, %v2883_v28 }
 0x1d9   : > { %v1430_v25 = vsel %vm515_vm5, %v2902_v53, %v2903_v45  ;;  %v1431_v23 = vsel %vm515_vm5, %v2903_v45, %v2907_v51  ;;  %v2868_v45 = vunpack.i.h.bf16 %v4498_v12  ;;  %v2863_v51 = vunpack.i.h.bf16 %v4616_v33 }
 0x1da   : > { %1467 = vmatpush.msrb.mxu3 %v1430_v25  ;;  %1507 = vmatpush.msrb.mxu2 %v1431_v23  ;;  %v1426_v23 = vsel %vm515_vm5, %v2887_v60, %v2888_v46  ;;  %v2858_v35 = vunpack.i.h.bf16 %v4625_v19  ;;  %v2857_v12 = vunpack.i.l.bf16 %v4625_v19  ;;  %v1390_v46 = vsel %vm472_vm6, %v2877_v16, %v2878_v42 }
 0x1db   : > { %1548 = vmatpush.msra.mxu1 %v1429_v8  ;;  %v1388_v60 = vsel %vm472_vm6, %v2872_v41, %v2873_v14  ;;  %v1389_v22 = vsel %vm472_vm6, %v2873_v14, %v2877_v16  ;;  %v2848_v28 = vunpack.i.h.bf16 %v4579_v56  ;;  %v2847_v19 = vunpack.i.l.bf16 %v4579_v56 }
 0x1dc   : > { %1468 = vmatpush.msrb.mxu3 %v1427_v54  ;;  %1508 = vmatpush.msrb.mxu2 %v1428_v61  ;;  %v4670_v39 = vpop.permute.xlu1 %2920  ;;  %v2843_v8 = vunpack.i.h.bf16 %v4595_v29  ;;  %v1387_v54 = vsel %vm472_vm6, %v2867_v7, %v2868_v45  ;;  %v2842_v42 = vunpack.i.l.bf16 %v4595_v29  ;;  %v1385_v61 = vsel %vm472_vm6, %v2862_v6, %v2863_v51 }
 0x1dd   : > { %1549 = vmatpush.msra.mxu1 %v1426_v23  ;;  %v1386_v23 = vsel %vm472_vm6, %v2863_v51, %v2867_v7  ;;  %v2838_v16 = vunpack.i.h.bf16 %v4436_v3  ;;  %v2837_v56 = vunpack.i.l.bf16 %v4436_v3  ;;  %v1384_v14 = vsel %vm472_vm6, %v2857_v12, %v2858_v35 }
 0x1de   : > { %v4680_v53 = vpop.permute.xlu2 %2970  ;;  %v4682_v25 = vpop.permute.xlu0 %2915  ;;  %1469 = vmatpush.msrb.mxu3 %v1424_v62  ;;  %1509 = vmatpush.msrb.mxu2 %v1425_v31  ;;  %v2833_v45 = vunpack.i.h.bf16 %v4540_v47  ;;  %v2832_v29 = vunpack.i.l.bf16 %v4540_v47  ;;  %v1382_v6 = vsel %vm472_vm6, %v2852_v13, %v2853_v38  ;;  %v1383_v7 = vsel %vm472_vm6, %v2853_v38, %v2857_v12 }
 0x1df   : > { %v2973_v33 = vunpack.i.h.bf16 %v4680_v53  ;;  %v2972_v15 = vunpack.i.l.bf16 %v4680_v53  ;;  %1550 = vmatpush.msra.mxu1 %v1390_v46  ;;  %v2823_v51 = vunpack.i.h.bf16 %v4411_v50  ;;  %v2828_v62 = vunpack.i.h.bf16 %v4557_v1 }
 0x1e0   : > { %1470 = vmatpush.msrb.mxu3 %v1388_v60  ;;  %1510 = vmatpush.msrb.mxu2 %v1389_v22  ;;  %v1348_v31 = vsel %vm429_vm7, %v2847_v19, %v2848_v28  ;;  %v2822_v35 = vunpack.i.l.bf16 %v4411_v50  ;;  %v2827_v47 = vunpack.i.l.bf16 %v4557_v1  ;;  %v1346_v13 = vsel %vm429_vm7, %v2842_v42, %v2843_v8 }
 0x1e1   : > { %1551 = vmatpush.msra.mxu1 %v1387_v54  ;;  %v1876_v41 = vsel %vm515_vm5, %v2972_v15, %v2973_v33  ;;  %v1347_v38 = vsel %vm429_vm7, %v2843_v8, %v2847_v19  ;;  %v2812_v12 = vunpack.i.l.bf16 %v4509_v26  ;;  %v1345_v60 = vsel %vm429_vm7, %v2837_v56, %v2838_v16 }
 0x1e2   : > { %1471 = vmatpush.msrb.mxu3 %v1385_v61  ;;  %1511 = vmatpush.msrb.mxu2 %v1386_v23  ;;  %v1343_v1 = vsel %vm429_vm7, %v2832_v29, %v2833_v45  ;;  %v1344_v28 = vsel %vm429_vm7, %v2833_v45, %v2837_v56  ;;  %v1342_v19 = vsel %vm429_vm7, %v2827_v47, %v2828_v62  ;;  %v2808_v8 = vunpack.i.h.bf16 %v4381_v55  ;;  %v4759_v55 = vld [vmem:[%s5059_s1 + $0x8] sm:$0xff] }
 0x1e3   : > { %1552 = vmatpush.msra.mxu1 %v1384_v14  ;;  %1913 = vmatpush.msra.mxu0 %v1876_v41  ;;  %v1340_v54 = vsel %vm429_vm7, %v2822_v35, %v2823_v51  ;;  %v1341_v42 = vsel %vm429_vm7, %v2823_v51, %v2827_v47  ;;  %v1302_v16 = vsel %vm386_vm0, %v2812_v12, %v2813_v17  ;;  %v2818_v56 = vunpack.i.h.bf16 %v4492_v5 }
 0x1e4   : > { %1472 = vmatpush.msrb.mxu3 %v1382_v6  ;;  %1512 = vmatpush.msrb.mxu2 %v1383_v7  ;;  %v4708_v3 = vpop.permute.xlu1 %2935  ;;  %v1301_v29 = vsel %vm386_vm0, %v2807_v2, %v2808_v8  ;;  %v2793_v26 = vunpack.i.h.bf16 %v4349_v9  ;;  %v2942_v5 = vunpack.i.l.bf16 %v4651_v21  ;;  %v5190_v51 = vunpack.i.l.bf16 %v4349_v9 }
 0x1e5   : > { %1553 = vmatpush.msra.mxu1 %v1348_v31  ;;  %v2937_v14 = vunpack.i.l.bf16 %v4708_v3  ;;  %v2938_v17 = vunpack.i.h.bf16 %v4708_v3  ;;  %v2943_v3 = vunpack.i.h.bf16 %v4651_v21  ;;  %v5191_v35 = vunpack.i.h.bf16 %v4444_v59 }
 0x1e6   : > { %v4716_v46 = vpop.permute.xlu2 %2985  ;;  %v4718_v15 = vpop.permute.xlu0 %2930  ;;  %1473 = vmatpush.msrb.mxu3 %v1346_v13  ;;  %1513 = vmatpush.msrb.mxu2 %v1347_v38  ;;  %v2768_v9 = vunpack.i.h.bf16 %v4415_v0  ;;  %v2957_v47 = vunpack.i.l.bf16 %v4655_v58  ;;  %v5192_v59 = vunpack.i.l.bf16 %v4305_v49 }
 0x1e7   : > { %v2988_v22 = vunpack.i.h.bf16 %v4716_v46  ;;  %v2987_v50 = vunpack.i.l.bf16 %v4716_v46  ;;  %1554 = vmatpush.msra.mxu1 %v1345_v60  ;;  %v2933_v23 = vunpack.i.h.bf16 %v4718_v15  ;;  %v2932_v41 = vunpack.i.l.bf16 %v4718_v15 }
 0x1e8   : > { %1474 = vmatpush.msrb.mxu3 %v1343_v1  ;;  %1514 = vmatpush.msrb.mxu2 %v1344_v28  ;;  %v1715_v7 = vsel %vm352_vm1, %v2793_v26, %v2937_v14  ;;  %v1713_v40 = vsel %vm352_vm1, %v2938_v17, %v2942_v5 }
 0x1e9   : > { %1555 = vmatpush.msra.mxu1 %v1342_v19  ;;  %v1873_v61 = vsel %vm515_vm5, %v2987_v50, %v2988_v22  ;;  %v1744_v2 = vsel %vm386_vm0, %v2818_v56, %v2932_v41  ;;  %v2958_v19 = vunpack.i.h.bf16 %v4655_v58 }
 0x1ea   : > { %1475 = vmatpush.msrb.mxu3 %v1340_v54  ;;  %1515 = vmatpush.msrb.mxu2 %v1341_v42  ;;  %v5193_v54 = vunpack.i.l.bf16 %v4415_v0  ;;  %v1053_v42 = vpop.f32.mrf.mxu3 }
 0x1eb   : > { %1556 = vmatpush.msra.mxu1 %v2817_v34  ;;  %1914 = vmatpush.msra.mxu0 %v1873_v61  ;;  %v1745_v34 = vsel %vm386_vm0, %v2932_v41, %v2933_v23  ;;  %v1054_v0 = vadd.f32 %v1053_v42, %v3734_v43 }
 0x1ec   : > { %1476 = vmatpush.msrb.mxu3 %v1302_v16  ;;  %1516 = vmatpush.msrb.mxu2 %v4528_v10 }
 0x1ed   : > { %v4742_v45 = vpop.permute.xlu1 %2950  ;;  %1557 = vmatpush.msra.mxu1 %v2808_v8 }
 0x1ee   : > { %1477 = vmatpush.msrb.mxu3 %v4472_v44  ;;  %1517 = vmatpush.msrb.mxu2 %v1301_v29  ;;  %v2952_v31 = vunpack.i.l.bf16 %v4742_v45  ;;  %v2953_v13 = vunpack.i.h.bf16 %v4742_v45  ;;  %v4786_v38 = vpop.permute.xlu2 %3000  ;;  %v2927_v45 = vunpack.i.l.bf16 %v4644_v37 }
 0x1ef   : > { %v4754_v10 = vpop.permute.xlu0 %2945  ;;  %2199 = vmatmul.msk.f32.vlgmr.msrb.gmra.mxu3 %vm318_vm2, %v4759_v55  ;;  %2200 = vmatmul.msk.f32.vlgmr.msrb.gmra.mxu2 %vm318_vm2, %v4759_v55  ;;  %v3003_v53 = vunpack.i.h.bf16 %v4786_v38 }
 0x1f0   : > { %v2948_v44 = vunpack.i.h.bf16 %v4754_v10  ;;  %1522 = vmatpush.msra.mxu3 %v2802_v52  ;;  %1888 = vmatpush.msra.mxu2 %v1744_v2  ;;  %v2947_v6 = vunpack.i.l.bf16 %v4754_v10  ;;  %v1013_v52 = vpop.f32.mrf.mxu0  ;;  %v1682_v28 = vsel %vm318_vm2, %v2768_v9, %v2952_v31  ;;  %v1680_v56 = vsel %vm318_vm2, %v2953_v13, %v2957_v47  ;;  %v3129_v10 = vld [vmem:[%s3240_s24 + $0xf0] sm:$0xff] }
 0x1f1   : > { %1928 = vmatpush.msrb.mxu1 %v1745_v34  ;;  %v1014_v50 = vadd.f32 %v1013_v52, %v3734_v43  ;;  %v5195_v34 = vunpack.i.l.bf16 %v4383_v24  ;;  %v5197_v13 = vunpack.i.h.bf16 %v5184_v32 }
 0x1f2   : > { %1523 = vmatpush.msra.mxu3 %v5190_v51  ;;  %1889 = vmatpush.msra.mxu2 %v1715_v7  ;;  %v1716_v62 = vsel %vm352_vm1, %v2937_v14, %v2948_v44  ;;  %v1711_v12 = vsel %vm352_vm1, %v2943_v3, %v2947_v6  ;;  %v5194_v14 = vunpack.i.h.bf16 %v4375_v18  ;;  %v5196_v18 = vunpack.i.l.bf16 %v4337_v48 }
 0x1f3   : > { %1929 = vmatpush.msrb.mxu1 %v1716_v62 }
 0x1f4   : > { %1524 = vmatpush.msra.mxu3 %v5191_v35  ;;  %1890 = vmatpush.msra.mxu2 %v1713_v40 }
 0x1f5   : > { %v4791_v60 = vpop.permute.xlu1 %2965  ;;  %2201 = vmatmul.msk.f32.vlgmr.msra.gmra.mxu1 %vm318_vm2, %v4759_v55 }
 0x1f6   : > { %1525 = vmatpush.msra.mxu3 %v5192_v59  ;;  %1891 = vmatpush.msra.mxu2 %v1711_v12  ;;  %v2968_v61 = vunpack.i.h.bf16 %v4791_v60  ;;  %v2967_v41 = vunpack.i.l.bf16 %v4791_v60  ;;  %v4824_v3 = vpop.permute.xlu2 %3015  ;;  %v5198_v59 = vunpack.i.l.bf16 %v4294_v20 }
 0x1f7   : > { %v4798_v1 = vpop.permute.xlu0 %2960  ;;  %v3017_v60 = vunpack.i.l.bf16 %v4824_v3  ;;  %v3018_v21 = vunpack.i.h.bf16 %v4824_v3 }
 0x1f8   : > { %v2962_v8 = vunpack.i.l.bf16 %v4798_v1  ;;  %1526 = vmatpush.msra.mxu3 %v5193_v54  ;;  %1892 = vmatpush.msra.mxu2 %v1682_v28  ;;  %v1033_v49 = vpop.f32.mrf.mxu2  ;;  %v1649_v17 = vsel %vm284_vm3, %v2967_v41, %v2968_v61  ;;  %v2963_v24 = vunpack.i.h.bf16 %v4798_v1 }
 0x1f9   : > { %v1034_v16 = vadd.f32 %v1033_v49, %v1014_v50  ;;  %v2743_v49 = vunpack.i.h.bf16 %v4337_v48 }
 0x1fa   : > { %1527 = vmatpush.msra.mxu3 %v5194_v14  ;;  %1893 = vmatpush.msra.mxu2 %v1680_v56  ;;  %v1678_v58 = vsel %vm318_vm2, %v2958_v19, %v2962_v8  ;;  %v1683_v20 = vsel %vm318_vm2, %v2952_v31, %v2963_v24  ;;  %v2923_v31 = vunpack.i.h.bf16 %v4670_v39  ;;  %v1679_v48 = vsel %vm318_vm2, %v2962_v8, %v3018_v21  ;;  %v3120_v14 = vld [vmem:[%s3240_s24 + $0xd0] sm:$0xff] }
 0x1fb   : > { %v1116_v29 = vmax.f32 %v1034_v16, 0.0  ;;  %v5201_v16 = vunpack.i.l.bf16 %v4122_v4  ;;  %v2917_v56 = vunpack.i.l.bf16 %v4682_v25  ;;  %v2918_v8 = vunpack.i.h.bf16 %v4682_v25 }
 0x1fc   : > { %1528 = vmatpush.msra.mxu3 %v5195_v34  ;;  %1894 = vmatpush.msra.mxu2 %v1678_v58  ;;  %v3121_v34 = vld [vmem:[%s3240_s24 + $0x90] sm:$0xff] }
 0x1fd   : > { %2182 = vst [vmem:[%s4399_s6 + $0x18] sm:$0xff] %v1116_v29  ;;  %v1073_v26 = vpop.f32.mrf.mxu1  ;;  %v4818_v2 = vpop.permute.xlu1 %2980  ;;  %v3002_v29 = vunpack.i.l.bf16 %v4786_v38 }
 0x1fe   : > { %v1074_v7 = vadd.f32 %v1073_v26, %v1054_v0  ;;  %1529 = vmatpush.msra.mxu3 %v5196_v18  ;;  %1895 = vmatpush.msra.mxu2 %v1649_v17  ;;  %v2983_v51 = vunpack.i.h.bf16 %v4818_v2  ;;  %v2982_v62 = vunpack.i.l.bf16 %v4818_v2  ;;  %v1616_v26 = vsel %vm250_vm4, %v2923_v31, %v2927_v45 }
 0x1ff   : > { %v4827_v40 = vpop.permute.xlu0 %2975  ;;  %v4891_v0 = vpop.permute.xlu2 %3030 }
 0x200   : > { %v1117_v52 = vmax.f32 %v1074_v7, 0.0  ;;  %v2978_v35 = vunpack.i.h.bf16 %v4827_v40  ;;  %v2977_v9 = vunpack.i.l.bf16 %v4827_v40  ;;  %1530 = vmatpush.msra.mxu3 %v5197_v13  ;;  %v1714_v12 = vsel %vm352_vm1, %v2942_v5, %v2982_v62  ;;  %v3122_v7 = vld [vmem:[%s3240_s24 + $0x50] sm:$0xff] }
 0x201   : > { %1930 = vmatpush.msrb.mxu1 %v1714_v12  ;;  %v1712_v32 = vsel %vm352_vm1, %v2947_v6, %v2983_v51  ;;  %v5199_v5 = vunpack.i.l.bf16 %v5185_v63  ;;  %v5200_v6 = vunpack.i.h.bf16 %v4247_v36  ;;  %v1681_v63 = vsel %vm318_vm2, %v2957_v47, %v3017_v60 }
 0x202   : > { %2183 = vst [vmem:[%s4399_s6 + $0x20] sm:$0xff] %v1117_v52  ;;  %1531 = vmatpush.msra.mxu3 %v5198_v59  ;;  %v1647_v50 = vsel %vm284_vm3, %v2977_v9, %v2978_v35  ;;  %v1877_v9 = vsel %vm515_vm5, %v2973_v33, %v3002_v29  ;;  %v3033_v33 = vunpack.i.h.bf16 %v4891_v0 }
 0x203   : > { %1931 = vmatpush.msrb.mxu1 %v1712_v32  ;;  %1896 = vmatpush.msra.mxu2 %v1647_v50  ;;  %v3032_v50 = vunpack.i.l.bf16 %v4891_v0 }
 0x204   : > { %1532 = vmatpush.msra.mxu3 %v5199_v5 }
 0x205   : > { %v4858_v28 = vpop.permute.xlu1 %2995  ;;  %1932 = vmatpush.msrb.mxu1 %v1683_v20  ;;  %v3123_v20 = vld [vmem:[%s3240_s24 + $0xa0] sm:$0xff] }
 0x206   : > { %1533 = vmatpush.msra.mxu3 %v5200_v6  ;;  %v2998_v19 = vunpack.i.h.bf16 %v4858_v28  ;;  %v2997_v54 = vunpack.i.l.bf16 %v4858_v28 }
 0x207   : > { %v4870_v42 = vpop.permute.xlu0 %2990  ;;  %1933 = vmatpush.msrb.mxu1 %v1681_v63  ;;  %v3046_v5 = vpop.permute.xlu2 %3045  ;;  %v3124_v63 = vld [vmem:[%s3240_s24 + $0x60] sm:$0xff] }
 0x208   : > { %v2993_v36 = vunpack.i.h.bf16 %v4870_v42  ;;  %v2992_v41 = vunpack.i.l.bf16 %v4870_v42  ;;  %1534 = vmatpush.msra.mxu3 %v5201_v16  ;;  %v1870_v47 = vsel %vm515_vm5, %v2997_v54, %v2998_v19 }
 0x209   : > { %1915 = vmatpush.msra.mxu0 %v1870_v47  ;;  %1934 = vmatpush.msrb.mxu1 %v1679_v48  ;;  %v1113_v47 = vpop.f32.mrf.mxu0  ;;  %v1828_v48 = vsel %vm472_vm6, %v3032_v50, %v3033_v33 }
 0x20a   : > { %1535 = vmatpush.msra.mxu3 %v3120_v14  ;;  %v1645_v4 = vsel %vm284_vm3, %v2743_v49, %v2992_v41  ;;  %v1650_v58 = vsel %vm284_vm3, %v2968_v61, %v2993_v36  ;;  %v1614_v61 = vsel %vm250_vm4, %v2917_v56, %v2918_v8 }
 0x20b   : > { %1897 = vmatpush.msra.mxu2 %v1645_v4  ;;  %1935 = vmatpush.msrb.mxu1 %v1650_v58  ;;  %v3048_v58 = vunpack.i.h.bf16 %v3046_v5 }
 0x20c   : > { %1536 = vmatpush.msra.mxu3 %v3121_v34 }
 0x20d   : > { %1898 = vmatpush.msra.mxu2 %v1616_v26  ;;  %v3011_v17 = vpop.permute.xlu1 %3010  ;;  %v3047_v26 = vunpack.i.l.bf16 %v3046_v5 }
 0x20e   : > { %1537 = vmatpush.msra.mxu3 %v3122_v7  ;;  %v3012_v18 = vunpack.i.l.bf16 %v3011_v17 }
 0x20f   : > { %v3006_v52 = vpop.permute.xlu0 %3005  ;;  %1538 = vmatmul.f32.vlgmr.msra.gmra.mxu3 %v4441_v11  ;;  %1899 = vmatpush.msra.mxu2 %v1614_v61 }
 0x210   : > { %v3008_v13 = vunpack.i.h.bf16 %v3006_v52  ;;  %v3007_v12 = vunpack.i.l.bf16 %v3006_v52  ;;  %1953 = vmatpush.msrb.mxu3 %v1877_v9  ;;  %v1874_v59 = vsel %vm515_vm5, %v2988_v22, %v3012_v18  ;;  %v3013_v22 = vunpack.i.h.bf16 %v3011_v17  ;;  %v3061_v17 = vpop.permute.xlu2 %3060 }
 0x211   : > { %1900 = vmatpush.msra.mxu2 %v4634_v57 }
 0x212   : > { %1954 = vmatpush.msrb.mxu3 %v1874_v59  ;;  %v1834_v32 = vsel %vm472_vm6, %v3007_v12, %v3008_v13  ;;  %v1875_v14 = vsel %vm515_vm5, %v3012_v18, %v3013_v22  ;;  %v3063_v18 = vunpack.i.h.bf16 %v3061_v17  ;;  %v3062_v12 = vunpack.i.l.bf16 %v3061_v17 }
 0x213   : > { %1901 = vmatpush.msra.mxu2 %v4608_v27  ;;  %1916 = vmatpush.msra.mxu0 %v1834_v32  ;;  %v1878_v27 = vsel %vm515_vm5, %v3002_v29, %v3003_v53  ;;  %v1833_v53 = vsel %vm472_vm6, %v3047_v26, %v3048_v58  ;;  %v5202_v58 = vunpack.i.l.bf16 %v4620_v30 }
 0x214   : > { %v1830_v5 = vsel %vm472_vm6, %v3062_v12, %v3063_v18 }
 0x215   : > { %1902 = vmatpush.msra.mxu2 %v3123_v20  ;;  %v3026_v46 = vpop.permute.xlu1 %3025 }
 0x216   : > { %v3028_v6 = vunpack.i.h.bf16 %v3026_v46  ;;  %v3027_v57 = vunpack.i.l.bf16 %v3026_v46 }
 0x217   : > { %v3021_v54 = vpop.permute.xlu0 %3020  ;;  %1903 = vmatpush.msra.mxu2 %v3124_v63 }
 0x218   : > { %v3023_v49 = vunpack.i.h.bf16 %v3021_v54  ;;  %v3022_v31 = vunpack.i.l.bf16 %v3021_v54  ;;  %1904 = vmatmul.f32.vlgmr.msra.gmra.mxu2 %v4441_v11  ;;  %v1871_v38 = vsel %vm515_vm5, %v2998_v19, %v3027_v57  ;;  %v1872_v4 = vsel %vm515_vm5, %v3027_v57, %v3028_v6 }
 0x219   : > { %v1093_v16 = vpop.f32.mrf.mxu2  ;;  %1993 = vmatpush.msrb.mxu2 %v1878_v27  ;;  %1955 = vmatpush.msrb.mxu3 %v1871_v38  ;;  %v4952_v27 = vpop.permute.xlu2 %3075 }
 0x21a   : > { %v1094_v56 = vadd.f32 %v1093_v16, %v3734_v43  ;;  %v1831_v11 = vsel %vm472_vm6, %v3022_v31, %v3023_v49  ;;  %v1832_v50 = vsel %vm472_vm6, %v3023_v49, %v3047_v26  ;;  %v2928_v49 = vunpack.i.h.bf16 %v4644_v37 }
 0x21b   : > { %1994 = vmatpush.msrb.mxu2 %v1875_v14  ;;  %1917 = vmatpush.msra.mxu0 %v1831_v11  ;;  %v2913_v16 = vunpack.i.h.bf16 %v4620_v30 }
 0x21c   : > { %v1114_v28 = vadd.f32 %v1113_v47, %v1094_v56  ;;  %v1617_v40 = vsel %vm250_vm4, %v2927_v45, %v2928_v49 }
 0x21d   : > { %1995 = vmatpush.msrb.mxu2 %v1872_v4  ;;  %v3041_v19 = vpop.permute.xlu1 %3040  ;;  %1918 = vmatpush.msra.mxu0 %v1828_v48  ;;  %v3077_v48 = vunpack.i.l.bf16 %v4952_v27 }
 0x21e   : > { %v1118_v29 = vmax.f32 %v1114_v28, 0.0  ;;  %v3043_v0 = vunpack.i.h.bf16 %v3041_v19  ;;  %v3042_v34 = vunpack.i.l.bf16 %v3041_v19 }
 0x21f   : > { %v3036_v7 = vpop.permute.xlu0 %3035 }
 0x220   : > { %2184 = vst.msk [vmem:[%s4399_s6 + $0x28] sm:$0xff] %vm667_vm8, %v1118_v29  ;;  %v3038_v61 = vunpack.i.h.bf16 %v3036_v7  ;;  %v3037_v52 = vunpack.i.l.bf16 %v3036_v7  ;;  %v1792_v9 = vsel %vm429_vm7, %v3042_v34, %v3043_v0  ;;  %v1613_v29 = vsel %vm250_vm4, %v5202_v58, %v2913_v16  ;;  %v3125_v34 = vld [vmem:[%s3240_s24 + $0xe8] sm:$0xff] }
 0x221   : > { %1919 = vmatpush.msra.mxu0 %v1792_v9 }
 0x222   : > { %v1835_v59 = vsel %vm472_vm6, %v3008_v13, %v3037_v52  ;;  %v1836_v32 = vsel %vm472_vm6, %v3037_v52, %v3038_v61  ;;  %v1829_v13 = vsel %vm472_vm6, %v3033_v33, %v3062_v12  ;;  %v2922_v33 = vunpack.i.l.bf16 %v4670_v39  ;;  %v3126_v52 = vld [vmem:[%s3240_s24 + $0xa8] sm:$0xff] }
 0x223   : > { %1956 = vmatpush.msrb.mxu3 %v1835_v59  ;;  %1996 = vmatpush.msrb.mxu2 %v1836_v32 }
 0x225   : > { %1957 = vmatpush.msrb.mxu3 %v1832_v50  ;;  %v4935_v20 = vpop.permute.xlu1 %3055  ;;  %1997 = vmatpush.msrb.mxu2 %v1833_v53  ;;  %v3127_v53 = vld [vmem:[%s3240_s24 + $0x68] sm:$0xff]  ;;  %v3128_v50 = vld [vmem:[%s5059_s1] sm:$0xff] }
 0x226   : > { %v3058_v46 = vunpack.i.h.bf16 %v4935_v20  ;;  %v3057_v22 = vunpack.i.l.bf16 %v4935_v20 }
 0x227   : > { %v4940_v6 = vpop.permute.xlu0 %3050  ;;  %1958 = vmatpush.msrb.mxu3 %v1829_v13  ;;  %1998 = vmatpush.msrb.mxu2 %v1830_v5 }
 0x228   : > { %v3053_v57 = vunpack.i.h.bf16 %v4940_v6  ;;  %v3052_v54 = vunpack.i.l.bf16 %v4940_v6  ;;  %v1789_v63 = vsel %vm429_vm7, %v3057_v22, %v3058_v46 }
 0x229   : > { %1920 = vmatpush.msra.mxu0 %v1789_v63 }
 0x22a   : > { %v1648_v31 = vsel %vm284_vm3, %v2978_v35, %v3052_v54  ;;  %v1646_v38 = vsel %vm284_vm3, %v2992_v41, %v3053_v57  ;;  %v3078_v35 = vunpack.i.h.bf16 %v4952_v27  ;;  %v1615_v41 = vsel %vm250_vm4, %v2918_v8, %v2922_v33 }
 0x22b   : > { %1936 = vmatpush.msrb.mxu1 %v1648_v31 }
 0x22c   : > { %v1748_v8 = vsel %vm386_vm0, %v3077_v48, %v3078_v35 }
 0x22d   : > { %1937 = vmatpush.msrb.mxu1 %v1646_v38  ;;  %v3071_v47 = vpop.permute.xlu1 %3070 }
 0x22e   : > { %v3073_v56 = vunpack.i.h.bf16 %v3071_v47  ;;  %v3072_v14 = vunpack.i.l.bf16 %v3071_v47 }
 0x22f   : > { %v3066_v4 = vpop.permute.xlu0 %3065  ;;  %1938 = vmatpush.msrb.mxu1 %v1617_v40 }
 0x230   : > { %v3068_v11 = vunpack.i.h.bf16 %v3066_v4  ;;  %v3067_v28 = vunpack.i.l.bf16 %v3066_v4  ;;  %v1793_v19 = vsel %vm429_vm7, %v3043_v0, %v3072_v14  ;;  %v1794_v45 = vsel %vm429_vm7, %v3072_v14, %v3073_v56  ;;  %v3091_v0 = vpop.permute.xlu2 %3090 }
 0x231   : > { %1939 = vmatpush.msrb.mxu1 %v1615_v41  ;;  %1959 = vmatpush.msrb.mxu3 %v1793_v19  ;;  %v3093_v18 = vunpack.i.h.bf16 %v3091_v0  ;;  %v3092_v9 = vunpack.i.l.bf16 %v3091_v0 }
 0x232   : > { %1999 = vmatpush.msrb.mxu2 %v1794_v45  ;;  %v1786_v25 = vsel %vm429_vm7, %v3067_v28, %v3068_v11 }
 0x233   : > { %1940 = vmatpush.msrb.mxu1 %v1613_v29  ;;  %1921 = vmatpush.msra.mxu0 %v1786_v25  ;;  %v1788_v22 = vsel %vm429_vm7, %v3092_v9, %v3093_v18  ;;  %v1787_v13 = vsel %vm429_vm7, %v3068_v11, %v3092_v9 }
 0x235   : > { %1941 = vmatpush.msrb.mxu1 %v3125_v34  ;;  %v3086_v26 = vpop.permute.xlu1 %3085  ;;  %1922 = vmatpush.msra.mxu0 %v1748_v8 }
 0x236   : > { %v3088_v17 = vunpack.i.h.bf16 %v3086_v26  ;;  %v3087_v7 = vunpack.i.l.bf16 %v3086_v26 }
 0x237   : > { %v3081_v61 = vpop.permute.xlu0 %3080  ;;  %1942 = vmatpush.msrb.mxu1 %v3126_v52 }
 0x238   : > { %v3083_v12 = vunpack.i.h.bf16 %v3081_v61  ;;  %v3082_v59 = vunpack.i.l.bf16 %v3081_v61  ;;  %v1746_v32 = vsel %vm386_vm0, %v3087_v7, %v3088_v17 }
 0x239   : > { %1943 = vmatpush.msrb.mxu1 %v3127_v53  ;;  %1923 = vmatpush.msra.mxu0 %v1746_v32 }
 0x23a   : > { %1944 = vmatmul.f32.vlgmr.msrb.gmra.mxu1 %v3128_v50  ;;  %v1790_v5 = vsel %vm429_vm7, %v3058_v46, %v3082_v59  ;;  %2219 = vmatmul.msk.f32.vlgmr.msra.gmra.mxu0 %vm318_vm2, %v4759_v55  ;;  %v1791_v20 = vsel %vm429_vm7, %v3082_v59, %v3083_v12 }
 0x23b   : > { %1960 = vmatpush.msrb.mxu3 %v1790_v5  ;;  %1968 = vmatpush.msrb.mxu0 %v2933_v23 }
 0x23c   : > { %2000 = vmatpush.msrb.mxu2 %v1791_v20 }
 0x23d   : > { %1961 = vmatpush.msrb.mxu3 %v1787_v13  ;;  %1969 = vmatpush.msrb.mxu0 %v2948_v44  ;;  %v3131_v44 = vld [vmem:[%s3240_s24 + $0x70] sm:$0xff] }
 0x23e   : > { %2001 = vmatpush.msrb.mxu2 %v1788_v22  ;;  %v1459_v1 = vpop.f32.mrf.mxu1  ;;  %v1499_v2 = vpop.f32.mrf.mxu0 }
 0x23f   : > { %v3096_v46 = vpop.permute.xlu0 %3095  ;;  %1970 = vmatpush.msrb.mxu0 %v2982_v62  ;;  %v1460_v37 = vadd.f32 %v1459_v1, %v3734_v43  ;;  %v1500_v39 = vadd.f32 %v1499_v2, %v3734_v43 }
 0x240   : > { %v3098_v63 = vunpack.i.h.bf16 %v3096_v46  ;;  %v3097_v31 = vunpack.i.l.bf16 %v3096_v46 }
 0x241   : > { %1971 = vmatpush.msrb.mxu0 %v2983_v51 }
 0x242   : > { %v1749_v15 = vsel %vm386_vm0, %v3078_v35, %v3097_v31  ;;  %2002 = vmatpush.msrb.mxu2 %v3097_v31  ;;  %v1747_v23 = vsel %vm386_vm0, %v3088_v17, %v3098_v63 }
 0x243   : > { %1962 = vmatpush.msrb.mxu3 %v1749_v15  ;;  %1972 = vmatpush.msrb.mxu0 %v2963_v24 }
 0x244   : > { %2003 = vmatpush.msrb.mxu2 %v3098_v63 }
 0x245   : > { %1963 = vmatpush.msrb.mxu3 %v1747_v23  ;;  %1973 = vmatpush.msrb.mxu0 %v3017_v60 }
 0x246   : > { %2220 = vmatmul.msk.f32.vlgmr.msrb.gmra.mxu3 %vm318_vm2, %v4759_v55  ;;  %2221 = vmatmul.msk.f32.vlgmr.msrb.gmra.mxu2 %vm318_vm2, %v4759_v55  ;;  %v3130_v55 = vld [vmem:[%s3240_s24 + $0xb0] sm:$0xff] }
 0x247   : > { %1974 = vmatpush.msrb.mxu0 %v3018_v21 }
 0x249   : > { %1975 = vmatpush.msrb.mxu0 %v2993_v36 }
 0x24b   : > { %1976 = vmatpush.msrb.mxu0 %v3052_v54 }
 0x24d   : > { %1977 = vmatpush.msrb.mxu0 %v3053_v57 }
 0x24f   : > { %1978 = vmatpush.msrb.mxu0 %v2928_v49 }
 0x251   : > { %1979 = vmatpush.msrb.mxu0 %v2922_v33 }
 0x253   : > { %1980 = vmatpush.msrb.mxu0 %v2913_v16 }
 0x255   : > { %1981 = vmatpush.msrb.mxu0 %v3129_v10 }
 0x257   : > { %1982 = vmatpush.msrb.mxu0 %v3130_v55 }
 0x259   : > { %1983 = vmatpush.msrb.mxu0 %v3131_v44 }
 0x25a   : > { %1984 = vmatmul.f32.vlgmr.msrb.gmra.mxu0 %v3128_v50 }
 0x272   : > { %v1479_v51 = vpop.f32.mrf.mxu3  ;;  %v1519_v62 = vpop.f32.mrf.mxu2 }
 0x273   : > { %v1480_v30 = vadd.f32 %v1479_v51, %v1460_v37  ;;  %v1520_v3 = vadd.f32 %v1519_v62, %v1500_v39  ;;  %v1559_v42 = vpop.f32.mrf.mxu1 }
 0x275   : > { %v1562_v24 = vmax.f32 %v1480_v30, 0.0  ;;  %v1563_v60 = vmax.f32 %v1520_v3, 0.0 }
 0x277   : > { %2202 = vst [vmem:[%s4399_s6 + $0x30] sm:$0xff] %v1562_v24 }
 0x278   : > { %2203 = vst [vmem:[%s4399_s6 + $0x38] sm:$0xff] %v1563_v60 }
 0x292   : > { %v1539_v21 = vpop.f32.mrf.mxu3 }
 0x293   : > { %v1540_v36 = vadd.f32 %v1539_v21, %v3734_v43 }
 0x295   : > { %v1560_v6 = vadd.f32 %v1559_v42, %v1540_v36 }
 0x297   : > { %v1564_v57 = vmax.f32 %v1560_v6, 0.0 }
 0x299   : > { %2204 = vst.msk [vmem:[%s4399_s6 + $0x40] sm:$0xff] %vm667_vm8, %v1564_v57 }
 0x29b   : > { %v1905_v54 = vpop.f32.mrf.mxu2 }
 0x29c   : > { %v1906_v49 = vadd.f32 %v1905_v54, %v3734_v43 }
 0x2b7   : > { %v1925_v33 = vpop.f32.mrf.mxu0  ;;  %v1945_v16 = vpop.f32.mrf.mxu1 }
 0x2b8   : > { %v1926_v27 = vadd.f32 %v1925_v33, %v1906_v49  ;;  %v1946_v47 = vadd.f32 %v1945_v16, %v3734_v43 }
 0x2ba   : > { %v2008_v38 = vmax.f32 %v1926_v27, 0.0 }
 0x2bc   : > { %2222 = vst [vmem:[%s4399_s6 + $0x48] sm:$0xff] %v2008_v38 }
 0x2c9   : > { %v1965_v40 = vpop.f32.mrf.mxu3  ;;  %v2005_v14 = vpop.f32.mrf.mxu2 }
 0x2ca   : > { %v1966_v35 = vadd.f32 %v1965_v40, %v1946_v47 }
 0x2cc   : > { %v2009_v48 = vmax.f32 %v1966_v35, 0.0 }
 0x2ce   : > { %2223 = vst [vmem:[%s4399_s6 + $0x50] sm:$0xff] %v2009_v48 }
 0x2d7   : > { %v1985_v56 = vpop.f32.mrf.mxu0 }
 0x2d8   : > { %v1986_v4 = vadd.f32 %v1985_v56, %v3734_v43 }
 0x2da   : > { %v2006_v41 = vadd.f32 %v2005_v14, %v1986_v4 }
 0x2dc   : > { %v2010_v11 = vmax.f32 %v2006_v41, 0.0 }
 0x2de   : > { %2224 = vst.msk [vmem:[%s4399_s6 + $0x58] sm:$0xff] %vm667_vm8, %v2010_v11 }
 0x2df PF: > { %s13_s16 = sadd.s32 1, %s3170_s16   ;;  %s5203_s12 = smov %s3162_s14 }
 0x2e0   : > { %p10_p7 = scmp.ge.s32.totalorder %s13_s16, 10   ;;  %s5204_s13 = smov %s3166_s15 }
 0x2e1   : > { %s5205_s14 = smov %s5208_s17  ;;  %s5206_s15 = smov %s5212_s18 }
 0x2e2   :  { %12 = sbr.rel (!%p10_p7) target bundleno = 3 (0x3), region = 73 }

// kernel: ppcd_forward.6
= control target key start
LH: loop header
LB: loop body
LE: loop exit
PB: predicated region body
PF: predicated region fallthrough
CT: control target
= control target key end

     0   :  { %s2458_s15 = smov 0   ;;  %s2460_s16 = smov 0   ;;  %s3937_s0 = inlined_call_operand.vmem [shape: f32[2,18,8,162], index: 0, kind: input, shape index: {}]   ;;  %s3938_s1 = inlined_call_operand.vmem [shape: f32[2,18,8,162], index: 1, kind: input, shape index: {}]   ;;  %s3939_s2 = inlined_call_operand.vmem [shape: f32[8,512], index: 2, kind: input, shape index: {}]   ;;  %s3940_s3 = inlined_call_operand.vmem [shape: f32[8,1], index: 3, kind: input, shape index: {}]   ;;  %s3941_s4 = inlined_call_operand.vmem [shape: f32[2,8,8,134], index: 4, kind: output, shape index: {}]  }
   0x1   :  { %s2462_s17 = smov 0   ;;  %s2464_s18 = smov 0  }
   0x2   :  { %s2466_s19 = smov 0  }
   0x3 LB: > { %s23_s20 = sadd.s32 1, %s2415_s17  ;;  %s26_s21 = sadd.s32 1, %s2419_s18  ;;  %s2423_s19 = sphi %s2466_s19, %s14_s19   ;;  %s2419_s18 = sphi %s2464_s18, %s3997_s18   ;;  %s2415_s17 = sphi %s2462_s17, %s3996_s17   ;;  %s2411_s16 = sphi %s2460_s16, %s3995_s16   ;;  %s2407_s15 = sphi %s2458_s15, %s3994_s15  }
   0x4   : > { %p24_p0 = scmp.ge.s32.totalorder %s23_s20, 4  ;;  %p1660_p1 = scmp.ge.s32.totalorder %s2423_s19, 1 }
   0x5   : > { %p186_p2 = scmp.lt.s32.totalorder %s2423_s19, 9 }
   0x6   : > { %s3999_s20 = smov (%p24_p0, %s23_s20), 0  ;;  %s4001_s21 = smov (!%p24_p0, %s26_s21), %s2419_s18 }
   0x7   : > { %p187_p3 = pnand %p1660_p1, %p186_p2  ;;  %p28_p4 = scmp.ge.s32.totalorder %s4001_s21, 2 }
   0x8   : > { %p222_p5 = scmp.lt.s32.totalorder (!%p187_p3), %s2411_s16, 1  ;;  %s1738_s23 = sshll.u32 (!%p187_p3), %s2407_s15, 6 }
   0x9   : > { %s4003_s21 = smov (%p28_p4, %s4001_s21), 0  ;;  %190 = sbr.rel (%p187_p3) target bundleno = 610 (0x262), region = 36 }
   0xa   : > { %s2425_s6 = smov (!%p187_p3), 127   ;;  %s2426_s7 = smov (!%p187_p3), 119  }
   0xb   : > { %s2427_s8 = smov (!%p187_p3), 118   ;;  %s2428_s9 = smov (!%p187_p3), 110  }
   0xc   : > { %s2429_s10 = smov (!%p187_p3), 109   ;;  %s2430_s11 = smov (!%p187_p3), 101  }
   0xd   : > { %s2432_s12 = smov (!%p187_p3), 100  }
   0xe   : > { %s4005_s16 = smov (!%p222_p5, %s2411_s16), 1  ;;  %v2431_v28 = vmov 0   ;;  %vm313_vm0 = vcmask 1039360   ;;  %v247_v56 = vld [vmem:[%s3940_s3] sm:$0xff]  ;;  %vm435_vm1 = vcmask 965632   ;;  %vm378_vm2 = vcmask 973824  }
   0xf   : > { %s1760_s22 = smul.u32 288, %s4005_s16  ;;  %2089 = vset.pattern.permute.xlu2 %v2431_v28  ;;  %2370 = vset.pattern.permute.xlu0 %v2431_v28  ;;  %vm549_vm3 = vcmask 891904   ;;  %vm492_vm4 = vcmask 900096   ;;  %vm663_vm5 = vcmask 818176   ;;  %vm606_vm6 = vcmask 826368  }
  0x10   : > { %vm872_vm7 = vcmask 48128  }
  0x11   : > { %s231_s26 = scalar_lea.vmem %s3938_s1, %s1760_s22  ;;  %s226_s29 = scalar_lea.vmem %s3937_s0, %s1760_s22 }
  0x12   : > { %s2500_s30 = scalar_lea.vmem %s231_s26, %s1738_s23  ;;  %s2502_s5 = scalar_lea.vmem %s226_s29, %s1738_s23 }
  0x13   : > { %v2505_v0 = vld [vmem:[%s2500_s30] sm:$0xff]  ;;  %v2508_v1 = vld [vmem:[%s2500_s30 + $0x8] sm:$0xff]  ;;  %v2537_v9 = vld [vmem:[%s2500_s30 + $0x10] sm:$0xff] }
  0x14   : > { %v2511_v2 = vld [vmem:[%s2502_s5 + $0x20] sm:$0xff]  ;;  %v2515_v3 = vpack.i.bf16 %v2508_v1, %v2505_v0  ;;  %v2518_v4 = vld [vmem:[%s2502_s5 + $0x28] sm:$0xff]  ;;  %v2544_v10 = vld [vmem:[%s2500_s30 + $0x18] sm:$0xff] }
  0x15   : > { %v2521_v5 = vld [vmem:[%s2502_s5] sm:$0xff]  ;;  %v2524_v6 = vld [vmem:[%s2502_s5 + $0x8] sm:$0xff]  ;;  %v2528_v7 = vpack.i.bf16 %v2518_v4, %v2511_v2  ;;  %v2547_v11 = vld [vmem:[%s2502_s5 + $0x30] sm:$0xff]  ;;  %v2560_v15 = vpack.i.bf16 %v2544_v10, %v2537_v9 }
  0x16   : > { %v2532_v8 = vpack.i.bf16 %v2524_v6, %v2521_v5  ;;  %1830 = vrot.lane.b32.xlu2 %v2515_v3, %s2425_s6  ;;  %v2550_v12 = vld [vmem:[%s2502_s5 + $0x38] sm:$0xff]  ;;  %v2553_v13 = vld [vmem:[%s2502_s5 + $0x10] sm:$0xff]  ;;  %v2583_v20 = vld [vmem:[%s2500_s30 + $0x20] sm:$0xff] }
  0x17   : > { %1820 = vrot.lane.b32.xlu1 %v2528_v7, %s2425_s6  ;;  %v2556_v14 = vld [vmem:[%s2502_s5 + $0x18] sm:$0xff]  ;;  %v2564_v16 = vpack.i.bf16 %v2550_v12, %v2547_v11  ;;  %v2577_v18 = vld [vmem:[%s2500_s30 + $0x30] sm:$0xff]  ;;  %v2586_v21 = vld [vmem:[%s2500_s30 + $0x28] sm:$0xff] }
  0x18   : > { %1810 = vrot.lane.b32.xlu0 %v2532_v8, %s2425_s6  ;;  %v2568_v17 = vpack.i.bf16 %v2556_v14, %v2553_v13  ;;  %v2580_v19 = vld [vmem:[%s2500_s30 + $0x38] sm:$0xff]  ;;  %v2594_v23 = vpack.i.bf16 %v2586_v21, %v2583_v20  ;;  %v2764_v63 = vld [vmem:[%s2502_s5 + $0x40] sm:$0xff] }
  0x19   : > { %v2590_v22 = vpack.i.bf16 %v2580_v19, %v2577_v18 }
  0x1e   : > { %1835 = vrot.lane.b32.xlu2 %v2560_v15, %s2425_s6 }
  0x1f   : > { %1825 = vrot.lane.b32.xlu1 %v2564_v16, %s2425_s6 }
  0x20   : > { %1815 = vrot.lane.b32.xlu0 %v2568_v17, %s2425_s6 }
  0x26   : > { %1850 = vrot.lane.b32.xlu2 %v2532_v8, %s2426_s7 }
  0x27   : > { %1845 = vrot.lane.b32.xlu1 %v2590_v22, %s2425_s6 }
  0x28   : > { %1840 = vrot.lane.b32.xlu0 %v2594_v23, %s2425_s6 }
  0x2e   : > { %1865 = vrot.lane.b32.xlu2 %v2564_v16, %s2426_s7 }
  0x2f   : > { %1860 = vrot.lane.b32.xlu1 %v2528_v7, %s2426_s7 }
  0x30   : > { %1855 = vrot.lane.b32.xlu0 %v2568_v17, %s2426_s7 }
  0x36   : > { %1880 = vrot.lane.b32.xlu2 %v2594_v23, %s2426_s7 }
  0x37   : > { %1875 = vrot.lane.b32.xlu1 %v2560_v15, %s2426_s7 }
  0x38   : > { %1870 = vrot.lane.b32.xlu0 %v2515_v3, %s2426_s7 }
  0x3e   : > { %1895 = vrot.lane.b32.xlu2 %v2568_v17, %s2427_s8 }
  0x3f   : > { %1890 = vrot.lane.b32.xlu1 %v2532_v8, %s2427_s8 }
  0x40   : > { %1885 = vrot.lane.b32.xlu0 %v2590_v22, %s2426_s7 }
  0x46   : > { %1910 = vrot.lane.b32.xlu2 %v2515_v3, %s2427_s8 }
  0x47   : > { %1905 = vrot.lane.b32.xlu1 %v2564_v16, %s2427_s8 }
  0x48   : > { %1900 = vrot.lane.b32.xlu0 %v2528_v7, %s2427_s8 }
  0x4e   : > { %1925 = vrot.lane.b32.xlu2 %v2590_v22, %s2427_s8 }
  0x4f   : > { %1920 = vrot.lane.b32.xlu1 %v2594_v23, %s2427_s8 }
  0x50   : > { %1915 = vrot.lane.b32.xlu0 %v2560_v15, %s2427_s8 }
  0x56   : > { %1940 = vrot.lane.b32.xlu2 %v2528_v7, %s2428_s9 }
  0x57   : > { %1935 = vrot.lane.b32.xlu1 %v2568_v17, %s2428_s9 }
  0x58   : > { %1930 = vrot.lane.b32.xlu0 %v2532_v8, %s2428_s9 }
  0x5e   : > { %1955 = vrot.lane.b32.xlu2 %v2560_v15, %s2428_s9 }
  0x5f   : > { %1950 = vrot.lane.b32.xlu1 %v2515_v3, %s2428_s9 }
  0x60   : > { %1945 = vrot.lane.b32.xlu0 %v2564_v16, %s2428_s9 }
  0x66   : > { %1970 = vrot.lane.b32.xlu2 %v2532_v8, %s2429_s10 }
  0x67   : > { %1965 = vrot.lane.b32.xlu1 %v2590_v22, %s2428_s9 }
  0x68   : > { %1960 = vrot.lane.b32.xlu0 %v2594_v23, %s2428_s9 }
  0x6e   : > { %1985 = vrot.lane.b32.xlu2 %v2564_v16, %s2429_s10 }
  0x6f   : > { %1980 = vrot.lane.b32.xlu1 %v2528_v7, %s2429_s10 }
  0x70   : > { %1975 = vrot.lane.b32.xlu0 %v2568_v17, %s2429_s10  ;;  %v2656_v24 = vpop.permute.xlu2 %1830 }
  0x71   : > { %v1833_v44 = vunpack.i.h.bf16 %v2656_v24  ;;  %v1832_v45 = vunpack.i.l.bf16 %v2656_v24 }
  0x73   : > { %v350_v55 = vsel %vm313_vm0, %v1832_v45, %v1833_v44 }
  0x76   : > { %2000 = vrot.lane.b32.xlu2 %v2594_v23, %s2429_s10 }
  0x77   : > { %1995 = vrot.lane.b32.xlu1 %v2560_v15, %s2429_s10 }
  0x78   : > { %1990 = vrot.lane.b32.xlu0 %v2515_v3, %s2429_s10  ;;  %v2664_v25 = vpop.permute.xlu2 %1835 }
  0x79   : > { %v1838_v42 = vunpack.i.h.bf16 %v2664_v25  ;;  %v1837_v43 = vunpack.i.l.bf16 %v2664_v25 }
  0x7b   : > { %v351_v52 = vsel %vm313_vm0, %v1837_v43, %v1838_v42 }
  0x7e   : > { %2015 = vrot.lane.b32.xlu2 %v2568_v17, %s2430_s11 }
  0x7f   : > { %2010 = vrot.lane.b32.xlu1 %v2532_v8, %s2430_s11 }
  0x80   : > { %2005 = vrot.lane.b32.xlu0 %v2590_v22, %s2429_s10  ;;  %v2672_v26 = vpop.permute.xlu2 %1850 }
  0x86   : > { %2030 = vrot.lane.b32.xlu2 %v2515_v3, %s2430_s11 }
  0x87   : > { %2025 = vrot.lane.b32.xlu1 %v2564_v16, %s2430_s11 }
  0x88   : > { %2020 = vrot.lane.b32.xlu0 %v2528_v7, %s2430_s11  ;;  %v2680_v27 = vpop.permute.xlu2 %1865 }
  0x89   : > { %v2682_v29 = vpop.permute.xlu1 %1820 }
  0x8a   : > { %v2684_v30 = vpop.permute.xlu0 %1810  ;;  %v1823_v53 = vunpack.i.h.bf16 %v2682_v29  ;;  %v1822_v54 = vunpack.i.l.bf16 %v2682_v29 }
  0x8b   : > { %v1813_v60 = vunpack.i.h.bf16 %v2684_v30  ;;  %v1812_v61 = vunpack.i.l.bf16 %v2684_v30 }
  0x8c   : > { %v316_v62 = vsel %vm313_vm0, %v1822_v54, %v1823_v53 }
  0x8d   : > { %v314_v43 = vsel %vm313_vm0, %v1812_v61, %v1813_v60  ;;  %v2836_v61 = vld [vmem:[%s3939_s2] sm:$0xff] }
  0x8e   : > { %2045 = vrot.lane.b32.xlu2 %v2590_v22, %s2430_s11 }
  0x8f   : > { %2040 = vrot.lane.b32.xlu1 %v2594_v23, %s2430_s11 }
  0x90   : > { %2035 = vrot.lane.b32.xlu0 %v2560_v15, %s2430_s11  ;;  %v2692_v31 = vpop.permute.xlu2 %1880 }
  0x91   : > { %v2694_v32 = vpop.permute.xlu1 %1825  ;;  %v1883_v30 = vunpack.i.h.bf16 %v2692_v31 }
  0x92   : > { %v2696_v33 = vpop.permute.xlu0 %1815  ;;  %v1828_v48 = vunpack.i.h.bf16 %v2694_v32  ;;  %v1827_v49 = vunpack.i.l.bf16 %v2694_v32 }
  0x93   : > { %v1818_v57 = vunpack.i.h.bf16 %v2696_v33  ;;  %v1817_v58 = vunpack.i.l.bf16 %v2696_v33 }
  0x94   : > { %v317_v59 = vsel %vm313_vm0, %v1827_v49, %v1828_v48  ;;  %v2798_v49 = vld [vmem:[%s2502_s5 + $0x50] sm:$0xff] }
  0x96   : > { %2060 = vrot.lane.b32.xlu2 %v2528_v7, %s2432_s12 }
  0x97   : > { %2055 = vrot.lane.b32.xlu1 %v2568_v17, %s2432_s12 }
  0x98   : > { %2050 = vrot.lane.b32.xlu0 %v2532_v8, %s2432_s12  ;;  %v2704_v34 = vpop.permute.xlu2 %1895 }
  0x99   : > { %v2706_v35 = vpop.permute.xlu1 %1845 }
  0x9a   : > { %v2708_v36 = vpop.permute.xlu0 %1840  ;;  %v1848_v37 = vunpack.i.h.bf16 %v2706_v35  ;;  %v1847_v38 = vunpack.i.l.bf16 %v2706_v35 }
  0x9b   : > { %v1843_v39 = vunpack.i.h.bf16 %v2708_v36  ;;  %v1842_v40 = vunpack.i.l.bf16 %v2708_v36 }
  0x9c   : > { %v353_v41 = vsel %vm313_vm0, %v1847_v38, %v1848_v37 }
  0x9d   : > { %709 = vmatpush.msra.mxu0 %v353_v41  ;;  %v352_v46 = vsel %vm313_vm0, %v1842_v40, %v1843_v39  ;;  %v315_v40 = vsel %vm313_vm0, %v1817_v58, %v1818_v57  ;;  %v2825_v58 = vld [vmem:[%s2500_s30 + $0x40] sm:$0xff] }
  0x9e   : > { %2075 = vrot.lane.b32.xlu2 %v2560_v15, %s2432_s12 }
  0x9f   : > { %2070 = vrot.lane.b32.xlu1 %v2515_v3, %s2432_s12  ;;  %710 = vmatpush.msra.mxu0 %v352_v46  ;;  %v1708_v3 = vld [vmem:[%s2502_s5 + $0x48] sm:$0xff] }
  0xa0   : > { %2065 = vrot.lane.b32.xlu0 %v2564_v16, %s2432_s12  ;;  %v2730_v47 = vpop.permute.xlu2 %1910  ;;  %v2779_v41 = vpack.i.bf16 %v1708_v3, %v2764_v63 }
  0xa1   : > { %v2734_v50 = vpop.permute.xlu1 %1860  ;;  %711 = vmatpush.msra.mxu0 %v351_v52  ;;  %v1913_v36 = vunpack.i.h.bf16 %v2730_v47 }
  0xa2   : > { %v2736_v51 = vpop.permute.xlu0 %1855 }
  0xa3   : > { %712 = vmatpush.msra.mxu0 %v350_v55 }
  0xa5   : > { %713 = vmatpush.msra.mxu0 %v317_v59 }
  0xa6   : > { %706 = vperm.xlu2 %2089, %v247_v56   ;;  %v1732_v56 = vld [vmem:[%s2500_s30 + $0x58] sm:$0xff] }
  0xa7   : > { %2085 = vrot.lane.b32.xlu1 %v2590_v22, %s2432_s12  ;;  %714 = vmatpush.msra.mxu0 %v316_v62 }
  0xa8   : > { %2080 = vrot.lane.b32.xlu0 %v2594_v23, %s2432_s12  ;;  %v2767_v8 = vpop.permute.xlu2 %1925 }
  0xa9   : > { %v2769_v15 = vpop.permute.xlu1 %1875  ;;  %v1928_v17 = vunpack.i.h.bf16 %v2767_v8  ;;  %v1927_v28 = vunpack.i.l.bf16 %v2767_v8  ;;  %715 = vmatpush.msra.mxu0 %v315_v40 }
  0xaa   : > { %v2773_v38 = vpop.permute.xlu0 %1870 }
  0xab   : > { %v467_v45 = vsel %vm435_vm1, %v1927_v28, %v1928_v17  ;;  %716 = vmatpush.msra.mxu0 %v314_v43 }
  0xac   : > { %729 = vmatpush.msra.mxu1 %v467_v45 }
  0xad   : > { %717 = vmatpush.msra.mxu0 %v2577_v18  ;;  %v1713_v18 = vld [vmem:[%s2502_s5 + $0x58] sm:$0xff] }
  0xae   : > { %2101 = vrot.lane.b32.xlu2 %v2779_v41, %s2425_s6  ;;  %v2807_v55 = vpack.i.bf16 %v1713_v18, %v2798_v49 }
  0xaf   : > { %2096 = vrot.lane.b32.xlu1 %v2564_v16, %s2425_s6  ;;  %718 = vmatpush.msra.mxu0 %v2583_v20  ;;  %v2818_v20 = vld [vmem:[%s2500_s30 + $0x50] sm:$0xff] }
  0xb0   : > { %2091 = vrot.lane.b32.xlu0 %v2528_v7, %s2425_s6  ;;  %v2795_v46 = vpop.permute.xlu2 %1940  ;;  %v2839_v62 = vpack.i.bf16 %v1732_v56, %v2818_v20 }
  0xb1   : > { %v2801_v52 = vpop.permute.xlu1 %1890  ;;  %719 = vmatpush.msra.mxu0 %v2537_v9 }
  0xb2   : > { %v2803_v54 = vpop.permute.xlu0 %1885 }
  0xb3   : > { %720 = vmatpush.msra.mxu0 %v2505_v0  ;;  %v1727_v0 = vld [vmem:[%s2500_s30 + $0x48] sm:$0xff]  ;;  %v1888_v33 = vunpack.i.h.bf16 %v2803_v54 }
  0xb5   : > { %721 = vmatpush.msra.mxu0 %v2547_v11 }
  0xb6   : > { %2116 = vrot.lane.b32.xlu2 %v2590_v22, %s2425_s6 }
  0xb7   : > { %2111 = vrot.lane.b32.xlu1 %v2594_v23, %s2425_s6  ;;  %722 = vmatpush.msra.mxu0 %v2511_v2  ;;  %v2842_v2 = vpack.i.bf16 %v1727_v0, %v2825_v58  ;;  %v1898_v0 = vunpack.i.h.bf16 %v2704_v34 }
  0xb8   : > { %2106 = vrot.lane.b32.xlu0 %v2807_v55, %s2425_s6  ;;  %v2821_v9 = vpop.permute.xlu2 %1955 }
  0xb9   : > { %v2828_v11 = vpop.permute.xlu1 %1905  ;;  %723 = vmatpush.msra.mxu0 %v2553_v13 }
  0xba   : > { %v2830_v59 = vpop.permute.xlu0 %1900  ;;  %v1907_v43 = vunpack.i.l.bf16 %v2828_v11 }
  0xbb   : > { %724 = vmatpush.msra.mxu0 %v2521_v5  ;;  %v1902_v45 = vunpack.i.l.bf16 %v2830_v59 }
  0xbc   : > { %725 = vmatmul.f32.vlgmr.msra.gmra.mxu0 %v2836_v61 }
  0xbd   : > { %789 = vmatpush.msrb.mxu0 %v1848_v37 }
  0xbe   : > { %2131 = vrot.lane.b32.xlu2 %v2528_v7, %s2426_s7 }
  0xbf   : > { %2126 = vrot.lane.b32.xlu1 %v2839_v62, %s2425_s6  ;;  %790 = vmatpush.msrb.mxu0 %v1843_v39  ;;  %v1912_v39 = vunpack.i.l.bf16 %v2730_v47 }
  0xc0   : > { %2121 = vrot.lane.b32.xlu0 %v2842_v2, %s2425_s6  ;;  %v2856_v13 = vpop.permute.xlu2 %1970 }
  0xc1   : > { %v2858_v5 = vpop.permute.xlu1 %1920  ;;  %791 = vmatpush.msrb.mxu0 %v1838_v42  ;;  %v1908_v42 = vunpack.i.h.bf16 %v2828_v11 }
  0xc2   : > { %v2860_v3 = vpop.permute.xlu0 %1915  ;;  %v1923_v35 = vunpack.i.h.bf16 %v2858_v5  ;;  %v1922_v37 = vunpack.i.l.bf16 %v2858_v5 }
  0xc3   : > { %v1918_v28 = vunpack.i.h.bf16 %v2860_v3  ;;  %v1917_v40 = vunpack.i.l.bf16 %v2860_v3  ;;  %792 = vmatpush.msrb.mxu0 %v1833_v44  ;;  %v1903_v44 = vunpack.i.h.bf16 %v2830_v59  ;;  %v439_v29 = vsel %vm435_vm1, %v1907_v43, %v1908_v42 }
  0xc4   : > { %v466_v25 = vsel %vm435_vm1, %v1922_v37, %v1923_v35  ;;  %v1897_v37 = vunpack.i.l.bf16 %v2704_v34 }
  0xc5   : > { %730 = vmatpush.msra.mxu1 %v466_v25  ;;  %793 = vmatpush.msrb.mxu0 %v1828_v48  ;;  %v465_v24 = vsel %vm435_vm1, %v1917_v40, %v1918_v28  ;;  %v464_v48 = vsel %vm435_vm1, %v1912_v39, %v1913_v36  ;;  %v1892_v40 = vunpack.i.l.bf16 %v2801_v52  ;;  %v438_v39 = vsel %vm435_vm1, %v1902_v45, %v1903_v44 }
  0xc6   : > { %2146 = vrot.lane.b32.xlu2 %v2807_v55, %s2426_s7  ;;  %v437_v25 = vsel %vm435_vm1, %v1897_v37, %v1898_v0  ;;  %v1877_v37 = vunpack.i.l.bf16 %v2769_v15 }
  0xc7   : > { %731 = vmatpush.msra.mxu1 %v465_v24  ;;  %794 = vmatpush.msrb.mxu0 %v1823_v53  ;;  %v1893_v53 = vunpack.i.h.bf16 %v2801_v52 }
  0xc8   : > { %2136 = vrot.lane.b32.xlu0 %v2564_v16, %s2426_s7  ;;  %2141 = vrot.lane.b32.xlu1 %v2779_v41, %s2426_s7  ;;  %v2892_v32 = vpop.permute.xlu2 %1985 }
  0xc9   : > { %v2897_v18 = vpop.permute.xlu1 %1935  ;;  %732 = vmatpush.msra.mxu1 %v464_v48  ;;  %795 = vmatpush.msrb.mxu0 %v1818_v57  ;;  %v1887_v57 = vunpack.i.l.bf16 %v2803_v54  ;;  %v436_v43 = vsel %vm435_vm1, %v1892_v40, %v1893_v53  ;;  %v3942_v48 = vunpack.i.h.bf16 %v2769_v15  ;;  %v1872_v40 = vunpack.i.l.bf16 %v2773_v38 }
  0xca   : > { %v2899_v56 = vpop.permute.xlu0 %1930 }
  0xcb   : > { %733 = vmatpush.msra.mxu1 %v439_v29  ;;  %796 = vmatpush.msrb.mxu0 %v1813_v60  ;;  %v1882_v60 = vunpack.i.l.bf16 %v2692_v31  ;;  %v1873_v29 = vunpack.i.h.bf16 %v2773_v38 }
  0xcd   : > { %734 = vmatpush.msra.mxu1 %v438_v39  ;;  %797 = vmatpush.msrb.mxu0 %v2580_v19  ;;  %v409_v39 = vsel %vm378_vm2, %v1882_v60, %v1883_v30  ;;  %v1862_v60 = vunpack.i.l.bf16 %v2734_v50 }
  0xce   : > { %2161 = vrot.lane.b32.xlu2 %v2842_v2, %s2426_s7 }
  0xcf   : > { %735 = vmatpush.msra.mxu1 %v437_v25  ;;  %798 = vmatpush.msrb.mxu0 %v2586_v21  ;;  %v410_v21 = vsel %vm378_vm2, %v1887_v57, %v1888_v33  ;;  %v1868_v25 = vunpack.i.h.bf16 %v2680_v27  ;;  %v408_v57 = vsel %vm378_vm2, %v1877_v37, %v3942_v48  ;;  %v1853_v48 = vunpack.i.h.bf16 %v2672_v26 }
  0xd0   : > { %2151 = vrot.lane.b32.xlu0 %v2594_v23, %s2426_s7  ;;  %2156 = vrot.lane.b32.xlu1 %v2590_v22, %s2426_s7  ;;  %v2930_v19 = vpop.permute.xlu2 %2000 }
  0xd1   : > { %v2935_v24 = vpop.permute.xlu1 %1950  ;;  %736 = vmatpush.msra.mxu1 %v436_v43  ;;  %799 = vmatpush.msrb.mxu0 %v2544_v10  ;;  %v1867_v10 = vunpack.i.l.bf16 %v2680_v27  ;;  %v407_v43 = vsel %vm378_vm2, %v1872_v40, %v1873_v29  ;;  %v1852_v40 = vunpack.i.l.bf16 %v2672_v26  ;;  %v2003_v3 = vunpack.i.h.bf16 %v2930_v19 }
  0xd2   : > { %v2937_v45 = vpop.permute.xlu0 %1945  ;;  %v3945_v27 = vunpack.i.h.bf16 %v2856_v13 }
  0xd3   : > { %737 = vmatpush.msra.mxu1 %v410_v21  ;;  %800 = vmatpush.msrb.mxu0 %v2508_v1  ;;  %v1863_v1 = vunpack.i.h.bf16 %v2734_v50 }
  0xd5   : > { %738 = vmatpush.msra.mxu1 %v409_v39  ;;  %801 = vmatpush.msrb.mxu0 %v2550_v12  ;;  %v1858_v39 = vunpack.i.h.bf16 %v2736_v51 }
  0xd6   : > { %2176 = vrot.lane.b32.xlu2 %v2564_v16, %s2427_s8 }
  0xd7   : > { %739 = vmatpush.msra.mxu1 %v408_v57  ;;  %802 = vmatpush.msrb.mxu0 %v2518_v4  ;;  %v1857_v57 = vunpack.i.l.bf16 %v2736_v51  ;;  %v382_v4 = vsel %vm378_vm2, %v1867_v10, %v1868_v25 }
  0xd8   : > { %2166 = vrot.lane.b32.xlu0 %v2839_v62, %s2426_s7  ;;  %2171 = vrot.lane.b32.xlu1 %v2528_v7, %s2427_s8  ;;  %v2966_v12 = vpop.permute.xlu2 %2015 }
  0xd9   : > { %v2971_v37 = vpop.permute.xlu1 %1965  ;;  %740 = vmatpush.msra.mxu1 %v407_v43  ;;  %803 = vmatpush.msrb.mxu0 %v2556_v14  ;;  %v381_v43 = vsel %vm378_vm2, %v1862_v60, %v1863_v1  ;;  %v380_v14 = vsel %vm378_vm2, %v1857_v57, %v1858_v39  ;;  %v379_v60 = vsel %vm378_vm2, %v1852_v40, %v1853_v48 }
  0xda   : > { %v2973_v21 = vpop.permute.xlu0 %1960 }
  0xdb   : > { %741 = vmatpush.msra.mxu1 %v382_v4  ;;  %804 = vmatpush.msrb.mxu0 %v2524_v6  ;;  %v2998_v6 = vld [vmem:[%s3939_s2 + $0x8] sm:$0xff] }
  0xdc   : > { %805 = vmatmul.f32.vlgmr.msrb.gmra.mxu0 %v2836_v61 }
  0xdd   : > { %742 = vmatpush.msra.mxu1 %v381_v43 }
  0xde   : > { %2191 = vrot.lane.b32.xlu2 %v2839_v62, %s2429_s10 }
  0xdf   : > { %743 = vmatpush.msra.mxu1 %v380_v14 }
  0xe0   : > { %2181 = vrot.lane.b32.xlu0 %v2779_v41, %s2427_s8  ;;  %2186 = vrot.lane.b32.xlu1 %v2807_v55, %s2427_s8  ;;  %v3002_v10 = vpop.permute.xlu2 %2030 }
  0xe1   : > { %v3007_v4 = vpop.permute.xlu1 %1980  ;;  %744 = vmatpush.msra.mxu1 %v379_v60 }
  0xe2   : > { %v3009_v57 = vpop.permute.xlu0 %1975  ;;  %745 = vmatmul.f32.vlgmr.msra.gmra.mxu1 %v2998_v6  ;;  %v1983_v14 = vunpack.i.h.bf16 %v3007_v4  ;;  %v1982_v60 = vunpack.i.l.bf16 %v3007_v4 }
  0xe3   : > { %809 = vmatpush.msrb.mxu1 %v1928_v17 }
  0xe4   : > { %v552_v50 = vsel %vm549_vm3, %v1982_v60, %v1983_v14  ;;  %v3947_v60 = vunpack.i.h.bf16 %v2935_v24 }
  0xe5   : > { %810 = vmatpush.msrb.mxu1 %v1923_v35  ;;  %v2002_v35 = vunpack.i.l.bf16 %v2930_v19 }
  0xe6   : > { %2206 = vrot.lane.b32.xlu2 %v2839_v62, %s2427_s8 }
  0xe7   : > { %811 = vmatpush.msrb.mxu1 %v1918_v28 }
  0xe8   : > { %2196 = vrot.lane.b32.xlu0 %v2842_v2, %s2429_s10  ;;  %2201 = vrot.lane.b32.xlu1 %v2839_v62, %s2432_s12  ;;  %v3024_v40 = vpop.permute.xlu2 %2045 }
  0xe9   : > { %812 = vmatpush.msrb.mxu1 %v1913_v36  ;;  %v3028_v8 = vpop.permute.xlu1 %1995 }
  0xea   : > { %v3030_v17 = vpop.permute.xlu0 %1990  ;;  %v1998_v28 = vunpack.i.h.bf16 %v3028_v8  ;;  %v1997_v36 = vunpack.i.l.bf16 %v3028_v8 }
  0xeb   : > { %813 = vmatpush.msrb.mxu1 %v1908_v42  ;;  %v1993_v42 = vunpack.i.h.bf16 %v3030_v17  ;;  %v1992_v54 = vunpack.i.l.bf16 %v3030_v17 }
  0xec   : > { %v579_v43 = vsel %vm549_vm3, %v1997_v36, %v1998_v28  ;;  %v1967_v36 = vunpack.i.l.bf16 %v2971_v37 }
  0xed   : > { %814 = vmatpush.msrb.mxu1 %v1903_v44  ;;  %v3968_v44 = vunpack.i.h.bf16 %v2769_v15  ;;  %v578_v38 = vsel %vm549_vm3, %v1992_v54, %v1993_v42 }
  0xee   : > { %2221 = vrot.lane.b32.xlu2 %v2842_v2, %s2427_s8 }
  0xef   : > { %815 = vmatpush.msrb.mxu1 %v1898_v0  ;;  %v580_v0 = vsel %vm549_vm3, %v2002_v35, %v2003_v3 }
  0xf0   : > { %2211 = vrot.lane.b32.xlu0 %v2590_v22, %s2429_s10  ;;  %2216 = vrot.lane.b32.xlu1 %v2842_v2, %s2432_s12  ;;  %v3044_v47 = vpop.permute.xlu2 %2060 }
  0xf1   : > { %816 = vmatpush.msrb.mxu1 %v1893_v53  ;;  %v3048_v11 = vpop.permute.xlu1 %2010  ;;  %v1988_v53 = vunpack.i.h.bf16 %v2892_v32 }
  0xf2   : > { %v3050_v59 = vpop.permute.xlu0 %2005 }
  0xf3   : > { %v2008_v5 = vunpack.i.h.bf16 %v3050_v59  ;;  %v2007_v34 = vunpack.i.l.bf16 %v3050_v59  ;;  %817 = vmatpush.msrb.mxu1 %v1888_v33  ;;  %v1987_v33 = vunpack.i.l.bf16 %v2892_v32 }
  0xf5   : > { %v581_v52 = vsel %vm549_vm3, %v2007_v34, %v2008_v5  ;;  %818 = vmatpush.msrb.mxu1 %v1883_v30  ;;  %v1977_v34 = vunpack.i.l.bf16 %v3009_v57  ;;  %v553_v35 = vsel %vm549_vm3, %v1987_v33, %v1988_v53  ;;  %v1957_v33 = vunpack.i.l.bf16 %v2821_v9 }
  0xf6   : > { %749 = vmatpush.msra.mxu2 %v581_v52  ;;  %2236 = vrot.lane.b32.xlu2 %v2590_v22, %s2427_s8  ;;  %v3944_v52 = vunpack.i.h.bf16 %v2971_v37 }
  0xf7   : > { %819 = vmatpush.msrb.mxu1 %v3968_v44  ;;  %v3943_v44 = vunpack.i.h.bf16 %v2973_v21 }
  0xf8   : > { %2226 = vrot.lane.b32.xlu0 %v2594_v23, %s2429_s10  ;;  %750 = vmatpush.msra.mxu2 %v580_v0  ;;  %v3078_v31 = vpop.permute.xlu2 %2075  ;;  %v1962_v0 = vunpack.i.l.bf16 %v2973_v21 }
  0xf9   : > { %2231 = vrot.lane.b32.xlu1 %v2590_v22, %s2432_s12  ;;  %820 = vmatpush.msrb.mxu1 %v1873_v29  ;;  %v3084_v15 = vpop.permute.xlu1 %2025  ;;  %v1978_v29 = vunpack.i.h.bf16 %v3009_v57 }
  0xfa   : > { %v3086_v30 = vpop.permute.xlu0 %2020  ;;  %751 = vmatpush.msra.mxu2 %v579_v43  ;;  %v524_v43 = vsel %vm492_vm4, %v1967_v36, %v3944_v52  ;;  %v1937_v52 = vunpack.i.l.bf16 %v2897_v18 }
  0xfb   : > { %821 = vmatpush.msrb.mxu1 %v1868_v25  ;;  %v1972_v25 = vunpack.i.l.bf16 %v2856_v13  ;;  %v551_v54 = vsel %vm549_vm3, %v1977_v34, %v1978_v29  ;;  %v523_v34 = vsel %vm492_vm4, %v1962_v0, %v3943_v44  ;;  %v1943_v0 = vunpack.i.h.bf16 %v2795_v46 }
  0xfc   : > { %752 = vmatpush.msra.mxu2 %v578_v38  ;;  %v1952_v38 = vunpack.i.l.bf16 %v2935_v24  ;;  %v3949_v44 = vunpack.i.h.bf16 %v2897_v18 }
  0xfd   : > { %822 = vmatpush.msrb.mxu1 %v1863_v1  ;;  %v550_v26 = vsel %vm549_vm3, %v1972_v25, %v3945_v27  ;;  %v3946_v25 = vunpack.i.h.bf16 %v2937_v45 }
  0xfe   : > { %753 = vmatpush.msra.mxu2 %v553_v35  ;;  %2251 = vrot.lane.b32.xlu2 %v2594_v23, %s2427_s8  ;;  %s1663_s8 = sshll.u32 %s2407_s15, 1 }
  0xff   : > { %823 = vmatpush.msrb.mxu1 %v1858_v39  ;;  %p235_p6 = scmp.lt.s32.totalorder %s1663_s8, 7 }
 0x100   : > { %2241 = vrot.lane.b32.xlu0 %v2807_v55, %s2429_s10  ;;  %754 = vmatpush.msra.mxu2 %v552_v50  ;;  %v3118_v1 = vpop.permute.xlu2 %706  ;;  %v1947_v50 = vunpack.i.l.bf16 %v2937_v45 }
 0x101   : > { %2246 = vrot.lane.b32.xlu1 %v2594_v23, %s2432_s12  ;;  %824 = vmatpush.msrb.mxu1 %v1853_v48  ;;  %v3124_v51 = vpop.permute.xlu1 %2040  ;;  %v1958_v48 = vunpack.i.h.bf16 %v2821_v9  ;;  %v3952_v9 = vunpack.i.h.bf16 %v3002_v10  ;;  %s4007_s8 = smov (!%p235_p6, %s1663_s8), 7 }
 0x102   : > { %v3126_v39 = vpop.permute.xlu0 %2035  ;;  %755 = vmatpush.msra.mxu2 %v551_v54  ;;  %825 = vmatmul.f32.vlgmr.msrb.gmra.mxu1 %v2998_v6  ;;  %v496_v27 = vsel %vm492_vm4, %v1947_v50, %v3946_v25  ;;  %v494_v25 = vsel %vm492_vm4, %v1937_v52, %v3949_v44  ;;  %s1664_s15 = sshll.u32 %s4007_s8, 1 }
 0x104   : > { %756 = vmatpush.msra.mxu2 %v550_v26  ;;  %v522_v26 = vsel %vm492_vm4, %v1957_v33, %v1958_v48  ;;  %v3948_v33 = vunpack.i.h.bf16 %v2899_v56 }
 0x106   : > { %757 = vmatpush.msra.mxu2 %v524_v43  ;;  %2266 = vrot.lane.b32.xlu2 %v2564_v16, %s2429_s10  ;;  %v1942_v43 = vunpack.i.l.bf16 %v2795_v46  ;;  %v3955_v46 = vunpack.i.h.bf16 %v3086_v30 }
 0x108   : > { %2256 = vrot.lane.b32.xlu0 %v2779_v41, %s2429_s10  ;;  %758 = vmatpush.msra.mxu2 %v523_v34  ;;  %v3153_v35 = vpop.permute.xlu2 %2101  ;;  %v521_v34 = vsel %vm492_vm4, %v1952_v38, %v3947_v60  ;;  %v495_v38 = vsel %vm492_vm4, %v1942_v43, %v1943_v0  ;;  %v3197_v60 = vld [vmem:[%s3939_s2 + $0x10] sm:$0xff] }
 0x109   : > { %2261 = vrot.lane.b32.xlu1 %v2807_v55, %s2432_s12  ;;  %v3157_v36 = vpop.permute.xlu1 %2055 }
 0x10a   : > { %v3159_v54 = vpop.permute.xlu0 %2050  ;;  %759 = vmatpush.msra.mxu2 %v522_v26  ;;  %v1932_v26 = vunpack.i.l.bf16 %v2899_v56 }
 0x10b   : > { %v3954_v57 = vunpack.i.h.bf16 %v3159_v54 }
 0x10c   : > { %760 = vmatpush.msra.mxu2 %v521_v34  ;;  %v493_v43 = vsel %vm492_vm4, %v1932_v26, %v3948_v33 }
 0x10e   : > { %761 = vmatpush.msra.mxu2 %v496_v27  ;;  %2281 = vrot.lane.b32.xlu2 %v2564_v16, %s2432_s12 }
 0x110   : > { %2271 = vrot.lane.b32.xlu0 %v2779_v41, %s2432_s12  ;;  %762 = vmatpush.msra.mxu2 %v495_v38  ;;  %v3185_v50 = vpop.permute.xlu2 %2116 }
 0x111   : > { %2276 = vrot.lane.b32.xlu1 %v2528_v7, %s2429_s10  ;;  %v3187_v27 = vpop.permute.xlu1 %2070 }
 0x112   : > { %v3189_v34 = vpop.permute.xlu0 %2065  ;;  %763 = vmatpush.msra.mxu2 %v494_v25  ;;  %v2072_v33 = vunpack.i.l.bf16 %v3187_v27 }
 0x113   : > { %v2068_v17 = vunpack.i.h.bf16 %v3189_v34 }
 0x114   : > { %764 = vmatpush.msra.mxu2 %v493_v43  ;;  %v2077_v43 = vunpack.i.l.bf16 %v3078_v31 }
 0x115   : > { %765 = vmatmul.f32.vlgmr.msra.gmra.mxu2 %v3197_v60 }
 0x116   : > { %829 = vmatpush.msrb.mxu2 %v2008_v5  ;;  %2296 = vrot.lane.b32.xlu2 %v2842_v2, %s2428_s9 }
 0x118   : > { %2286 = vrot.lane.b32.xlu0 %v2839_v62, %s2428_s9  ;;  %830 = vmatpush.msrb.mxu2 %v2003_v3  ;;  %v3213_v52 = vpop.permute.xlu2 %2131  ;;  %v2078_v3 = vunpack.i.h.bf16 %v3078_v31 }
 0x119   : > { %2291 = vrot.lane.b32.xlu1 %v2528_v7, %s2432_s12  ;;  %v3215_v25 = vpop.permute.xlu1 %2085 }
 0x11a   : > { %v3217_v26 = vpop.permute.xlu0 %2080  ;;  %831 = vmatpush.msrb.mxu2 %v1998_v28  ;;  %v2088_v59 = vunpack.i.h.bf16 %v3215_v25  ;;  %v2087_v5 = vunpack.i.l.bf16 %v3215_v25  ;;  %v2073_v28 = vunpack.i.h.bf16 %v3187_v27 }
 0x11b   : > { %v2083_v38 = vunpack.i.h.bf16 %v3217_v26  ;;  %v2082_v19 = vunpack.i.l.bf16 %v3217_v26 }
 0x11c   : > { %832 = vmatpush.msrb.mxu2 %v1993_v42  ;;  %v695_v8 = vsel %vm663_vm5, %v2087_v5, %v2088_v59  ;;  %v2067_v42 = vunpack.i.l.bf16 %v3189_v34  ;;  %v2062_v5 = vunpack.i.l.bf16 %v3044_v47  ;;  %v692_v4 = vsel %vm663_vm5, %v2072_v33, %v2073_v28  ;;  %v2371_v34 = vld [vmem:[%s2500_s30 + $0x30] sm:$0xff] }
 0x11d   : > { %769 = vmatpush.msra.mxu3 %v695_v8  ;;  %v694_v44 = vsel %vm663_vm5, %v2082_v19, %v2083_v38  ;;  %v2057_v19 = vunpack.i.l.bf16 %v3157_v36 }
 0x11e   : > { %833 = vmatpush.msrb.mxu2 %v1988_v53  ;;  %2311 = vrot.lane.b32.xlu2 %v2842_v2, %s2430_s11  ;;  %v693_v2 = vsel %vm663_vm5, %v2077_v43, %v2078_v3  ;;  %v3969_v43 = vunpack.i.h.bf16 %v2856_v13  ;;  %v667_v8 = vsel %vm663_vm5, %v2067_v42, %v2068_v17  ;;  %v3953_v13 = vunpack.i.h.bf16 %v3024_v40 }
 0x11f   : > { %770 = vmatpush.msra.mxu3 %v694_v44  ;;  %v2063_v44 = vunpack.i.h.bf16 %v3044_v47  ;;  %v2047_v42 = vunpack.i.l.bf16 %v3024_v40  ;;  %v3976_v47 = vunpack.i.h.bf16 %v3159_v54 }
 0x120   : > { %2301 = vrot.lane.b32.xlu0 %v2839_v62, %s2430_s11  ;;  %834 = vmatpush.msrb.mxu2 %v1983_v14  ;;  %v3249_v32 = vpop.permute.xlu2 %2146  ;;  %v2058_v14 = vunpack.i.h.bf16 %v3157_v36  ;;  %v2372_v36 = vld [vmem:[%s2500_s30 + $0x20] sm:$0xff] }
 0x121   : > { %2306 = vrot.lane.b32.xlu1 %v2590_v22, %s2428_s9  ;;  %v3254_v53 = vpop.permute.xlu1 %2096  ;;  %771 = vmatpush.msra.mxu3 %v693_v2  ;;  %v3970_v2 = vunpack.i.h.bf16 %v2971_v37  ;;  %v666_v33 = vsel %vm663_vm5, %v2062_v5, %v2063_v44 }
 0x122   : > { %v3256_v62 = vpop.permute.xlu0 %2091  ;;  %835 = vmatpush.msrb.mxu2 %v1978_v29  ;;  %v2052_v29 = vunpack.i.l.bf16 %v3159_v54  ;;  %v665_v5 = vsel %vm663_vm5, %v2057_v19, %v2058_v14  ;;  %v2037_v19 = vunpack.i.l.bf16 %v3126_v39 }
 0x123   : > { %772 = vmatpush.msra.mxu3 %v692_v4  ;;  %v3971_v4 = vunpack.i.h.bf16 %v2973_v21  ;;  %v3950_v21 = vunpack.i.h.bf16 %v3126_v39 }
 0x124   : > { %836 = vmatpush.msrb.mxu2 %v3969_v43 }
 0x125   : > { %773 = vmatpush.msra.mxu3 %v667_v8 }
 0x126   : > { %837 = vmatpush.msrb.mxu2 %v3970_v2  ;;  %2326 = vrot.lane.b32.xlu2 %v2807_v55, %s2428_s9  ;;  %v3951_v2 = vunpack.i.h.bf16 %v3124_v51 }
 0x127   : > { %774 = vmatpush.msra.mxu3 %v666_v33  ;;  %v2042_v33 = vunpack.i.l.bf16 %v3124_v51 }
 0x128   : > { %2316 = vrot.lane.b32.xlu0 %v2594_v23, %s2428_s9  ;;  %838 = vmatpush.msrb.mxu2 %v3971_v4  ;;  %v3289_v37 = vpop.permute.xlu2 %2161  ;;  %v3972_v4 = vunpack.i.h.bf16 %v2935_v24  ;;  %v2028_v24 = vunpack.i.h.bf16 %v3084_v15 }
 0x129   : > { %2321 = vrot.lane.b32.xlu1 %v2590_v22, %s2430_s11  ;;  %v3294_v43 = vpop.permute.xlu1 %2111  ;;  %775 = vmatpush.msra.mxu3 %v665_v5  ;;  %v664_v22 = vsel %vm663_vm5, %v2052_v29, %v3954_v57  ;;  %v638_v5 = vsel %vm606_vm6, %v2047_v42, %v3953_v13  ;;  %v3973_v29 = vunpack.i.h.bf16 %v2937_v45  ;;  %v3958_v42 = vunpack.i.h.bf16 %v2966_v12 }
 0x12a   : > { %v3296_v8 = vpop.permute.xlu0 %2106  ;;  %839 = vmatpush.msrb.mxu2 %v1958_v48  ;;  %v2032_v48 = vunpack.i.l.bf16 %v3002_v10  ;;  %v2012_v57 = vunpack.i.l.bf16 %v3048_v11 }
 0x12b   : > { %776 = vmatpush.msra.mxu3 %v664_v22  ;;  %v637_v22 = vsel %vm606_vm6, %v2042_v33, %v3951_v2 }
 0x12c   : > { %840 = vmatpush.msrb.mxu2 %v3972_v4  ;;  %v2027_v4 = vunpack.i.l.bf16 %v3084_v15 }
 0x12d   : > { %777 = vmatpush.msra.mxu3 %v638_v5 }
 0x12e   : > { %841 = vmatpush.msrb.mxu2 %v3973_v29  ;;  %2341 = vrot.lane.b32.xlu2 %v2807_v55, %s2430_s11  ;;  %v636_v55 = vsel %vm606_vm6, %v2037_v19, %v3950_v21  ;;  %v3974_v29 = vunpack.i.h.bf16 %v2897_v18  ;;  %v2017_v21 = vunpack.i.l.bf16 %v2966_v12  ;;  %v2118_v18 = vunpack.i.l.bf16 %v3185_v50 }
 0x12f   : > { %778 = vmatpush.msra.mxu3 %v637_v22 }
 0x130   : > { %2331 = vrot.lane.b32.xlu0 %v2594_v23, %s2430_s11  ;;  %842 = vmatpush.msrb.mxu2 %v1943_v0  ;;  %v3329_v45 = vpop.permute.xlu2 %2176  ;;  %v635_v23 = vsel %vm606_vm6, %v2032_v48, %v3952_v9  ;;  %v2022_v0 = vunpack.i.l.bf16 %v3086_v30  ;;  %v610_v48 = vsel %vm606_vm6, %v2027_v4, %v2028_v24  ;;  %v3957_v9 = vunpack.i.h.bf16 %v3185_v50 }
 0x131   : > { %2336 = vrot.lane.b32.xlu1 %v2779_v41, %s2428_s9  ;;  %v3335_v33 = vpop.permute.xlu1 %2126  ;;  %779 = vmatpush.msra.mxu3 %v636_v55 }
 0x132   : > { %v3337_v5 = vpop.permute.xlu0 %2121  ;;  %843 = vmatpush.msrb.mxu2 %v3974_v29  ;;  %v3959_v19 = vunpack.i.h.bf16 %v3335_v33  ;;  %v2128_v22 = vunpack.i.l.bf16 %v3335_v33  ;;  %v3975_v29 = vunpack.i.h.bf16 %v2899_v56  ;;  %v609_v4 = vsel %vm606_vm6, %v2022_v0, %v3955_v46 }
 0x133   : > { %v3956_v2 = vunpack.i.h.bf16 %v3337_v5  ;;  %v2123_v55 = vunpack.i.l.bf16 %v3337_v5  ;;  %780 = vmatpush.msra.mxu3 %v635_v23  ;;  %v2013_v23 = vunpack.i.h.bf16 %v3048_v11  ;;  %v2114_v56 = vunpack.i.h.bf16 %v3294_v43 }
 0x134   : > { %844 = vmatpush.msrb.mxu2 %v3975_v29  ;;  %v978_v13 = vsel %vm313_vm0, %v2128_v22, %v3959_v19  ;;  %v2113_v29 = vunpack.i.l.bf16 %v3294_v43  ;;  %v608_v0 = vsel %vm606_vm6, %v2017_v21, %v3958_v42  ;;  %v2108_v46 = vunpack.i.l.bf16 %v3296_v8 }
 0x135   : > { %845 = vmatmul.f32.vlgmr.msrb.gmra.mxu2 %v3197_v60  ;;  %781 = vmatpush.msra.mxu3 %v610_v48  ;;  %v977_v22 = vsel %vm313_vm0, %v2123_v55, %v3956_v2  ;;  %v976_v48 = vsel %vm313_vm0, %v2118_v18, %v3957_v9  ;;  %v607_v18 = vsel %vm606_vm6, %v2012_v57, %v2013_v23  ;;  %v2104_v9 = vunpack.i.h.bf16 %v3153_v35 }
 0x136   : > { %1323 = vmatpush.msra.mxu0 %v978_v13  ;;  %2356 = vrot.lane.b32.xlu2 %v2528_v7, %s2428_s9  ;;  %v2103_v42 = vunpack.i.l.bf16 %v3153_v35  ;;  %v2099_v19 = vunpack.i.h.bf16 %v3254_v53  ;;  %v2098_v57 = vunpack.i.l.bf16 %v3254_v53 }
 0x137   : > { %782 = vmatpush.msra.mxu3 %v609_v4  ;;  %v2109_v4 = vunpack.i.h.bf16 %v3296_v8 }
 0x138   : > { %2346 = vrot.lane.b32.xlu0 %v2564_v16, %s2428_s9  ;;  %1324 = vmatpush.msra.mxu0 %v977_v22  ;;  %v3378_v13 = vpop.permute.xlu2 %2191  ;;  %v941_v25 = vsel %vm313_vm0, %v2103_v42, %v2104_v9  ;;  %s1665_s9 = sshll.u32 %s4005_s16, 4 }
 0x139   : > { %2351 = vrot.lane.b32.xlu1 %v2779_v41, %s2430_s11  ;;  %v2194_v55 = vunpack.i.h.bf16 %v3378_v13  ;;  %v2193_v22 = vunpack.i.l.bf16 %v3378_v13  ;;  %783 = vmatpush.msra.mxu3 %v608_v0  ;;  %v3395_v41 = vld [vmem:[%s3939_s2 + $0x18] sm:$0xff]  ;;  %v975_v0 = vsel %vm313_vm0, %v2113_v29, %v2114_v56  ;;  %v2094_v29 = vunpack.i.h.bf16 %v3256_v62  ;;  %s239_s10 = sadd.s32 %s1665_s9, %s1664_s15 }
 0x13a   : > { %v3390_v2 = vpop.permute.xlu0 %2136  ;;  %1325 = vmatpush.msra.mxu0 %v976_v48  ;;  %v3397_v21 = vpop.permute.xlu1 %2141  ;;  %s1666_s16 = sshll.u32 %s239_s10, 3 }
 0x13b   : > { %784 = vmatpush.msra.mxu3 %v607_v18  ;;  %v1202_v48 = vsel %vm549_vm3, %v2193_v22, %v2194_v55  ;;  %v942_v18 = vsel %vm313_vm0, %v2108_v46, %v2109_v4  ;;  %s3873_s13 = scalar_lea.vmem %s3941_s4, %s1666_s16 }
 0x13c   : > { %1326 = vmatpush.msra.mxu0 %v975_v0  ;;  %785 = vmatmul.f32.vlgmr.msra.gmra.mxu3 %v3395_v41  ;;  %v2093_v0 = vunpack.i.l.bf16 %v3256_v62 }
 0x13d   : > { %849 = vmatpush.msrb.mxu3 %v2088_v59  ;;  %1363 = vmatpush.msra.mxu2 %v1202_v48 }
 0x13e   : > { %1327 = vmatpush.msra.mxu0 %v942_v18 }
 0x13f   : > { %850 = vmatpush.msrb.mxu3 %v2083_v38 }
 0x140   : > { %2361 = vrot.lane.b32.xlu0 %v2564_v16, %s2430_s11  ;;  %1328 = vmatpush.msra.mxu0 %v941_v25  ;;  %v3429_v59 = vpop.permute.xlu2 %2206  ;;  %v940_v16 = vsel %vm313_vm0, %v2098_v57, %v2099_v19  ;;  %v3982_v25 = vunpack.i.h.bf16 %v3086_v30  ;;  %v3985_v30 = vunpack.i.h.bf16 %v3185_v50 }
 0x141   : > { %2366 = vrot.lane.b32.xlu1 %v2528_v7, %s2430_s11  ;;  %851 = vmatpush.msrb.mxu3 %v2078_v3  ;;  %v2209_v46 = vunpack.i.h.bf16 %v3429_v59  ;;  %v2208_v26 = vunpack.i.l.bf16 %v3429_v59  ;;  %v939_v7 = vsel %vm313_vm0, %v2093_v0, %v2094_v29 }
 0x142   : > { %v3435_v38 = vpop.permute.xlu0 %2151  ;;  %1329 = vmatpush.msra.mxu0 %v940_v16  ;;  %v3440_v42 = vpop.permute.xlu1 %2156  ;;  %v3984_v16 = vunpack.i.h.bf16 %v2966_v12 }
 0x143   : > { %852 = vmatpush.msrb.mxu3 %v2073_v28  ;;  %v1090_v31 = vsel %vm435_vm1, %v2208_v26, %v2209_v46  ;;  %v2158_v62 = vunpack.i.l.bf16 %v3440_v42 }
 0x144   : > { %1330 = vmatpush.msra.mxu0 %v939_v7  ;;  %1343 = vmatpush.msra.mxu1 %v1090_v31 }
 0x145   : > { %853 = vmatpush.msrb.mxu3 %v2068_v17  ;;  %v3977_v17 = vunpack.i.h.bf16 %v3024_v40  ;;  %v2373_v40 = vld [vmem:[%s2502_s5 + $0x30] sm:$0xff] }
 0x146   : > { %1331 = vmatpush.msra.mxu0 %v2818_v20 }
 0x147   : > { %854 = vmatpush.msrb.mxu3 %v2063_v44  ;;  %v3978_v44 = vunpack.i.h.bf16 %v3124_v51  ;;  %v2374_v51 = vld [vmem:[%s2502_s5 + $0x20] sm:$0xff] }
 0x148   : > { %1332 = vmatpush.msra.mxu0 %v2825_v58  ;;  %v3456_v27 = vpop.permute.xlu2 %2221 }
 0x149   : > { %855 = vmatpush.msrb.mxu3 %v2058_v14  ;;  %v2224_v3 = vunpack.i.h.bf16 %v3456_v27  ;;  %v2223_v28 = vunpack.i.l.bf16 %v3456_v27  ;;  %v3979_v14 = vunpack.i.h.bf16 %v3126_v39  ;;  %v3981_v39 = vunpack.i.h.bf16 %v3335_v33 }
 0x14a   : > { %v3462_v22 = vpop.permute.xlu0 %2166  ;;  %1333 = vmatpush.msra.mxu0 %v2371_v34  ;;  %v3465_v20 = vpop.permute.xlu1 %2171 }
 0x14b   : > { %856 = vmatpush.msrb.mxu3 %v3976_v47  ;;  %v1089_v58 = vsel %vm435_vm1, %v2223_v28, %v2224_v3 }
 0x14c   : > { %1334 = vmatpush.msra.mxu0 %v2372_v36  ;;  %1344 = vmatpush.msra.mxu1 %v1089_v58  ;;  %v2178_v36 = vunpack.i.l.bf16 %v3329_v45 }
 0x14d   : > { %857 = vmatpush.msrb.mxu3 %v3977_v17 }
 0x14e   : > { %1335 = vmatpush.msra.mxu0 %v2798_v49  ;;  %v3980_v49 = vunpack.i.h.bf16 %v3002_v10  ;;  %v3983_v10 = vunpack.i.h.bf16 %v3337_v5 }
 0x14f   : > { %858 = vmatpush.msrb.mxu3 %v3978_v44  ;;  %v2173_v44 = vunpack.i.l.bf16 %v3465_v20 }
 0x150   : > { %1336 = vmatpush.msra.mxu0 %v2764_v63  ;;  %v3479_v54 = vpop.permute.xlu2 %2236 }
 0x151   : > { %859 = vmatpush.msrb.mxu3 %v3979_v14  ;;  %v2239_v48 = vunpack.i.h.bf16 %v3479_v54  ;;  %v2238_v57 = vunpack.i.l.bf16 %v3479_v54 }
 0x152   : > { %v3485_v18 = vpop.permute.xlu0 %2181  ;;  %1337 = vmatpush.msra.mxu0 %v2373_v40  ;;  %v3488_v0 = vpop.permute.xlu1 %2186  ;;  %v2168_v40 = vunpack.i.l.bf16 %v3462_v22 }
 0x153   : > { %860 = vmatpush.msrb.mxu3 %v3980_v49  ;;  %v1088_v63 = vsel %vm435_vm1, %v2238_v57, %v2239_v48  ;;  %v2188_v33 = vunpack.i.l.bf16 %v3488_v0  ;;  %v2184_v50 = vunpack.i.h.bf16 %v3485_v18  ;;  %v2183_v58 = vunpack.i.l.bf16 %v3485_v18 }
 0x154   : > { %1338 = vmatpush.msra.mxu0 %v2374_v51  ;;  %1345 = vmatpush.msra.mxu1 %v1088_v63 }
 0x155   : > { %861 = vmatpush.msrb.mxu3 %v2028_v24  ;;  %1339 = vmatmul.f32.vlgmr.msra.gmra.mxu0 %v2836_v61  ;;  %v2189_v61 = vunpack.i.h.bf16 %v3488_v0  ;;  %v1061_v14 = vsel %vm435_vm1, %v2183_v58, %v2184_v50 }
 0x156   : > { %1403 = vmatpush.msrb.mxu0 %v3981_v39  ;;  %v2164_v39 = vunpack.i.h.bf16 %v3289_v37 }
 0x157   : > { %862 = vmatpush.msrb.mxu3 %v3982_v25  ;;  %v1062_v43 = vsel %vm435_vm1, %v2188_v33, %v2189_v61  ;;  %v2163_v25 = vunpack.i.l.bf16 %v3289_v37  ;;  %v2154_v33 = vunpack.i.h.bf16 %v3435_v38 }
 0x158   : > { %1404 = vmatpush.msrb.mxu0 %v3983_v10  ;;  %v3505_v26 = vpop.permute.xlu2 %2251 }
 0x159   : > { %863 = vmatpush.msrb.mxu3 %v3984_v16  ;;  %v2254_v7 = vunpack.i.h.bf16 %v3505_v26  ;;  %v2253_v15 = vunpack.i.l.bf16 %v3505_v26  ;;  %v2159_v16 = vunpack.i.h.bf16 %v3440_v42 }
 0x15a   : > { %v3511_v24 = vpop.permute.xlu0 %2196  ;;  %1405 = vmatpush.msrb.mxu0 %v3985_v30  ;;  %v3519_v28 = vpop.permute.xlu1 %2201  ;;  %v2153_v30 = vunpack.i.l.bf16 %v3435_v38 }
 0x15b   : > { %v2199_v5 = vunpack.i.h.bf16 %v3511_v24  ;;  %v2198_v31 = vunpack.i.l.bf16 %v3511_v24  ;;  %864 = vmatpush.msrb.mxu3 %v2013_v23  ;;  %v2204_v12 = vunpack.i.h.bf16 %v3519_v28  ;;  %v2203_v34 = vunpack.i.l.bf16 %v3519_v28 }
 0x15c   : > { %v1087_v47 = vsel %vm435_vm1, %v2253_v15, %v2254_v7  ;;  %1406 = vmatpush.msrb.mxu0 %v2114_v56  ;;  %865 = vmatmul.f32.vlgmr.msrb.gmra.mxu3 %v3395_v41  ;;  %v2179_v23 = vunpack.i.h.bf16 %v3329_v45  ;;  %v2174_v56 = vunpack.i.h.bf16 %v3465_v20 }
 0x15d   : > { %v1201_v11 = vsel %vm549_vm3, %v2198_v31, %v2199_v5  ;;  %1346 = vmatpush.msra.mxu1 %v1087_v47  ;;  %v1314_v17 = vsel %vm663_vm5, %v2203_v34, %v2204_v12  ;;  %v2376_v31 = vld [vmem:[%s2500_s30 + $0x48] sm:$0xff]  ;;  %v1033_v34 = vsel %vm378_vm2, %v2163_v25, %v2164_v39  ;;  %v2149_v47 = vunpack.i.h.bf16 %v3249_v32 }
 0x15e   : > { %1364 = vmatpush.msra.mxu2 %v1201_v11  ;;  %1407 = vmatpush.msrb.mxu0 %v2109_v4  ;;  %v1060_v8 = vsel %vm435_vm1, %v2178_v36, %v2179_v23  ;;  %v2169_v4 = vunpack.i.h.bf16 %v3462_v22  ;;  %v1059_v53 = vsel %vm435_vm1, %v2173_v44, %v2174_v56  ;;  %v2148_v36 = vunpack.i.l.bf16 %v3249_v32 }
 0x15f   : > { %1383 = vmatpush.msra.mxu3 %v1314_v17  ;;  %1347 = vmatpush.msra.mxu1 %v1062_v43  ;;  %v2377_v17 = vld [vmem:[%s2500_s30 + $0x38] sm:$0xff]  ;;  %v2143_v25 = vunpack.i.l.bf16 %v3397_v21  ;;  %v746_v24 = vpop.f32.mrf.mxu1 }
 0x160   : > { %1408 = vmatpush.msrb.mxu0 %v2104_v9  ;;  %v1034_v15 = vsel %vm378_vm2, %v2168_v40, %v2169_v4  ;;  %v3596_v11 = vpop.permute.xlu2 %2266 }
 0x161   : > { %1348 = vmatpush.msra.mxu1 %v1061_v14 }
 0x162   : > { %v3553_v57 = vpop.permute.xlu0 %2211  ;;  %1409 = vmatpush.msrb.mxu0 %v2099_v19  ;;  %v3564_v49 = vpop.permute.xlu1 %2216 }
 0x163   : > { %v2214_v35 = vunpack.i.h.bf16 %v3553_v57  ;;  %v2213_v9 = vunpack.i.l.bf16 %v3553_v57  ;;  %v2219_v63 = vunpack.i.h.bf16 %v3564_v49  ;;  %v2218_v51 = vunpack.i.l.bf16 %v3564_v49  ;;  %1349 = vmatpush.msra.mxu1 %v1060_v8 }
 0x164   : > { %1410 = vmatpush.msrb.mxu0 %v2094_v29  ;;  %v2375_v29 = vld [vmem:[%s2500_s30 + $0x58] sm:$0xff]  ;;  %v1032_v8 = vsel %vm378_vm2, %v2158_v62, %v2159_v16 }
 0x165   : > { %v1200_v19 = vsel %vm549_vm3, %v2213_v9, %v2214_v35  ;;  %1350 = vmatpush.msra.mxu1 %v1059_v53  ;;  %v1313_v10 = vsel %vm663_vm5, %v2218_v51, %v2219_v63  ;;  %v2144_v51 = vunpack.i.h.bf16 %v3397_v21  ;;  %v2378_v53 = vld [vmem:[%s2500_s30 + $0x28] sm:$0xff] }
 0x166   : > { %1365 = vmatpush.msra.mxu2 %v1200_v19  ;;  %1411 = vmatpush.msrb.mxu0 %v2375_v29  ;;  %v1031_v19 = vsel %vm378_vm2, %v2153_v30, %v2154_v33  ;;  %v2139_v29 = vunpack.i.h.bf16 %v3390_v2  ;;  %v1006_v30 = vsel %vm378_vm2, %v2148_v36, %v2149_v47 }
 0x167   : > { %1384 = vmatpush.msra.mxu3 %v1313_v10  ;;  %1351 = vmatpush.msra.mxu1 %v1034_v15  ;;  %v2138_v15 = vunpack.i.l.bf16 %v3390_v2 }
 0x168   : > { %1412 = vmatpush.msrb.mxu0 %v2376_v31  ;;  %v2379_v31 = vld [vmem:[%s2502_s5 + $0x58] sm:$0xff] }
 0x169   : > { %1352 = vmatpush.msra.mxu1 %v1033_v34  ;;  %v2134_v34 = vunpack.i.h.bf16 %v3213_v52 }
 0x16a   : > { %v3594_v58 = vpop.permute.xlu0 %2226  ;;  %1413 = vmatpush.msrb.mxu0 %v2377_v17  ;;  %v2133_v17 = vunpack.i.l.bf16 %v3213_v52 }
 0x16b   : > { %v2229_v43 = vunpack.i.h.bf16 %v3594_v58  ;;  %v2228_v44 = vunpack.i.l.bf16 %v3594_v58  ;;  %v3602_v14 = vpop.permute.xlu1 %2231  ;;  %1353 = vmatpush.msra.mxu1 %v1032_v8  ;;  %v1005_v8 = vsel %vm378_vm2, %v2143_v25, %v2144_v51  ;;  %v3645_v25 = vpop.permute.xlu2 %2281 }
 0x16c   : > { %v2234_v40 = vunpack.i.h.bf16 %v3602_v14  ;;  %v2233_v9 = vunpack.i.l.bf16 %v3602_v14  ;;  %1414 = vmatpush.msrb.mxu0 %v2378_v53  ;;  %v2381_v53 = vld [vmem:[%s2502_s5 + $0x38] sm:$0xff] }
 0x16d   : > { %v1199_v10 = vsel %vm549_vm3, %v2228_v44, %v2229_v43  ;;  %1354 = vmatpush.msra.mxu1 %v1031_v19  ;;  %v2380_v44 = vld [vmem:[%s2502_s5 + $0x48] sm:$0xff] }
 0x16e   : > { %1366 = vmatpush.msra.mxu2 %v1199_v10  ;;  %v1312_v62 = vsel %vm663_vm5, %v2233_v9, %v2234_v40  ;;  %1415 = vmatpush.msrb.mxu0 %v2379_v31 }
 0x16f   : > { %1385 = vmatpush.msra.mxu3 %v1312_v62  ;;  %1355 = vmatpush.msra.mxu1 %v1006_v30  ;;  %v1004_v62 = vsel %vm378_vm2, %v2138_v15, %v2139_v29  ;;  %v2383_v15 = vld [vmem:[%s3939_s2] sm:$0xff] }
 0x170   : > { %1416 = vmatpush.msrb.mxu0 %v2380_v44  ;;  %v2382_v44 = vld [vmem:[%s2502_s5 + $0x28] sm:$0xff] }
 0x171   : > { %1356 = vmatpush.msra.mxu1 %v1005_v8  ;;  %v1003_v8 = vsel %vm378_vm2, %v2133_v17, %v2134_v34  ;;  %v2269_v17 = vunpack.i.h.bf16 %v3596_v11 }
 0x172   : > { %v3633_v9 = vpop.permute.xlu0 %2241  ;;  %1417 = vmatpush.msrb.mxu0 %v2381_v53 }
 0x173   : > { %v2244_v36 = vunpack.i.h.bf16 %v3633_v9  ;;  %v2243_v19 = vunpack.i.l.bf16 %v3633_v9  ;;  %v3638_v10 = vpop.permute.xlu1 %2246  ;;  %1357 = vmatpush.msra.mxu1 %v1004_v62  ;;  %v3688_v54 = vpop.permute.xlu2 %2296 }
 0x174   : > { %v2249_v31 = vunpack.i.h.bf16 %v3638_v10  ;;  %v2248_v30 = vunpack.i.l.bf16 %v3638_v10  ;;  %1418 = vmatpush.msrb.mxu0 %v2382_v44 }
 0x175   : > { %v1174_v53 = vsel %vm549_vm3, %v2243_v19, %v2244_v36  ;;  %1419 = vmatmul.f32.vlgmr.msrb.gmra.mxu0 %v2383_v15  ;;  %1358 = vmatpush.msra.mxu1 %v1003_v8  ;;  %v2268_v19 = vunpack.i.l.bf16 %v3596_v11  ;;  %v2283_v15 = vunpack.i.l.bf16 %v3645_v25 }
 0x176   : > { %v1311_v62 = vsel %vm663_vm5, %v2248_v30, %v2249_v31  ;;  %1367 = vmatpush.msra.mxu2 %v1174_v53  ;;  %1359 = vmatmul.f32.vlgmr.msra.gmra.mxu1 %v2998_v6 }
 0x177   : > { %1423 = vmatpush.msrb.mxu1 %v2209_v46  ;;  %1386 = vmatpush.msra.mxu3 %v1311_v62  ;;  %v1172_v27 = vsel %vm549_vm3, %v2268_v19, %v2269_v17 }
 0x179   : > { %1424 = vmatpush.msrb.mxu1 %v2224_v3 }
 0x17a   : > { %v3667_v44 = vpop.permute.xlu0 %2256 }
 0x17b   : > { %v2259_v8 = vunpack.i.h.bf16 %v3667_v44  ;;  %v2258_v30 = vunpack.i.l.bf16 %v3667_v44  ;;  %v3671_v53 = vpop.permute.xlu1 %2261  ;;  %1425 = vmatpush.msrb.mxu1 %v2239_v48  ;;  %v2284_v48 = vunpack.i.h.bf16 %v3645_v25 }
 0x17c   : > { %v2264_v6 = vunpack.i.h.bf16 %v3671_v53  ;;  %v2263_v59 = vunpack.i.l.bf16 %v3671_v53 }
 0x17d   : > { %v1173_v46 = vsel %vm549_vm3, %v2258_v30, %v2259_v8  ;;  %1426 = vmatpush.msrb.mxu1 %v2254_v7  ;;  %v2299_v30 = vunpack.i.h.bf16 %v3688_v54 }
 0x17e   : > { %1368 = vmatpush.msra.mxu2 %v1173_v46  ;;  %v1286_v3 = vsel %vm663_vm5, %v2263_v59, %v2264_v6  ;;  %v2298_v59 = vunpack.i.l.bf16 %v3688_v54 }
 0x17f   : > { %1387 = vmatpush.msra.mxu3 %v1286_v3  ;;  %1427 = vmatpush.msrb.mxu1 %v2189_v61  ;;  %v826_v25 = vpop.f32.mrf.mxu1 }
 0x180   : > { %1369 = vmatpush.msra.mxu2 %v1172_v27 }
 0x181   : > { %1428 = vmatpush.msrb.mxu1 %v2184_v50  ;;  %v1284_v50 = vsel %vm663_vm5, %v2283_v15, %v2284_v48 }
 0x182   : > { %v3696_v26 = vpop.permute.xlu0 %2271 }
 0x183   : > { %v2274_v7 = vunpack.i.h.bf16 %v3696_v26  ;;  %v2273_v62 = vunpack.i.l.bf16 %v3696_v26  ;;  %v3700_v19 = vpop.permute.xlu1 %2276  ;;  %1429 = vmatpush.msrb.mxu1 %v2179_v23  ;;  %v3719_v23 = vpop.permute.xlu2 %2311 }
 0x184   : > { %v2279_v0 = vunpack.i.h.bf16 %v3700_v19  ;;  %v2278_v61 = vunpack.i.l.bf16 %v3700_v19  ;;  %v2313_v3 = vunpack.i.l.bf16 %v3719_v23  ;;  %v3989_v14 = vunpack.i.h.bf16 %v3719_v23 }
 0x185   : > { %v1285_v18 = vsel %vm663_vm5, %v2273_v62, %v2274_v7  ;;  %1430 = vmatpush.msrb.mxu1 %v2174_v56 }
 0x186   : > { %1388 = vmatpush.msra.mxu3 %v1285_v18  ;;  %v1171_v45 = vsel %vm549_vm3, %v2278_v61, %v2279_v0 }
 0x187   : > { %1370 = vmatpush.msra.mxu2 %v1171_v45  ;;  %1431 = vmatpush.msrb.mxu1 %v2169_v4 }
 0x188   : > { %1389 = vmatpush.msra.mxu3 %v1284_v50 }
 0x189   : > { %1432 = vmatpush.msrb.mxu1 %v2164_v39  ;;  %v1145_v39 = vsel %vm492_vm4, %v2298_v59, %v2299_v30 }
 0x18a   : > { %v3725_v20 = vpop.permute.xlu0 %2286 }
 0x18b   : > { %v2289_v56 = vunpack.i.h.bf16 %v3725_v20  ;;  %v2288_v46 = vunpack.i.l.bf16 %v3725_v20  ;;  %v3729_v27 = vpop.permute.xlu1 %2291  ;;  %1433 = vmatpush.msrb.mxu1 %v2159_v16  ;;  %v3961_v16 = vunpack.i.h.bf16 %v3719_v23  ;;  %v3754_v38 = vpop.permute.xlu2 %2326 }
 0x18c   : > { %v2294_v22 = vunpack.i.h.bf16 %v3729_v27  ;;  %v2293_v4 = vunpack.i.l.bf16 %v3729_v27  ;;  %v3967_v18 = vunpack.i.h.bf16 %v3754_v38  ;;  %v2328_v50 = vunpack.i.l.bf16 %v3754_v38 }
 0x18d   : > { %v1146_v37 = vsel %vm492_vm4, %v2288_v46, %v2289_v56  ;;  %1434 = vmatpush.msrb.mxu1 %v2154_v33 }
 0x18e   : > { %1371 = vmatpush.msra.mxu2 %v1146_v37  ;;  %v1283_v42 = vsel %vm663_vm5, %v2293_v4, %v2294_v22 }
 0x18f   : > { %1390 = vmatpush.msra.mxu3 %v1283_v42  ;;  %1435 = vmatpush.msrb.mxu1 %v2149_v47  ;;  %v1118_v42 = vsel %vm492_vm4, %v2328_v50, %v3967_v18 }
 0x190   : > { %1372 = vmatpush.msra.mxu2 %v1145_v39 }
 0x191   : > { %1436 = vmatpush.msrb.mxu1 %v2144_v51  ;;  %v1257_v51 = vsel %vm606_vm6, %v2313_v3, %v3961_v16 }
 0x192   : > { %v3752_v15 = vpop.permute.xlu0 %2301 }
 0x193   : > { %v3962_v33 = vunpack.i.h.bf16 %v3752_v15  ;;  %v2303_v62 = vunpack.i.l.bf16 %v3752_v15  ;;  %v3758_v61 = vpop.permute.xlu1 %2306  ;;  %1437 = vmatpush.msrb.mxu1 %v2139_v29  ;;  %v2384_v29 = vld [vmem:[%s3939_s2 + $0x8] sm:$0xff]  ;;  %v3788_v37 = vpop.permute.xlu2 %2341  ;;  %v3987_v11 = vunpack.i.h.bf16 %v3752_v15 }
 0x194   : > { %v2309_v32 = vunpack.i.h.bf16 %v3758_v61  ;;  %v2308_v47 = vunpack.i.l.bf16 %v3758_v61  ;;  %v3993_v10 = vunpack.i.h.bf16 %v3788_v37 }
 0x195   : > { %v1258_v21 = vsel %vm606_vm6, %v2303_v62, %v3962_v33  ;;  %1438 = vmatpush.msrb.mxu1 %v2134_v34  ;;  %v3963_v62 = vunpack.i.h.bf16 %v3788_v37 }
 0x196   : > { %1391 = vmatpush.msra.mxu3 %v1258_v21  ;;  %v1144_v2 = vsel %vm492_vm4, %v2308_v47, %v2309_v32  ;;  %1439 = vmatmul.f32.vlgmr.msrb.gmra.mxu1 %v2384_v29  ;;  %v2343_v47 = vunpack.i.l.bf16 %v3788_v37 }
 0x197   : > { %1373 = vmatpush.msra.mxu2 %v1144_v2 }
 0x198   : > { %1392 = vmatpush.msra.mxu3 %v1257_v51  ;;  %v766_v57 = vpop.f32.mrf.mxu2 }
 0x19a   : > { %v3780_v45 = vpop.permute.xlu0 %2316 }
 0x19b   : > { %v2319_v52 = vunpack.i.h.bf16 %v3780_v45  ;;  %v2318_v34 = vunpack.i.l.bf16 %v3780_v45  ;;  %v3784_v59 = vpop.permute.xlu1 %2321 }
 0x19c   : > { %v3960_v46 = vunpack.i.h.bf16 %v3784_v59  ;;  %v2323_v4 = vunpack.i.l.bf16 %v3784_v59  ;;  %v3991_v9 = vunpack.i.h.bf16 %v3784_v59 }
 0x19d   : > { %v1143_v39 = vsel %vm492_vm4, %v2318_v34, %v2319_v52 }
 0x19e   : > { %1374 = vmatpush.msra.mxu2 %v1143_v39  ;;  %v1256_v3 = vsel %vm606_vm6, %v2323_v4, %v3960_v46  ;;  %v1230_v39 = vsel %vm606_vm6, %v2343_v47, %v3963_v62 }
 0x19f   : > { %1393 = vmatpush.msra.mxu3 %v1256_v3  ;;  %v3818_v3 = vpop.permute.xlu2 %2356 }
 0x1a0   : > { %1375 = vmatpush.msra.mxu2 %v1118_v42  ;;  %v2359_v46 = vunpack.i.h.bf16 %v3818_v3  ;;  %v2358_v16 = vunpack.i.l.bf16 %v3818_v3 }
 0x1a2   : > { %v3801_v21 = vpop.permute.xlu0 %2331 }
 0x1a3   : > { %v3964_v51 = vunpack.i.h.bf16 %v3801_v21  ;;  %v2333_v2 = vunpack.i.l.bf16 %v3801_v21  ;;  %v3805_v29 = vpop.permute.xlu1 %2336 }
 0x1a4   : > { %v3965_v50 = vunpack.i.h.bf16 %v3805_v29  ;;  %v2338_v34 = vunpack.i.l.bf16 %v3805_v29 }
 0x1a5   : > { %v1255_v4 = vsel %vm606_vm6, %v2333_v2, %v3964_v51 }
 0x1a6   : > { %1394 = vmatpush.msra.mxu3 %v1255_v4  ;;  %v1117_v42 = vsel %vm492_vm4, %v2338_v34, %v3965_v50 }
 0x1a7   : > { %1376 = vmatpush.msra.mxu2 %v1117_v42  ;;  %v1115_v42 = vsel %vm492_vm4, %v2358_v16, %v2359_v46 }
 0x1a8   : > { %1395 = vmatpush.msra.mxu3 %v1230_v39 }
 0x1aa   : > { %v3822_v33 = vpop.permute.xlu0 %2346 }
 0x1ab   : > { %v3966_v2 = vunpack.i.h.bf16 %v3822_v33  ;;  %v2348_v47 = vunpack.i.l.bf16 %v3822_v33  ;;  %v3826_v4 = vpop.permute.xlu1 %2351 }
 0x1ac   : > { %v2354_v62 = vunpack.i.h.bf16 %v3826_v4  ;;  %v2353_v34 = vunpack.i.l.bf16 %v3826_v4 }
 0x1ad   : > { %v1116_v39 = vsel %vm492_vm4, %v2348_v47, %v3966_v2 }
 0x1ae   : > { %1377 = vmatpush.msra.mxu2 %v1116_v39  ;;  %v1229_v51 = vsel %vm606_vm6, %v2353_v34, %v2354_v62 }
 0x1af   : > { %1396 = vmatpush.msra.mxu3 %v1229_v51 }
 0x1b0   : > { %1378 = vmatpush.msra.mxu2 %v1115_v42 }
 0x1b1   : > { %1379 = vmatmul.f32.vlgmr.msra.gmra.mxu2 %v3197_v60 }
 0x1b2   : > { %1443 = vmatpush.msrb.mxu2 %v2194_v55  ;;  %v2362_v50 = vpop.permute.xlu0 %2361  ;;  %v726_v55 = vpop.f32.mrf.mxu0 }
 0x1b3   : > { %v2364_v47 = vunpack.i.h.bf16 %v2362_v50  ;;  %v2363_v2 = vunpack.i.l.bf16 %v2362_v50  ;;  %v2367_v18 = vpop.permute.xlu1 %2366 }
 0x1b4   : > { %1444 = vmatpush.msrb.mxu2 %v2199_v5  ;;  %v2369_v16 = vunpack.i.h.bf16 %v2367_v18  ;;  %v2368_v39 = vunpack.i.l.bf16 %v2367_v18  ;;  %v727_v5 = vadd.f32 %v726_v55, %v3118_v1 }
 0x1b5   : > { %v1228_v34 = vsel %vm606_vm6, %v2363_v2, %v2364_v47 }
 0x1b6   : > { %1445 = vmatpush.msrb.mxu2 %v2214_v35  ;;  %1397 = vmatpush.msra.mxu3 %v1228_v34  ;;  %v1227_v13 = vsel %vm606_vm6, %v2368_v39, %v2369_v16  ;;  %v747_v35 = vadd.f32 %v746_v24, %v727_v5 }
 0x1b8   : > { %1446 = vmatpush.msrb.mxu2 %v2229_v43  ;;  %1398 = vmatpush.msra.mxu3 %v1227_v13  ;;  %v767_v58 = vadd.f32 %v766_v57, %v747_v35  ;;  %v3988_v43 = vunpack.i.h.bf16 %v3805_v29  ;;  %v846_v44 = vpop.f32.mrf.mxu2 }
 0x1b9   : > { %1399 = vmatmul.f32.vlgmr.msra.gmra.mxu3 %v3395_v41 }
 0x1ba   : > { %1447 = vmatpush.msrb.mxu2 %v2244_v36  ;;  %1463 = vmatpush.msrb.mxu3 %v2204_v12  ;;  %v3992_v36 = vunpack.i.h.bf16 %v3801_v21 }
 0x1bc   : > { %1448 = vmatpush.msrb.mxu2 %v2259_v8  ;;  %1464 = vmatpush.msrb.mxu3 %v2219_v63  ;;  %v3986_v63 = vunpack.i.h.bf16 %v3754_v38 }
 0x1be   : > { %1449 = vmatpush.msrb.mxu2 %v2269_v17  ;;  %1465 = vmatpush.msrb.mxu3 %v2234_v40  ;;  %v3990_v40 = vunpack.i.h.bf16 %v3822_v33 }
 0x1bf   : > { %v786_v28 = vpop.f32.mrf.mxu3 }
 0x1c0   : > { %1450 = vmatpush.msrb.mxu2 %v2279_v0  ;;  %1466 = vmatpush.msrb.mxu3 %v2249_v31  ;;  %v787_v12 = vadd.f32 %v786_v28, %v767_v58  ;;  %v806_v31 = vpop.f32.mrf.mxu0 }
 0x1c1   : > { %v807_v17 = vadd.f32 %v806_v31, %v3118_v1 }
 0x1c2   : > { %1451 = vmatpush.msrb.mxu2 %v2289_v56  ;;  %1467 = vmatpush.msrb.mxu3 %v2264_v6  ;;  %v869_v49 = vmax.f32 %v787_v12, 0.0 }
 0x1c3   : > { %v827_v8 = vadd.f32 %v826_v25, %v807_v17 }
 0x1c4   : > { %1452 = vmatpush.msrb.mxu2 %v2299_v30  ;;  %1468 = vmatpush.msrb.mxu3 %v2274_v7  ;;  %871 = vst [vmem:[%s3873_s13] sm:$0xff] %v869_v49 }
 0x1c5   : > { %v847_v53 = vadd.f32 %v846_v44, %v827_v8 }
 0x1c6   : > { %1453 = vmatpush.msrb.mxu2 %v2309_v32  ;;  %1469 = vmatpush.msrb.mxu3 %v2284_v48 }
 0x1c8   : > { %1454 = vmatpush.msrb.mxu2 %v2319_v52  ;;  %1470 = vmatpush.msrb.mxu3 %v2294_v22 }
 0x1ca   : > { %1455 = vmatpush.msrb.mxu2 %v3986_v63  ;;  %1471 = vmatpush.msrb.mxu3 %v3987_v11 }
 0x1cc   : > { %1456 = vmatpush.msrb.mxu2 %v3988_v43  ;;  %1472 = vmatpush.msrb.mxu3 %v3989_v14 }
 0x1ce   : > { %1457 = vmatpush.msrb.mxu2 %v3990_v40  ;;  %1473 = vmatpush.msrb.mxu3 %v3991_v9 }
 0x1d0   : > { %1458 = vmatpush.msrb.mxu2 %v2359_v46  ;;  %1474 = vmatpush.msrb.mxu3 %v3992_v36 }
 0x1d1   : > { %1459 = vmatmul.f32.vlgmr.msrb.gmra.mxu2 %v3197_v60 }
 0x1d2   : > { %1475 = vmatpush.msrb.mxu3 %v3993_v10  ;;  %v1340_v48 = vpop.f32.mrf.mxu0 }
 0x1d3   : > { %v1341_v7 = vadd.f32 %v1340_v48, %v3118_v1 }
 0x1d4   : > { %1476 = vmatpush.msrb.mxu3 %v2354_v62 }
 0x1d6   : > { %1477 = vmatpush.msrb.mxu3 %v2364_v47 }
 0x1d8   : > { %1478 = vmatpush.msrb.mxu3 %v2369_v16 }
 0x1d9   : > { %1479 = vmatmul.f32.vlgmr.msrb.gmra.mxu3 %v3395_v41 }
 0x1df   : > { %v866_v60 = vpop.f32.mrf.mxu3 }
 0x1e0   : > { %v867_v6 = vadd.f32 %v866_v60, %v847_v53 }
 0x1e2   : > { %v870_v54 = vmax.f32 %v867_v6, 0.0 }
 0x1e4   : > { %873 = vst.msk [vmem:[%s3873_s13 + $0x8] sm:$0xff] %vm872_vm7, %v870_v54 }
 0x1f2   : > { %v1420_v56 = vpop.f32.mrf.mxu0 }
 0x1f3   : > { %v1360_v26 = vpop.f32.mrf.mxu1  ;;  %v1421_v22 = vadd.f32 %v1420_v56, %v3118_v1 }
 0x1f4   : > { %v1361_v41 = vadd.f32 %v1360_v26, %v1341_v7 }
 0x213   : > { %v1440_v27 = vpop.f32.mrf.mxu1 }
 0x214   : > { %v1441_v38 = vadd.f32 %v1440_v27, %v1421_v22 }
 0x234   : > { %v1380_v19 = vpop.f32.mrf.mxu2 }
 0x235   : > { %v1381_v0 = vadd.f32 %v1380_v19, %v1361_v41 }
 0x23c   : > { %v1400_v23 = vpop.f32.mrf.mxu3 }
 0x23d   : > { %v1401_v30 = vadd.f32 %v1400_v23, %v1381_v0 }
 0x23f   : > { %v1483_v20 = vmax.f32 %v1401_v30, 0.0 }
 0x241   : > { %1733 = vst [vmem:[%s3873_s13 + $0x10] sm:$0xff] %v1483_v20 }
 0x254   : > { %v1460_v15 = vpop.f32.mrf.mxu2 }
 0x255   : > { %v1461_v33 = vadd.f32 %v1460_v15, %v1441_v38 }
 0x25c   : > { %v1480_v61 = vpop.f32.mrf.mxu3 }
 0x25d   : > { %v1481_v32 = vadd.f32 %v1480_v61, %v1461_v33 }
 0x25f   : > { %v1484_v18 = vmax.f32 %v1481_v32, 0.0 }
 0x261   : > { %1734 = vst.msk [vmem:[%s3873_s13 + $0x18] sm:$0xff] %vm872_vm7, %v1484_v18 }
 0x262 PF: > { %s14_s19 = sadd.s32 1, %s2423_s19   ;;  %s3994_s15 = smov %s2415_s17 }
 0x263   : > { %p11_p7 = scmp.ge.s32.totalorder %s14_s19, 10   ;;  %s3995_s16 = smov %s2419_s18 }
 0x264   : > { %s3996_s17 = smov %s3999_s20  ;;  %s3997_s18 = smov %s4003_s21 }
 0x265   :  { %13 = sbr.rel (!%p11_p7) target bundleno = 3 (0x3), region = 86 }

// kernel: ppcd_forward.4
= control target key start
LH: loop header
LB: loop body
LE: loop exit
PB: predicated region body
PF: predicated region fallthrough
CT: control target
= control target key end

     0   :  { %s534_s9 = smov 0   ;;  %s536_s10 = smov 0   ;;  %s596_s0 = inlined_call_operand.vmem [shape: f32[2,16,8,128], index: 0, kind: input, shape index: {}]   ;;  %s597_s1 = inlined_call_operand.vmem [shape: f32[2,16,8,128], index: 1, kind: input, shape index: {}]   ;;  %s598_s2 = inlined_call_operand.vmem [shape: f32[2,8,8,120], index: 2, kind: output, shape index: {}]  }
   0x1   :  { %s538_s11 = smov 0   ;;  %s540_s12 = smov 0  }
   0x2   :  { %s542_s13 = smov 0  }
   0x3 LB: > { %s21_s14 = sadd.s32 1, %s508_s11  ;;  %s24_s15 = sadd.s32 1, %s512_s12  ;;  %s516_s13 = sphi %s542_s13, %s12_s13   ;;  %s512_s12 = sphi %s540_s12, %s602_s12   ;;  %s508_s11 = sphi %s538_s11, %s601_s11   ;;  %s504_s10 = sphi %s536_s10, %s600_s10   ;;  %s500_s9 = sphi %s534_s9, %s599_s9  }
   0x4   : > { %p22_p0 = scmp.ge.s32.totalorder %s21_s14, 4  ;;  %p393_p1 = scmp.ge.s32.totalorder %s516_s13, 1 }
   0x5   : > { %p136_p2 = scmp.lt.s32.totalorder %s516_s13, 9 }
   0x6   : > { %s604_s14 = smov (%p22_p0, %s21_s14), 0  ;;  %s606_s15 = smov (!%p22_p0, %s24_s15), %s512_s12 }
   0x7   : > { %p137_p3 = pnand %p393_p1, %p136_p2  ;;  %p26_p4 = scmp.ge.s32.totalorder %s606_s15, 2 }
   0x8   : > { %p167_p5 = scmp.lt.s32.totalorder (!%p137_p3), %s504_s10, 1  ;;  %s428_s16 = sshll.u32 (!%p137_p3), %s500_s9, 5 }
   0x9   : > { %s608_s15 = smov (%p26_p4, %s606_s15), 0  ;;  %140 = sbr.rel (%p137_p3) target bundleno = 155 (0x9b), region = 28 }
   0xa   : > { %s518_s26 = smov (!%p137_p3), 120   ;;  %s398_s27 = sshll.u32 (!%p137_p3), %s500_s9, 1 }
   0xb   : > { %p180_p6 = scmp.lt.s32.totalorder (!%p137_p3), %s398_s27, 7 }
   0xe   : > { %s610_s10 = smov (!%p167_p5, %s504_s10), 1  ;;  %s612_s27 = smov (!%p180_p6, %s398_s27), 7  ;;  %vm223_vm0 = vcmask 982016  }
   0xf   : > { %s426_s17 = sshll.u32 %s610_s10, 7  ;;  %s399_s28 = sshll.u32 %s610_s10, 3 }
  0x10   : > { %s171_s20 = scalar_lea.vmem %s596_s0, %s426_s17  ;;  %s176_s23 = scalar_lea.vmem %s597_s1, %s426_s17 }
  0x11   : > { %s190_s24 = scalar_lea.vmem %s171_s20, %s428_s16  ;;  %s192_s25 = scalar_lea.vmem %s176_s23, %s428_s16 }
  0x12   : > { %v191_v0 = vld [vmem:[%s190_s24] sm:$0xff]  ;;  %v405_v3 = vld [vmem:[%s190_s24 + $0x8] sm:$0xff]  ;;  %v411_v4 = vld [vmem:[%s190_s24 + $0x10] sm:$0xff]  ;;  %s183_s29 = sadd.s32 %s399_s28, %s612_s27 }
  0x13   : > { %v193_v1 = vld [vmem:[%s192_s25] sm:$0xff]  ;;  %196 = vrot.lane.b32.xlu0 %v191_v0, %s518_s26  ;;  %214 = vrot.lane.b32.xlu2 %v405_v3, %s518_s26  ;;  %v414_v5 = vld [vmem:[%s192_s25 + $0x10] sm:$0xff]  ;;  %s400_s30 = sshll.u32 %s183_s29, 3 }
  0x14   : > { %201 = vrot.lane.b32.xlu1 %v193_v1, %s518_s26  ;;  %v194_v2 = vmax.f32 %v191_v0, %v193_v1  ;;  %v418_v6 = vld [vmem:[%s190_s24 + $0x18] sm:$0xff]  ;;  %v408_v7 = vld [vmem:[%s192_s25 + $0x8] sm:$0xff]  ;;  %v232_v14 = vmax.f32 %v411_v4, %v414_v5  ;;  %s185_s5 = scalar_lea.vmem %s598_s2, %s400_s30 }
  0x15   : > { %v422_v8 = vld [vmem:[%s192_s25 + $0x18] sm:$0xff] }
  0x1b   : > { %234 = vrot.lane.b32.xlu0 %v411_v4, %s518_s26  ;;  %252 = vrot.lane.b32.xlu2 %v418_v6, %s518_s26 }
  0x1c   : > { %239 = vrot.lane.b32.xlu1 %v414_v5, %s518_s26 }
  0x23   : > { %219 = vrot.lane.b32.xlu0 %v408_v7, %s518_s26 }
  0x24   : > { %257 = vrot.lane.b32.xlu1 %v422_v8, %s518_s26 }
  0x6d   : > { %v215_v13 = vpop.permute.xlu2 %214 }
  0x75   : > { %v253_v22 = vpop.permute.xlu2 %252 }
  0x85   : > { %v197_v9 = vpop.permute.xlu0 %196 }
  0x86   : > { %v202_v10 = vpop.permute.xlu1 %201  ;;  %v199_v11 = vmax.f32 %v194_v2, %v197_v9 }
  0x88   : > { %v204_v12 = vmax.f32 %v199_v11, %v202_v10 }
  0x8a   : > { %v211_v15 = vmax.f32 %v204_v12, %v405_v3 }
  0x8c   : > { %v212_v19 = vmax.f32 %v211_v15, %v408_v7 }
  0x8d   : > { %v235_v16 = vpop.permute.xlu0 %234 }
  0x8e   : > { %v240_v17 = vpop.permute.xlu1 %239  ;;  %v237_v18 = vmax.f32 %v232_v14, %v235_v16  ;;  %v217_v23 = vmax.f32 %v212_v19, %v215_v13 }
  0x90   : > { %v242_v20 = vmax.f32 %v237_v18, %v240_v17 }
  0x92   : > { %v249_v21 = vmax.f32 %v242_v20, %v418_v6 }
  0x94   : > { %v250_v24 = vmax.f32 %v249_v21, %v422_v8 }
  0x95   : > { %v220_v25 = vpop.permute.xlu0 %219 }
  0x96   : > { %v258_v26 = vpop.permute.xlu1 %257  ;;  %v255_v27 = vmax.f32 %v250_v24, %v253_v22  ;;  %v222_v28 = vmax.f32 %v217_v23, %v220_v25 }
  0x98   : > { %224 = vst.msk [vmem:[%s185_s5] sm:$0xff] %vm223_vm0, %v222_v28  ;;  %v260_v29 = vmax.f32 %v255_v27, %v258_v26 }
  0x9a   : > { %423 = vst.msk [vmem:[%s185_s5 + $0x8] sm:$0xff] %vm223_vm0, %v260_v29 }
  0x9b PF: > { %s12_s13 = sadd.s32 1, %s516_s13   ;;  %s599_s9 = smov %s508_s11 }
  0x9c   : > { %p9_p7 = scmp.ge.s32.totalorder %s12_s13, 10   ;;  %s600_s10 = smov %s512_s12 }
  0x9d   : > { %s601_s11 = smov %s604_s14  ;;  %s602_s12 = smov %s608_s15 }
  0x9e   :  { %11 = sbr.rel (!%p9_p7) target bundleno = 3 (0x3), region = 70 }

// kernel: ppcd_forward.7
= control target key start
LH: loop header
LB: loop body
LE: loop exit
PB: predicated region body
PF: predicated region fallthrough
CT: control target
= control target key end

     0   :  { %s1625_s15 = smov 0   ;;  %s1627_s16 = smov 0   ;;  %s2074_s0 = inlined_call_operand.vmem [shape: f32[2,12,8,144], index: 0, kind: input, shape index: {}]   ;;  %s2075_s1 = inlined_call_operand.vmem [shape: f32[2,12,8,144], index: 1, kind: input, shape index: {}]   ;;  %s2076_s2 = inlined_call_operand.vmem [shape: f32[16,432], index: 2, kind: input, shape index: {}]   ;;  %s2077_s3 = inlined_call_operand.vmem [shape: f32[16,1], index: 3, kind: input, shape index: {}]   ;;  %s2078_s4 = inlined_call_operand.vmem [shape: f32[2,8,16,92], index: 4, kind: output, shape index: {}]  }
   0x1   :  { %s1629_s17 = smov 0   ;;  %s1631_s18 = smov 0  }
   0x2   :  { %s1633_s19 = smov 0  }
   0x3 LB: > { %s23_s20 = sadd.s32 1, %s1581_s17  ;;  %s26_s21 = sadd.s32 1, %s1585_s18  ;;  %s1589_s19 = sphi %s1633_s19, %s14_s19   ;;  %s1585_s18 = sphi %s1631_s18, %s2082_s18   ;;  %s1581_s17 = sphi %s1629_s17, %s2081_s17   ;;  %s1577_s16 = sphi %s1627_s16, %s2080_s16   ;;  %s1573_s15 = sphi %s1625_s15, %s2079_s15  }
   0x4   : > { %p24_p0 = scmp.ge.s32.totalorder %s23_s20, 4  ;;  %p1097_p1 = scmp.ge.s32.totalorder %s1589_s19, 1 }
   0x5   : > { %p186_p2 = scmp.lt.s32.totalorder %s1589_s19, 9 }
   0x6   : > { %s2084_s20 = smov (%p24_p0, %s23_s20), 0  ;;  %s2086_s21 = smov (!%p24_p0, %s26_s21), %s1585_s18 }
   0x7   : > { %p187_p3 = pnand %p1097_p1, %p186_p2  ;;  %p28_p4 = scmp.ge.s32.totalorder %s2086_s21, 2 }
   0x8   : > { %p222_p5 = scmp.lt.s32.totalorder (!%p187_p3), %s1577_s16, 1  ;;  %s1157_s23 = sshll.u32 (!%p187_p3), %s1573_s15, 5 }
   0x9   : > { %s2088_s21 = smov (%p28_p4, %s2086_s21), 0  ;;  %190 = sbr.rel (%p187_p3) target bundleno = 457 (0x1c9), region = 36 }
   0xa   : > { %s1591_s6 = smov (!%p187_p3), 126   ;;  %s1592_s7 = smov (!%p187_p3), 124  }
   0xb   : > { %s1593_s8 = smov (!%p187_p3), 104   ;;  %s1594_s9 = smov (!%p187_p3), 102  }
   0xc   : > { %s1595_s10 = smov (!%p187_p3), 100   ;;  %s1596_s11 = smov (!%p187_p3), 80  }
   0xd   : > { %s1597_s12 = smov (!%p187_p3), 78   ;;  %s1598_s13 = smov (!%p187_p3), 76  }
   0xe   : > { %s2090_s16 = smov (!%p222_p5, %s1577_s16), 1  ;;  %vm446_vm0 = vcmask 637952   ;;  %vm409_vm1 = vcmask 654336   ;;  %vm483_vm2 = vcmask 621568   ;;  %vm506_vm3 = vcmask 392192  }
   0xf   : > { %s1169_s22 = smul.u32 192, %s2090_s16  ;;  %s1102_s24 = sshll.u32 %s2090_s16, 4  ;;  %vm607_vm4 = vcmask 752640  }
  0x11   : > { %s226_s26 = scalar_lea.vmem %s2074_s0, %s1169_s22  ;;  %s231_s29 = scalar_lea.vmem %s2075_s1, %s1169_s22 }
  0x12   : > { %s1667_s30 = scalar_lea.vmem %s226_s26, %s1157_s23  ;;  %s1669_s5 = scalar_lea.vmem %s231_s29, %s1157_s23 }
  0x13   : > { %v1672_v0 = vld [vmem:[%s1667_s30 + $0x40] sm:$0xff]  ;;  %v262_v9 = vld [vmem:[%s1669_s5 + $0x8] sm:$0xff]  ;;  %v1738_v21 = vld [vmem:[%s1667_s30 + $0x30] sm:$0xff]  ;;  %s1100_s22 = sshll.u32 %s1573_s15, 1 }
  0x14   : > { %v1675_v1 = vld [vmem:[%s1669_s5 + $0x40] sm:$0xff]  ;;  %v258_v10 = vld [vmem:[%s1667_s30 + $0x8] sm:$0xff]  ;;  %v1741_v22 = vld [vmem:[%s1669_s5 + $0x30] sm:$0xff]  ;;  %p235_p6 = scmp.lt.s32.totalorder %s1100_s22, 7 }
  0x15   : > { %v1678_v2 = vld [vmem:[%s1667_s30] sm:$0xff]  ;;  %v1229_v3 = vpack.i.bf16 %v1675_v1, %v1672_v0  ;;  %v1111_v11 = vld [vmem:[%s1667_s30 + $0x28] sm:$0xff]  ;;  %v1745_v23 = vpack.i.bf16 %v1738_v21, %v1741_v22  ;;  %v1750_v24 = vld [vmem:[%s1667_s30 + $0x10] sm:$0xff] }
  0x16   : > { %v1683_v4 = vld [vmem:[%s1669_s5] sm:$0xff]  ;;  %v1294_v13 = vpack.i.bf16 %v258_v10, %v1678_v2  ;;  %v1119_v15 = vld [vmem:[%s1667_s30 + $0x48] sm:$0xff]  ;;  %v1753_v25 = vld [vmem:[%s1669_s5 + $0x10] sm:$0xff]  ;;  %s2092_s22 = smov (!%p235_p6, %s1100_s22), 7 }
  0x17   : > { %v1219_v5 = vpack.i.bf16 %v1683_v4, %v1678_v2  ;;  %v1688_v6 = vld [vmem:[%s1667_s30 + $0x20] sm:$0xff]  ;;  %1230 = vrot.lane.b32.xlu1 %v1229_v3, %s1591_s6  ;;  %v1299_v12 = vpack.i.bf16 %v262_v9, %v1683_v4  ;;  %v1115_v16 = vld [vmem:[%s1669_s5 + $0x28] sm:$0xff]  ;;  %v1314_v18 = vpack.i.bf16 %v1119_v15, %v1672_v0  ;;  %v1759_v26 = vpack.i.bf16 %v1750_v24, %v1753_v25  ;;  %v1762_v28 = vld [vmem:[%s1669_s5 + $0x50] sm:$0xff]  ;;  %s1101_s23 = sshll.u32 %s2092_s22, 1 }
  0x18   : > { %v1691_v7 = vld [vmem:[%s1669_s5 + $0x20] sm:$0xff]  ;;  %v1304_v14 = vpack.i.bf16 %v1111_v11, %v1688_v6  ;;  %v1123_v17 = vld [vmem:[%s1669_s5 + $0x48] sm:$0xff]  ;;  %v1765_v29 = vld [vmem:[%s1667_s30 + $0x50] sm:$0xff]  ;;  %s239_s25 = sadd.s32 %s1102_s24, %s1101_s23 }
  0x19   : > { %v1239_v8 = vpack.i.bf16 %v1691_v7, %v1688_v6  ;;  %1220 = vrot.lane.b32.xlu0 %v1219_v5, %s1591_s6  ;;  %v1309_v19 = vpack.i.bf16 %v1115_v16, %v1691_v7  ;;  %v1319_v20 = vpack.i.bf16 %v1123_v17, %v1675_v1  ;;  %v1384_v27 = vpack.i.bf16 %v1119_v15, %v1123_v17  ;;  %v1149_v31 = vld [vmem:[%s1669_s5 + $0x58] sm:$0xff]  ;;  %s1103_s26 = sshll.u32 %s239_s25, 3 }
  0x1a   : > { %v1769_v30 = vpack.i.bf16 %v1765_v29, %v1762_v28  ;;  %v1145_v32 = vld [vmem:[%s1667_s30 + $0x58] sm:$0xff]  ;;  %v1404_v33 = vpack.i.bf16 %v1149_v31, %v1762_v28  ;;  %s2049_s15 = scalar_lea.vmem %s2078_s4, %s1103_s26 }
  0x1b   : > { %1240 = vrot.lane.b32.xlu2 %v1239_v8, %s1592_s7  ;;  %v1409_v37 = vpack.i.bf16 %v1145_v32, %v1765_v29  ;;  %v1141_v38 = vld [vmem:[%s1669_s5 + $0x38] sm:$0xff] }
  0x1c   : > { %v1788_v40 = vpack.i.bf16 %v1141_v38, %v1741_v22  ;;  %v1137_v41 = vld [vmem:[%s1667_s30 + $0x38] sm:$0xff] }
  0x1d   : > { %v1800_v43 = vpack.i.bf16 %v1137_v41, %v1738_v21  ;;  %v1129_v44 = vld [vmem:[%s1667_s30 + $0x18] sm:$0xff] }
  0x1e   : > { %v1133_v46 = vld [vmem:[%s1669_s5 + $0x18] sm:$0xff]  ;;  %v1811_v48 = vpack.i.bf16 %v1129_v44, %v1750_v24 }
  0x1f   : > { %1235 = vrot.lane.b32.xlu1 %v1219_v5, %s1592_s7  ;;  %v1814_v50 = vpack.i.bf16 %v1133_v46, %v1753_v25 }
  0x21   : > { %1225 = vrot.lane.b32.xlu0 %v1239_v8, %s1591_s6 }
  0x23   : > { %1245 = vrot.lane.b32.xlu2 %v1229_v3, %s1592_s7 }
  0x27   : > { %1255 = vrot.lane.b32.xlu1 %v1239_v8, %s1593_s8 }
  0x29   : > { %1250 = vrot.lane.b32.xlu0 %v1219_v5, %s1593_s8 }
  0x2b   : > { %1260 = vrot.lane.b32.xlu2 %v1229_v3, %s1593_s8 }
  0x2f   : > { %1270 = vrot.lane.b32.xlu1 %v1239_v8, %s1594_s9 }
  0x31   : > { %1265 = vrot.lane.b32.xlu0 %v1219_v5, %s1594_s9 }
  0x33   : > { %1275 = vrot.lane.b32.xlu2 %v1229_v3, %s1594_s9 }
  0x37   : > { %1285 = vrot.lane.b32.xlu1 %v1239_v8, %s1595_s10 }
  0x39   : > { %1280 = vrot.lane.b32.xlu0 %v1219_v5, %s1595_s10 }
  0x3b   : > { %1290 = vrot.lane.b32.xlu2 %v1229_v3, %s1595_s10 }
  0x3f   : > { %1300 = vrot.lane.b32.xlu1 %v1299_v12, %s1596_s11 }
  0x41   : > { %1295 = vrot.lane.b32.xlu0 %v1294_v13, %s1596_s11 }
  0x43   : > { %1305 = vrot.lane.b32.xlu2 %v1304_v14, %s1596_s11 }
  0x47   : > { %1315 = vrot.lane.b32.xlu1 %v1314_v18, %s1596_s11 }
  0x49   : > { %1310 = vrot.lane.b32.xlu0 %v1309_v19, %s1596_s11 }
  0x4b   : > { %1320 = vrot.lane.b32.xlu2 %v1319_v20, %s1596_s11 }
  0x4f   : > { %1330 = vrot.lane.b32.xlu1 %v1299_v12, %s1597_s12 }
  0x51   : > { %1325 = vrot.lane.b32.xlu0 %v1294_v13, %s1597_s12 }
  0x53   : > { %1335 = vrot.lane.b32.xlu2 %v1304_v14, %s1597_s12 }
  0x57   : > { %1345 = vrot.lane.b32.xlu1 %v1314_v18, %s1597_s12 }
  0x59   : > { %1340 = vrot.lane.b32.xlu0 %v1309_v19, %s1597_s12 }
  0x5b   : > { %1350 = vrot.lane.b32.xlu2 %v1319_v20, %s1597_s12 }
  0x5f   : > { %1360 = vrot.lane.b32.xlu1 %v1299_v12, %s1598_s13 }
  0x61   : > { %1355 = vrot.lane.b32.xlu0 %v1294_v13, %s1598_s13 }
  0x63   : > { %1365 = vrot.lane.b32.xlu2 %v1304_v14, %s1598_s13 }
  0x67   : > { %1375 = vrot.lane.b32.xlu1 %v1229_v3, %s1598_s13 }
  0x69   : > { %1370 = vrot.lane.b32.xlu0 %v1309_v19, %s1598_s13 }
  0x6b   : > { %1380 = vrot.lane.b32.xlu2 %v1745_v23, %s1592_s7 }
  0x6f   : > { %1390 = vrot.lane.b32.xlu1 %v1759_v26, %s1592_s7 }
  0x71   : > { %1385 = vrot.lane.b32.xlu0 %v1384_v27, %s1598_s13 }
  0x73   : > { %1395 = vrot.lane.b32.xlu2 %v1769_v30, %s1591_s6 }
  0x75   : > { %v1241_v34 = vpop.permute.xlu2 %1240 }
  0x76   : > { %v1243_v35 = vunpack.i.h.bf16 %v1241_v34  ;;  %v1242_v36 = vunpack.i.l.bf16 %v1241_v34 }
  0x77   : > { %1405 = vrot.lane.b32.xlu1 %v1404_v33, %s1597_s12 }
  0x78   : > { %513 = vmatpush.msra.mxu0 %v1243_v35 }
  0x79   : > { %1400 = vrot.lane.b32.xlu0 %v1759_v26, %s1595_s10 }
  0x7a   : > { %514 = vmatpush.msra.mxu0 %v1242_v36 }
  0x7b   : > { %1410 = vrot.lane.b32.xlu2 %v1409_v37, %s1597_s12 }
  0x7d   : > { %v1785_v39 = vpop.permute.xlu2 %1245 }
  0x7e   : > { %v1248_v41 = vunpack.i.h.bf16 %v1785_v39 }
  0x7f   : > { %1420 = vrot.lane.b32.xlu1 %v1769_v30, %s1594_s9 }
  0x81   : > { %1415 = vrot.lane.b32.xlu0 %v1745_v23, %s1591_s6 }
  0x83   : > { %1425 = vrot.lane.b32.xlu2 %v1788_v40, %s1597_s12 }
  0x85   : > { %v1797_v42 = vpop.permute.xlu2 %1260 }
  0x86   : > { %v1263_v32 = vunpack.i.h.bf16 %v1797_v42  ;;  %v1262_v34 = vunpack.i.l.bf16 %v1797_v42 }
  0x87   : > { %1435 = vrot.lane.b32.xlu1 %v1759_v26, %s1591_s6 }
  0x89   : > { %1430 = vrot.lane.b32.xlu0 %v1800_v43, %s1597_s12  ;;  %v1231_v45 = vpop.permute.xlu1 %1230 }
  0x8a   : > { %v1233_v56 = vunpack.i.h.bf16 %v1231_v45  ;;  %v1232_v57 = vunpack.i.l.bf16 %v1231_v45 }
  0x8b   : > { %1440 = vrot.lane.b32.xlu2 %v1745_v23, %s1594_s9  ;;  %v1221_v47 = vpop.permute.xlu0 %1220 }
  0x8c   : > { %v1223_v63 = vunpack.i.h.bf16 %v1221_v47  ;;  %v1222_v3 = vunpack.i.l.bf16 %v1221_v47 }
  0x8d   : > { %v1276_v49 = vpop.permute.xlu2 %1275 }
  0x8f   : > { %1450 = vrot.lane.b32.xlu1 %v1811_v48, %s1597_s12 }
  0x91   : > { %1445 = vrot.lane.b32.xlu0 %v1814_v50, %s1597_s12  ;;  %v1236_v51 = vpop.permute.xlu1 %1235 }
  0x92   : > { %v1238_v53 = vunpack.i.h.bf16 %v1236_v51  ;;  %v1237_v54 = vunpack.i.l.bf16 %v1236_v51 }
  0x93   : > { %1455 = vrot.lane.b32.xlu2 %v1759_v26, %s1594_s9  ;;  %v1226_v52 = vpop.permute.xlu0 %1225 }
  0x94   : > { %515 = vmatpush.msra.mxu0 %v1238_v53  ;;  %v1228_v60 = vunpack.i.h.bf16 %v1226_v52  ;;  %v1227_v62 = vunpack.i.l.bf16 %v1226_v52 }
  0x95   : > { %v1822_v55 = vpop.permute.xlu2 %1290 }
  0x96   : > { %516 = vmatpush.msra.mxu0 %v1237_v54 }
  0x97   : > { %1465 = vrot.lane.b32.xlu1 %v1409_v37, %s1596_s11 }
  0x98   : > { %517 = vmatpush.msra.mxu0 %v1233_v56 }
  0x99   : > { %1460 = vrot.lane.b32.xlu0 %v1404_v33, %s1596_s11  ;;  %v1826_v58 = vpop.permute.xlu1 %1255 }
  0x9a   : > { %518 = vmatpush.msra.mxu0 %v1232_v57  ;;  %v1257_v36 = vunpack.i.l.bf16 %v1826_v58 }
  0x9b   : > { %1470 = vrot.lane.b32.xlu2 %v1769_v30, %s1593_s8  ;;  %v1830_v59 = vpop.permute.xlu0 %1250 }
  0x9c   : > { %519 = vmatpush.msra.mxu0 %v1228_v60  ;;  %v1253_v38 = vunpack.i.h.bf16 %v1830_v59 }
  0x9d   : > { %v1832_v61 = vpop.permute.xlu2 %1305 }
  0x9e   : > { %520 = vmatpush.msra.mxu0 %v1227_v62 }
  0x9f   : > { %1480 = vrot.lane.b32.xlu1 %v1404_v33, %s1598_s13 }
  0xa0   : > { %521 = vmatpush.msra.mxu0 %v1223_v63 }
  0xa1   : > { %1475 = vrot.lane.b32.xlu0 %v1788_v40, %s1596_s11  ;;  %v1271_v5 = vpop.permute.xlu1 %1270 }
  0xa2   : > { %522 = vmatpush.msra.mxu0 %v1222_v3  ;;  %v1273_v14 = vunpack.i.h.bf16 %v1271_v5  ;;  %v1272_v17 = vunpack.i.l.bf16 %v1271_v5 }
  0xa3   : > { %1485 = vrot.lane.b32.xlu2 %v1800_v43, %s1596_s11  ;;  %v1266_v8 = vpop.permute.xlu0 %1265 }
  0xa4   : > { %523 = vmatpush.msra.mxu0 %v1675_v1  ;;  %v1278_v1 = vunpack.i.h.bf16 %v1276_v49  ;;  %v1268_v19 = vunpack.i.h.bf16 %v1266_v8  ;;  %v1267_v27 = vunpack.i.l.bf16 %v1266_v8 }
  0xa5   : > { %v1839_v9 = vpop.permute.xlu2 %1320 }
  0xa6   : > { %524 = vmatpush.msra.mxu0 %v1672_v0  ;;  %v1322_v60 = vunpack.i.l.bf16 %v1839_v9 }
  0xa7   : > { %1495 = vrot.lane.b32.xlu1 %v1745_v23, %s1593_s8 }
  0xa8   : > { %525 = vmatpush.msra.mxu0 %v1691_v7 }
  0xa9   : > { %1490 = vrot.lane.b32.xlu0 %v1409_v37, %s1598_s13  ;;  %v1847_v10 = vpop.permute.xlu1 %1285 }
  0xaa   : > { %526 = vmatpush.msra.mxu0 %v1688_v6  ;;  %v1277_v6 = vunpack.i.l.bf16 %v1276_v49 }
  0xab   : > { %1500 = vrot.lane.b32.xlu2 %v1814_v50, %s1596_s11  ;;  %v1281_v11 = vpop.permute.xlu0 %1280 }
  0xac   : > { %v1283_v12 = vunpack.i.h.bf16 %v1281_v11  ;;  %527 = vmatpush.msra.mxu0 %v1683_v4  ;;  %v1282_v0 = vunpack.i.l.bf16 %v1281_v11 }
  0xad   : > { %v1852_v13 = vpop.permute.xlu2 %1335 }
  0xae   : > { %536 = vmatpush.msra.mxu1 %v1283_v12  ;;  %528 = vmatpush.msra.mxu0 %v1678_v2  ;;  %v1338_v49 = vunpack.i.h.bf16 %v1852_v13 }
  0xaf   : > { %1510 = vrot.lane.b32.xlu1 %v1811_v48, %s1596_s11 }
  0xb0   : > { %537 = vmatpush.msra.mxu1 %v1282_v0  ;;  %v1308_v0 = vunpack.i.h.bf16 %v1832_v61 }
  0xb1   : > { %1505 = vrot.lane.b32.xlu0 %v1788_v40, %s1598_s13  ;;  %v1860_v7 = vpop.permute.xlu1 %1300 }
  0xb2   : > { %538 = vmatpush.msra.mxu1 %v1278_v1  ;;  %v1307_v1 = vunpack.i.l.bf16 %v1832_v61 }
  0xb3   : > { %1515 = vrot.lane.b32.xlu2 %v1800_v43, %s1598_s13  ;;  %v1864_v4 = vpop.permute.xlu0 %1295  ;;  %v1247_v43 = vunpack.i.l.bf16 %v1785_v39 }
  0xb4   : > { %539 = vmatpush.msra.mxu1 %v1277_v6 }
  0xb5   : > { %v1351_v2 = vpop.permute.xlu2 %1350 }
  0xb6   : > { %v1353_v15 = vunpack.i.h.bf16 %v1351_v2  ;;  %v1352_v16 = vunpack.i.l.bf16 %v1351_v2  ;;  %540 = vmatpush.msra.mxu1 %v1273_v14  ;;  %v1303_v2 = vunpack.i.h.bf16 %v1860_v7 }
  0xb7   : > { %1525 = vrot.lane.b32.xlu1 %v1814_v50, %s1598_s13  ;;  %v1337_v50 = vunpack.i.l.bf16 %v1852_v13 }
  0xb8   : > { %v452_v18 = vsel %vm446_vm0, %v1352_v16, %v1353_v15  ;;  %541 = vmatpush.msra.mxu1 %v1272_v17  ;;  %v1302_v15 = vunpack.i.l.bf16 %v1860_v7  ;;  %v1293_v7 = vunpack.i.h.bf16 %v1822_v55 }
  0xb9   : > { %1520 = vrot.lane.b32.xlu0 %v1759_v26, %s1593_s8  ;;  %559 = vmatpush.msra.mxu2 %v452_v18  ;;  %v1871_v20 = vpop.permute.xlu1 %1315  ;;  %v1258_v26 = vunpack.i.h.bf16 %v1826_v58  ;;  %v449_v57 = vsel %vm446_vm0, %v1337_v50, %v1338_v49 }
  0xba   : > { %542 = vmatpush.msra.mxu1 %v1268_v19  ;;  %v1318_v5 = vunpack.i.h.bf16 %v1871_v20  ;;  %v1317_v8 = vunpack.i.l.bf16 %v1871_v20  ;;  %v1298_v19 = vunpack.i.h.bf16 %v1864_v4  ;;  %v1297_v20 = vunpack.i.l.bf16 %v1864_v4 }
  0xbb   : > { %1530 = vrot.lane.b32.xlu2 %v1769_v30, %s1595_s10  ;;  %v1875_v31 = vpop.permute.xlu0 %1310  ;;  %v411_v61 = vsel %vm409_vm1, %v1302_v15, %v1303_v2  ;;  %v1292_v4 = vunpack.i.l.bf16 %v1822_v55  ;;  %v1287_v55 = vunpack.i.l.bf16 %v1847_v10 }
  0xbc   : > { %543 = vmatpush.msra.mxu1 %v1267_v27  ;;  %v1313_v12 = vunpack.i.h.bf16 %v1875_v31  ;;  %v1312_v13 = vunpack.i.l.bf16 %v1875_v31  ;;  %v414_v6 = vsel %vm409_vm1, %v1317_v8, %v1318_v5  ;;  %v412_v27 = vsel %vm409_vm1, %v1307_v1, %v1308_v0 }
  0xbd   : > { %v1878_v33 = vpop.permute.xlu2 %1365  ;;  %v410_v31 = vsel %vm409_vm1, %v1297_v20, %v1298_v19 }
  0xbe   : > { %544 = vmatpush.msra.mxu1 %v1263_v32  ;;  %v413_v17 = vsel %vm409_vm1, %v1312_v13, %v1313_v12 }
  0xbf   : > { %1540 = vrot.lane.b32.xlu1 %v1769_v30, %s1592_s7  ;;  %v1252_v30 = vunpack.i.l.bf16 %v1830_v59  ;;  %v1323_v59 = vunpack.i.h.bf16 %v1839_v9 }
  0xc0   : > { %545 = vmatpush.msra.mxu1 %v1262_v34 }
  0xc1   : > { %1535 = vrot.lane.b32.xlu0 %v1811_v48, %s1598_s13  ;;  %v1331_v35 = vpop.permute.xlu1 %1330  ;;  %v415_v9 = vsel %vm409_vm1, %v1322_v60, %v1323_v59 }
  0xc2   : > { %546 = vmatpush.msra.mxu1 %v1258_v26  ;;  %v1333_v52 = vunpack.i.h.bf16 %v1331_v35  ;;  %v1332_v53 = vunpack.i.l.bf16 %v1331_v35 }
  0xc3   : > { %1545 = vrot.lane.b32.xlu2 %v1745_v23, %s1595_s10  ;;  %v1326_v37 = vpop.permute.xlu0 %1325 }
  0xc4   : > { %547 = vmatpush.msra.mxu1 %v1257_v36  ;;  %v1328_v39 = vunpack.i.h.bf16 %v1326_v37  ;;  %v1327_v56 = vunpack.i.l.bf16 %v1326_v37  ;;  %v448_v63 = vsel %vm446_vm0, %v1332_v53, %v1333_v52 }
  0xc5   : > { %v1890_v40 = vpop.permute.xlu2 %1380 }
  0xc6   : > { %548 = vmatpush.msra.mxu1 %v1253_v38  ;;  %v447_v11 = vsel %vm446_vm0, %v1327_v56, %v1328_v39  ;;  %v1288_v38 = vunpack.i.h.bf16 %v1847_v10  ;;  %v1382_v12 = vunpack.i.l.bf16 %v1890_v40 }
  0xc8   : > { %549 = vmatpush.msra.mxu1 %v1252_v30 }
  0xc9   : > { %v1346_v42 = vpop.permute.xlu1 %1345 }
  0xca   : > { %550 = vmatpush.msra.mxu1 %v1248_v41  ;;  %v1348_v44 = vunpack.i.h.bf16 %v1346_v42  ;;  %v1347_v45 = vunpack.i.l.bf16 %v1346_v42 }
  0xcb   : > { %v1341_v46 = vpop.permute.xlu0 %1340 }
  0xcc   : > { %v1343_v23 = vunpack.i.h.bf16 %v1341_v46  ;;  %v1342_v47 = vunpack.i.l.bf16 %v1341_v46  ;;  %551 = vmatpush.msra.mxu1 %v1247_v43  ;;  %v451_v51 = vsel %vm446_vm0, %v1347_v45, %v1348_v44  ;;  %v1368_v44 = vunpack.i.h.bf16 %v1878_v33 }
  0xcd   : > { %v1895_v48 = vpop.permute.xlu2 %1395  ;;  %560 = vmatpush.msra.mxu2 %v451_v51  ;;  %v1367_v45 = vunpack.i.l.bf16 %v1878_v33 }
  0xce   : > { %v450_v54 = vsel %vm446_vm0, %v1342_v47, %v1343_v23  ;;  %v1398_v20 = vunpack.i.h.bf16 %v1895_v48 }
  0xcf   : > { %561 = vmatpush.msra.mxu2 %v450_v54  ;;  %v486_v59 = vsel %vm483_vm2, %v1367_v45, %v1368_v44 }
  0xd1   : > { %v1902_v58 = vpop.permute.xlu1 %1360  ;;  %562 = vmatpush.msra.mxu2 %v449_v57 }
  0xd2   : > { %v1363_v49 = vunpack.i.h.bf16 %v1902_v58  ;;  %v1362_v50 = vunpack.i.l.bf16 %v1902_v58 }
  0xd3   : > { %v1906_v62 = vpop.permute.xlu0 %1355  ;;  %563 = vmatpush.msra.mxu2 %v448_v63 }
  0xd4   : > { %v1358_v10 = vunpack.i.h.bf16 %v1906_v62  ;;  %v1357_v57 = vunpack.i.l.bf16 %v1906_v62  ;;  %v485_v5 = vsel %vm483_vm2, %v1362_v50, %v1363_v49 }
  0xd5   : > { %v1909_v3 = vpop.permute.xlu2 %1410  ;;  %564 = vmatpush.msra.mxu2 %v447_v11 }
  0xd6   : > { %v1413_v23 = vunpack.i.h.bf16 %v1909_v3  ;;  %v1412_v47 = vunpack.i.l.bf16 %v1909_v3  ;;  %v484_v62 = vsel %vm483_vm2, %v1357_v57, %v1358_v10 }
  0xd7   : > { %565 = vmatpush.msra.mxu2 %v415_v9  ;;  %v1383_v9 = vunpack.i.h.bf16 %v1890_v40  ;;  %v1397_v40 = vunpack.i.l.bf16 %v1895_v48  ;;  %v1967_v48 = vld [vmem:[%s2076_s2 + $0x10] sm:$0xff] }
  0xd8   : > { %v806_v3 = vsel %vm446_vm0, %v1412_v47, %v1413_v23 }
  0xd9   : > { %v1376_v14 = vpop.permute.xlu1 %1375  ;;  %566 = vmatpush.msra.mxu2 %v414_v6 }
  0xda   : > { %v1378_v26 = vunpack.i.h.bf16 %v1376_v14  ;;  %v1377_v30 = vunpack.i.l.bf16 %v1376_v14 }
  0xdb   : > { %v1371_v16 = vpop.permute.xlu0 %1370  ;;  %567 = vmatpush.msra.mxu2 %v413_v17 }
  0xdc   : > { %v1373_v41 = vunpack.i.h.bf16 %v1371_v16  ;;  %v1372_v42 = vunpack.i.l.bf16 %v1371_v16 }
  0xdd   : > { %v1426_v18 = vpop.permute.xlu2 %1425  ;;  %568 = vmatpush.msra.mxu2 %v412_v27 }
  0xde   : > { %v487_v52 = vsel %vm483_vm2, %v1372_v42, %v1373_v41  ;;  %v1428_v39 = vunpack.i.h.bf16 %v1426_v18  ;;  %v1427_v56 = vunpack.i.l.bf16 %v1426_v18 }
  0xdf   : > { %569 = vmatpush.msra.mxu2 %v411_v61 }
  0xe0   : > { %v805_v11 = vsel %vm446_vm0, %v1427_v56, %v1428_v39  ;;  %v251_v56 = vld [vmem:[%s2077_s3] sm:$0xff] }
  0xe1   : > { %v1928_v32 = vpop.permute.xlu1 %1390  ;;  %570 = vmatpush.msra.mxu2 %v410_v31 }
  0xe2   : > { %v1392_v14 = vunpack.i.l.bf16 %v1928_v32  ;;  %v1393_v16 = vunpack.i.h.bf16 %v1928_v32 }
  0xe3   : > { %v1386_v34 = vpop.permute.xlu0 %1385  ;;  %571 = vmatpush.msra.mxu2 %v1293_v7 }
  0xe4   : > { %v1388_v35 = vunpack.i.h.bf16 %v1386_v34  ;;  %v1387_v36 = vunpack.i.l.bf16 %v1386_v34 }
  0xe5   : > { %v1932_v37 = vpop.permute.xlu2 %1440  ;;  %572 = vmatpush.msra.mxu2 %v1292_v4 }
  0xe6   : > { %v489_v43 = vsel %vm483_vm2, %v1378_v26, %v1387_v36  ;;  %v488_v46 = vsel %vm483_vm2, %v1377_v30, %v1388_v35  ;;  %v1442_v15 = vunpack.i.l.bf16 %v1932_v37  ;;  %v1443_v17 = vunpack.i.h.bf16 %v1932_v37  ;;  %v1976_v30 = vld [vmem:[%s2076_s2 + $0x18] sm:$0xff] }
  0xe7   : > { %592 = vmatpush.msra.mxu3 %v489_v43  ;;  %573 = vmatpush.msra.mxu2 %v1288_v38  ;;  %v243_v38 = vld [vmem:[%s2076_s2] sm:$0xff] }
  0xe8   : > { %529 = vmatmul.f32.vlgmr.msra.gmra.mxu0 %v243_v38 }
  0xe9   : > { %593 = vmatpush.msra.mxu3 %v488_v46  ;;  %v1406_v51 = vpop.permute.xlu1 %1405  ;;  %574 = vmatpush.msra.mxu2 %v1287_v55  ;;  %v1983_v46 = vld [vmem:[%s2076_s2 + $0x8] sm:$0xff] }
  0xea   : > { %v1408_v53 = vunpack.i.h.bf16 %v1406_v51  ;;  %v1407_v33 = vunpack.i.l.bf16 %v1406_v51  ;;  %575 = vmatmul.f32.vlgmr.msra.gmra.mxu2 %v1967_v48  ;;  %552 = vmatmul.f32.vlgmr.msra.gmra.mxu1 %v1983_v46  ;;  %v1992_v51 = vld [vmem:[%s2076_s2 + $0x30] sm:$0xff] }
  0xeb   : > { %v1401_v54 = vpop.permute.xlu0 %1400  ;;  %594 = vmatpush.msra.mxu3 %v487_v52  ;;  %v247_v52 = vld [vmem:[%s2076_s2 + $0x20] sm:$0xff] }
  0xec   : > { %v1402_v60 = vunpack.i.l.bf16 %v1401_v54  ;;  %v807_v58 = vsel %vm446_vm0, %v1407_v33, %v1408_v53  ;;  %v1403_v8 = vunpack.i.h.bf16 %v1401_v54 }
  0xed   : > { %v1456_v63 = vpop.permute.xlu2 %1455  ;;  %595 = vmatpush.msra.mxu3 %v486_v59  ;;  %896 = vmatpush.msrb.mxu1 %v807_v58  ;;  %v1599_v59 = vmov 0  }
  0xee   : > { %873 = vmatpush.msrb.mxu0 %v1402_v60  ;;  %v1457_v18 = vunpack.i.l.bf16 %v1456_v63  ;;  %v1458_v61 = vunpack.i.h.bf16 %v1456_v63  ;;  %1549 = vset.pattern.permute.xlu0 %v1599_v59 }
  0xef   : > { %596 = vmatpush.msra.mxu3 %v485_v5  ;;  %897 = vmatpush.msrb.mxu1 %v806_v3 }
  0xf0   : > { %874 = vmatpush.msrb.mxu0 %v1403_v8  ;;  %498 = vperm.xlu0 %1549, %v251_v56  }
  0xf1   : > { %597 = vmatpush.msra.mxu3 %v484_v62  ;;  %v1421_v13 = vpop.permute.xlu1 %1420  ;;  %898 = vmatpush.msrb.mxu1 %v805_v11 }
  0xf2   : > { %v1422_v1 = vunpack.i.l.bf16 %v1421_v13  ;;  %v1423_v6 = vunpack.i.h.bf16 %v1421_v13  ;;  %1124 = vmatmul.msk.f32.vlgmr.msra.gmra.mxu3 %vm506_vm3, %v1976_v30  ;;  %578 = vmatmul.f32.gmra.mxu2 %v1992_v51 }
  0xf3   : > { %850 = vmatpush.msrb.mxu3 %v1382_v12  ;;  %v1416_v0 = vpop.permute.xlu0 %1415  ;;  %532 = vmatmul.f32.gmra.mxu0 %v247_v52 }
  0xf4   : > { %875 = vmatpush.msrb.mxu0 %v1422_v1  ;;  %v1417_v34 = vunpack.i.l.bf16 %v1416_v0  ;;  %v1418_v36 = vunpack.i.h.bf16 %v1416_v0  ;;  %1550 = vset.pattern.permute.xlu1 %v1599_v59 }
  0xf5   : > { %851 = vmatpush.msrb.mxu3 %v1383_v9  ;;  %v1471_v2 = vpop.permute.xlu2 %1470 }
  0xf6   : > { %876 = vmatpush.msrb.mxu0 %v1423_v6  ;;  %v1472_v32 = vunpack.i.l.bf16 %v1471_v2  ;;  %v1473_v4 = vunpack.i.h.bf16 %v1471_v2 }
  0xf7   : > { %852 = vmatpush.msrb.mxu3 %v1392_v14 }
  0xf8   : > { %877 = vmatpush.msrb.mxu0 %v1442_v15 }
  0xf9   : > { %853 = vmatpush.msrb.mxu3 %v1393_v16  ;;  %v1436_v19 = vpop.permute.xlu1 %1435 }
  0xfa   : > { %878 = vmatpush.msrb.mxu0 %v1443_v17  ;;  %v1437_v37 = vunpack.i.l.bf16 %v1436_v19  ;;  %v1438_v42 = vunpack.i.h.bf16 %v1436_v19 }
  0xfb   : > { %854 = vmatpush.msrb.mxu3 %v1397_v40  ;;  %v1431_v27 = vpop.permute.xlu0 %1430 }
  0xfc   : > { %v1433_v31 = vunpack.i.h.bf16 %v1431_v27  ;;  %v1432_v7 = vunpack.i.l.bf16 %v1431_v27  ;;  %879 = vmatpush.msrb.mxu0 %v1457_v18 }
  0xfd   : > { %855 = vmatpush.msrb.mxu3 %v1398_v20  ;;  %v1961_v26 = vpop.permute.xlu2 %1485 }
  0xfe   : > { %v804_v35 = vsel %vm446_vm0, %v1432_v7, %v1433_v31  ;;  %880 = vmatpush.msrb.mxu0 %v1458_v61  ;;  %v1488_v3 = vunpack.i.h.bf16 %v1961_v26  ;;  %v1487_v5 = vunpack.i.l.bf16 %v1961_v26 }
  0xff   : > { %856 = vmatpush.msrb.mxu3 %v1417_v34  ;;  %899 = vmatpush.msrb.mxu1 %v804_v35 }
 0x100   : > { %881 = vmatpush.msrb.mxu0 %v1472_v32  ;;  %v768_v1 = vsel %vm409_vm1, %v1487_v5, %v1488_v3 }
 0x101   : > { %857 = vmatpush.msrb.mxu3 %v1418_v36  ;;  %v1451_v41 = vpop.permute.xlu1 %1450 }
 0x102   : > { %v1453_v43 = vunpack.i.h.bf16 %v1451_v41  ;;  %v1452_v44 = vunpack.i.l.bf16 %v1451_v41  ;;  %882 = vmatpush.msrb.mxu0 %v1473_v4 }
 0x103   : > { %858 = vmatpush.msrb.mxu3 %v1437_v37  ;;  %v1446_v45 = vpop.permute.xlu0 %1445 }
 0x104   : > { %v1448_v55 = vunpack.i.h.bf16 %v1446_v45  ;;  %v1447_v23 = vunpack.i.l.bf16 %v1446_v45  ;;  %v802_v49 = vsel %vm446_vm0, %v1452_v44, %v1453_v43 }
 0x105   : > { %859 = vmatpush.msrb.mxu3 %v1438_v42  ;;  %v1501_v50 = vpop.permute.xlu2 %1500 }
 0x106   : > { %v803_v47 = vsel %vm446_vm0, %v1447_v23, %v1448_v55  ;;  %v1503_v13 = vunpack.i.h.bf16 %v1501_v50  ;;  %v1502_v9 = vunpack.i.l.bf16 %v1501_v50 }
 0x107   : > { %860 = vmatpush.msrb.mxu3 %v1762_v28  ;;  %900 = vmatpush.msrb.mxu1 %v803_v47  ;;  %v2002_v28 = vld [vmem:[%s2076_s2 + $0x38] sm:$0xff] }
 0x108   : > { %1125 = vmatmul.msk.f32.gmra.mxu3 %vm506_vm3, %v2002_v28  ;;  %v767_v6 = vsel %vm409_vm1, %v1502_v9, %v1503_v13 }
 0x109   : > { %861 = vmatpush.msrb.mxu3 %v1765_v29  ;;  %901 = vmatpush.msrb.mxu1 %v802_v49  ;;  %v1466_v53 = vpop.permute.xlu1 %1465  ;;  %v2010_v29 = vld [vmem:[%s2076_s2 + $0x28] sm:$0xff] }
 0x10a   : > { %v1468_v33 = vunpack.i.h.bf16 %v1466_v53  ;;  %v1467_v54 = vunpack.i.l.bf16 %v1466_v53  ;;  %555 = vmatmul.f32.gmra.mxu1 %v2010_v29 }
 0x10b   : > { %862 = vmatpush.msrb.mxu3 %v1741_v22  ;;  %v1461_v39 = vpop.permute.xlu0 %1460 }
 0x10c   : > { %v1463_v10 = vunpack.i.h.bf16 %v1461_v39  ;;  %v1462_v57 = vunpack.i.l.bf16 %v1461_v39  ;;  %v770_v60 = vsel %vm409_vm1, %v1467_v54, %v1468_v33 }
 0x10d   : > { %863 = vmatpush.msrb.mxu3 %v1738_v21  ;;  %v1516_v63 = vpop.permute.xlu2 %1515 }
 0x10e   : > { %v771_v22 = vsel %vm409_vm1, %v1462_v57, %v1463_v10  ;;  %v1518_v27 = vunpack.i.h.bf16 %v1516_v63  ;;  %v1517_v61 = vunpack.i.l.bf16 %v1516_v63 }
 0x10f   : > { %902 = vmatpush.msrb.mxu1 %v771_v22  ;;  %864 = vmatpush.msrb.mxu3 %v1753_v25  ;;  %v252_v25 = vld [vmem:[%s2077_s3 + $0x8] sm:$0xff] }
 0x110   : > { %503 = vperm.xlu1 %1550, %v252_v25  }
 0x111   : > { %903 = vmatpush.msrb.mxu1 %v770_v60  ;;  %865 = vmatpush.msrb.mxu3 %v1750_v24  ;;  %v1481_v58 = vpop.permute.xlu1 %1480 }
 0x112   : > { %v1483_v8 = vunpack.i.h.bf16 %v1481_v58  ;;  %v1482_v11 = vunpack.i.l.bf16 %v1481_v58  ;;  %866 = vmatmul.f32.vlgmr.msrb.gmra.mxu3 %v243_v38  ;;  %v840_v38 = vsel %vm483_vm2, %v1517_v61, %v1518_v27 }
 0x113   : > { %v1476_v21 = vpop.permute.xlu0 %1475 }
 0x114   : > { %v1478_v62 = vunpack.i.h.bf16 %v1476_v21  ;;  %v1477_v12 = vunpack.i.l.bf16 %v1476_v21  ;;  %v843_v0 = vsel %vm483_vm2, %v1482_v11, %v1483_v8 }
 0x115   : > { %929 = vmatpush.msrb.mxu2 %v843_v0  ;;  %v1531_v17 = vpop.permute.xlu2 %1530 }
 0x116   : > { %v769_v24 = vsel %vm409_vm1, %v1477_v12, %v1478_v62  ;;  %v1532_v35 = vunpack.i.l.bf16 %v1531_v17  ;;  %v1533_v41 = vunpack.i.h.bf16 %v1531_v17 }
 0x117   : > { %904 = vmatpush.msrb.mxu1 %v769_v24 }
 0x119   : > { %905 = vmatpush.msrb.mxu1 %v768_v1  ;;  %v1496_v14 = vpop.permute.xlu1 %1495 }
 0x11a   : > { %v1497_v15 = vunpack.i.l.bf16 %v1496_v14  ;;  %v1498_v16 = vunpack.i.h.bf16 %v1496_v14  ;;  %869 = vmatmul.f32.gmra.mxu3 %v247_v52 }
 0x11b   : > { %v1491_v2 = vpop.permute.xlu0 %1490  ;;  %906 = vmatpush.msrb.mxu1 %v767_v6 }
 0x11c   : > { %v1493_v40 = vunpack.i.h.bf16 %v1491_v2  ;;  %v1492_v18 = vunpack.i.l.bf16 %v1491_v2  ;;  %883 = vmatpush.msrb.mxu0 %v1497_v15 }
 0x11d   : > { %v1546_v4 = vpop.permute.xlu2 %1545 }
 0x11e   : > { %v842_v19 = vsel %vm483_vm2, %v1492_v18, %v1493_v40  ;;  %884 = vmatpush.msrb.mxu0 %v1498_v16  ;;  %v1547_v42 = vunpack.i.l.bf16 %v1546_v4  ;;  %v1548_v23 = vunpack.i.h.bf16 %v1546_v4 }
 0x11f   : > { %930 = vmatpush.msrb.mxu2 %v842_v19 }
 0x121   : > { %v1511_v20 = vpop.permute.xlu1 %1510 }
 0x122   : > { %v1513_v31 = vunpack.i.h.bf16 %v1511_v20  ;;  %v1512_v7 = vunpack.i.l.bf16 %v1511_v20 }
 0x123   : > { %v1506_v34 = vpop.permute.xlu0 %1505 }
 0x124   : > { %v1508_v32 = vunpack.i.h.bf16 %v1506_v34  ;;  %v1507_v26 = vunpack.i.l.bf16 %v1506_v34  ;;  %v766_v36 = vsel %vm409_vm1, %v1512_v7, %v1513_v31 }
 0x125   : > { %907 = vmatpush.msrb.mxu1 %v766_v36 }
 0x126   : > { %v841_v37 = vsel %vm483_vm2, %v1507_v26, %v1508_v32 }
 0x127   : > { %931 = vmatpush.msrb.mxu2 %v841_v37  ;;  %908 = vmatpush.msrb.mxu1 %v1532_v35 }
 0x129   : > { %932 = vmatpush.msrb.mxu2 %v840_v38  ;;  %v1526_v43 = vpop.permute.xlu1 %1525  ;;  %909 = vmatpush.msrb.mxu1 %v1533_v41 }
 0x12a   : > { %v1528_v44 = vunpack.i.h.bf16 %v1526_v43  ;;  %v1527_v45 = vunpack.i.l.bf16 %v1526_v43 }
 0x12b   : > { %v1521_v55 = vpop.permute.xlu0 %1520  ;;  %910 = vmatpush.msrb.mxu1 %v1547_v42 }
 0x12c   : > { %v1522_v47 = vunpack.i.l.bf16 %v1521_v55  ;;  %v839_v49 = vsel %vm483_vm2, %v1527_v45, %v1528_v44  ;;  %v1523_v50 = vunpack.i.h.bf16 %v1521_v55 }
 0x12d   : > { %933 = vmatpush.msrb.mxu2 %v839_v49  ;;  %911 = vmatpush.msrb.mxu1 %v1548_v23 }
 0x12e   : > { %885 = vmatpush.msrb.mxu0 %v1522_v47  ;;  %912 = vmatmul.f32.vlgmr.msrb.gmra.mxu1 %v1967_v48 }
 0x130   : > { %886 = vmatpush.msrb.mxu0 %v1523_v50 }
 0x131   : > { %v1541_v52 = vpop.permute.xlu1 %1540 }
 0x132   : > { %v1542_v33 = vunpack.i.l.bf16 %v1541_v52  ;;  %v1543_v54 = vunpack.i.h.bf16 %v1541_v52 }
 0x133   : > { %v1536_v53 = vpop.permute.xlu0 %1535 }
 0x134   : > { %v1538_v39 = vunpack.i.h.bf16 %v1536_v53  ;;  %v1537_v56 = vunpack.i.l.bf16 %v1536_v53  ;;  %887 = vmatpush.msrb.mxu0 %v1542_v33 }
 0x136   : > { %v838_v10 = vsel %vm483_vm2, %v1537_v56, %v1538_v39  ;;  %888 = vmatpush.msrb.mxu0 %v1543_v54  ;;  %915 = vmatmul.f32.gmra.mxu1 %v1992_v51 }
 0x137   : > { %934 = vmatpush.msrb.mxu2 %v838_v10  ;;  %889 = vmatmul.f32.vlgmr.msrb.gmra.mxu0 %v1983_v46 }
 0x138   : > { %1150 = vmatmul.msk.f32.vlgmr.msrb.gmra.mxu2 %vm506_vm3, %v1976_v30 }
 0x13f   : > { %892 = vmatmul.f32.gmra.mxu0 %v2010_v29 }
 0x140   : > { %1151 = vmatmul.msk.f32.gmra.mxu2 %vm506_vm3, %v2002_v28 }
 0x162   : > { %v499_v48 = vpop.permute.xlu0 %498 }
 0x165   : > { %v530_v57 = vpop.f32.mrf.mxu0 }
 0x166   : > { %v531_v59 = vadd.f32 %v530_v57, %v499_v48 }
 0x167   : > { %v553_v22 = vpop.f32.mrf.mxu1 }
 0x168   : > { %v554_v60 = vadd.f32 %v553_v22, %v531_v59 }
 0x16d   : > { %v576_v30 = vpop.f32.mrf.mxu2 }
 0x16e   : > { %v577_v46 = vadd.f32 %v576_v30, %v554_v60 }
 0x170   : > { %v533_v28 = vpop.f32.mrf.mxu0 }
 0x175   : > { %v599_v51 = vpop.f32.mrf.mxu3  ;;  %v579_v11 = vpop.f32.mrf.mxu2 }
 0x176   : > { %v600_v63 = vadd.f32 %v599_v51, %v577_v46 }
 0x178   : > { %v605_v3 = vmax.f32 %v600_v63, 0.0 }
 0x17a   : > { %608 = vst.msk [vmem:[%s2049_s15] sm:$0xff] %vm607_vm4, %v605_v3 }
 0x182   : > { %v504_v58 = vpop.permute.xlu1 %503 }
 0x183   : > { %v534_v29 = vadd.f32 %v533_v28, %v504_v58 }
 0x187   : > { %v556_v5 = vpop.f32.mrf.mxu1 }
 0x188   : > { %v557_v8 = vadd.f32 %v556_v5, %v534_v29 }
 0x18a   : > { %v580_v21 = vadd.f32 %v579_v11, %v557_v8 }
 0x18b   : > { %v602_v62 = vpop.f32.mrf.mxu3 }
 0x18c   : > { %v603_v12 = vadd.f32 %v602_v62, %v580_v21 }
 0x18e   : > { %v606_v13 = vmax.f32 %v603_v12, 0.0 }
 0x190   : > { %609 = vst.msk [vmem:[%s2049_s15 + $0x8] sm:$0xff] %vm607_vm4, %v606_v13 }
 0x195   : > { %v867_v9 = vpop.f32.mrf.mxu3 }
 0x196   : > { %v868_v25 = vadd.f32 %v867_v9, %v499_v48 }
 0x19d   : > { %v870_v6 = vpop.f32.mrf.mxu3 }
 0x19e   : > { %v871_v2 = vadd.f32 %v870_v6, %v504_v58 }
 0x1ab   : > { %v913_v0 = vpop.f32.mrf.mxu1 }
 0x1b3   : > { %v916_v40 = vpop.f32.mrf.mxu1 }
 0x1b4   : > { %v890_v24 = vpop.f32.mrf.mxu0 }
 0x1b5   : > { %v891_v1 = vadd.f32 %v890_v24, %v868_v25 }
 0x1b7   : > { %v914_v14 = vadd.f32 %v913_v0, %v891_v1 }
 0x1bb   : > { %v936_v15 = vpop.f32.mrf.mxu2 }
 0x1bc   : > { %v937_v16 = vadd.f32 %v936_v15, %v914_v14  ;;  %v893_v17 = vpop.f32.mrf.mxu0 }
 0x1bd   : > { %v894_v19 = vadd.f32 %v893_v17, %v871_v2 }
 0x1be   : > { %v942_v18 = vmax.f32 %v937_v16, 0.0 }
 0x1bf   : > { %v917_v20 = vadd.f32 %v916_v40, %v894_v19 }
 0x1c0   : > { %1152 = vst.msk [vmem:[%s2049_s15 + $0x10] sm:$0xff] %vm607_vm4, %v942_v18 }
 0x1c3   : > { %v939_v27 = vpop.f32.mrf.mxu2 }
 0x1c4   : > { %v940_v61 = vadd.f32 %v939_v27, %v917_v20 }
 0x1c6   : > { %v943_v31 = vmax.f32 %v940_v61, 0.0 }
 0x1c8   : > { %1153 = vst.msk [vmem:[%s2049_s15 + $0x18] sm:$0xff] %vm607_vm4, %v943_v31 }
 0x1c9 PF: > { %s14_s19 = sadd.s32 1, %s1589_s19   ;;  %s2079_s15 = smov %s1581_s17 }
 0x1ca   : > { %p11_p7 = scmp.ge.s32.totalorder %s14_s19, 10   ;;  %s2080_s16 = smov %s1585_s18 }
 0x1cb   : > { %s2081_s17 = smov %s2084_s20  ;;  %s2082_s18 = smov %s2088_s21 }
 0x1cc   :  { %13 = sbr.rel (!%p11_p7) target bundleno = 3 (0x3), region = 82 }

</bundles_post_ra>
